<compile_context>
chip_gen: v6e
topology: v6e:2x2x1
jax: 0.10.0
libtpu: 0.0.40
codegen_flags: <defaults>
</compile_context>

<pallas_src>
import jax
import jax.numpy as jnp
from jax.experimental import pallas as pl
from jax.experimental.pallas import tpu as pltpu

EPS = 1e-5
LPAD = 8      # left W-halo width (sublane-aligned interior writes)
RPAD = 8      # right W-halo width (only 1 column is read; 8 keeps stores aligned)
LANE = 128


# ----------------------------------------------------------------------------
# Fused kernel: one grid step = one batch element; everything stays in VMEM.
# ----------------------------------------------------------------------------
def _conv_block_kernel(x_ref, w1_ref, w2_ref, sb_ref, p2_ref, out_ref,
                       pad1_ref, pad2_ref):
    # x_ref:   (1, H, W, Cin)          input tile (NHWC), compute dtype
    # w1_ref:  (9, Cin,    Cp)         conv1 taps, tap-major
    # w2_ref:  (9, Cp,     Cp)         conv2 taps, tap-major
    # sb_ref:  (4, Cp) f32             rows = [scale1, bias1, scale2, bias2]
    # p2_ref:  (W2, 2*W)               0.25 pooling matrix (precomputed)
    # out_ref: (1, H2*W2, Cp) f32      pooled output (row = h2*W2 + w2)
    # pad*_ref:(H+2, LPAD+W+RPAD, C)   zero-halo conv-input slabs (compute dtype)
    H, W, Cin = x_ref.shape[1], x_ref.shape[2], x_ref.shape[3]
    Cp = out_ref.shape[2]
    H2, W2 = H // 2, W // 2
    cdt = pad1_ref.dtype
    wpad = LPAD + W + RPAD

    def zero_halo(pad_ref, c):
        # Only the halo bands (interior is fully overwritten every step).
        # Re-zeroed every step so the kernel is safe under megacore grid
        # sharding (no reliance on program_id==0 ever running on this core).
        pad_ref[pl.ds(0, 1), :, :] = jnp.zeros((1, wpad, c), cdt)
        pad_ref[pl.ds(H + 1, 1), :, :] = jnp.zeros((1, wpad, c), cdt)
        pad_ref[:, pl.ds(0, LPAD), :] = jnp.zeros((H + 2, LPAD, c), cdt)
        pad_ref[:, pl.ds(LPAD + W, RPAD), :] = jnp.zeros((H + 2, RPAD, c), cdt)

    def conv3x3(pad_ref, w_ref, cin):
        # 9 accumulated MXU matmuls over shifted views of the halo slab
        # (no im2col scratch, no misaligned VMEM->VMEM copies).
        acc = None
        for ky in range(3):
            for kx in range(3):
                t = ky * 3 + kx
                win = pad_ref[pl.ds(ky, H), pl.ds(LPAD - 1 + kx, W), :]
                part = jnp.dot(win.reshape(H * W, cin), w_ref[t],
                               preferred_element_type=jnp.float32)
                acc = part if acc is None else acc + part
        return acc                                          # (H*W, Cp) f32

    # ---- conv1 + bn1 + relu -------------------------------------------------
    zero_halo(pad1_ref, Cin)
    pad1_ref[pl.ds(1, H), pl.ds(LPAD, W), :] = x_ref[0]     # aligned interior write
    scale1 = sb_ref[0:1, :]                                  # hoisted BN affine
    bias1 = sb_ref[1:2, :]
    y1 = jnp.maximum(conv3x3(pad1_ref, w1_ref, Cin) * scale1 + bias1, 0.0)

    # ---- conv2 + bn2 + relu (intermediate never leaves VMEM) ----------------
    zero_halo(pad2_ref, Cp)
    pad2_ref[pl.ds(1, H), pl.ds(LPAD, W), :] = y1.reshape(H, W, Cp).astype(cdt)
    scale2 = sb_ref[2:3, :]
    bias2 = sb_ref[3:4, :]
    y2 = jnp.maximum(conv3x3(pad2_ref, w2_ref, Cp) * scale2 + bias2, 0.0)

    # ---- 2x2 average pool ---------------------------------------------------
    # Per output row-pair h2: take the 2W consecutive rows of y2 (image rows
    # 2h2 and 2h2+1, an aligned static slice) and contract with the tiny
    # precomputed (W2, 2W) 0.25-matrix. No per-step mask construction, and the
    # pool matmul is a few % of conv MACs at any size.
    p2 = p2_ref[...]
    y2c = y2.astype(p2.dtype)
    for h2 in range(H2):
        blk = y2c[2 * h2 * W:(2 * h2 + 2) * W, :]            # (2W, Cp)
        out_ref[0, pl.ds(h2 * W2, W2), :] = jnp.dot(
            p2, blk, preferred_element_type=jnp.float32).astype(out_ref.dtype)


# ----------------------------------------------------------------------------
# Wrapper (layout transposes, BN folding, weight flattening, Cout padding)
# ----------------------------------------------------------------------------
def conv_block_forward(x_nchw, params, pool_type="avg",
                       compute_dtype=jnp.bfloat16):
    """ConvBlock.forward: NCHW in -> NCHW out (spatial halved by the 2x2 pool)."""
    if pool_type == "max":
        # TODO(synk): max-pool branch not exercised (module default is 'avg').
        raise NotImplementedError("max pool branch not implemented")
    if pool_type != "avg":
        raise Exception("Incorrect argument!")

    N, Cin, H, W = x_nchw.shape
    assert H % 2 == 0 and W % 2 == 0, "2x2 pool expects even spatial dims"
    Cout = params["w1"].shape[0]
    Cout_p = max(LANE, ((Cout + LANE - 1) // LANE) * LANE)   # lane-dense output
    H2, W2 = H // 2, W // 2

    x = jnp.transpose(x_nchw, (0, 2, 3, 1)).astype(compute_dtype)  # NCHW->NHWC

    def fold(w, g, b, m, v, cin_pad):
        co, ci = w.shape[0], w.shape[1]
        scale = (g / jnp.sqrt(v + EPS)).astype(jnp.float32)
        bias = (b - m * scale).astype(jnp.float32)
        # (Cout, Cin, 3, 3) -> (ky, kx, ci, co) -> (9, ci, co); tap order
        # t = ky*3 + kx matches the in-kernel loop.
        wt = jnp.transpose(w, (2, 3, 1, 0)).reshape(9, ci, co)
        wt = jnp.pad(wt, ((0, 0), (0, cin_pad - ci), (0, Cout_p - co)))
        scale = jnp.pad(scale, (0, Cout_p - co))
        bias = jnp.pad(bias, (0, Cout_p - co))
        return wt.astype(compute_dtype), scale, bias

    w1, s1, b1 = fold(params["w1"], params["gamma1"], params["beta1"],
                      params["mean1"], params["var1"], Cin)
    w2, s2, b2 = fold(params["w2"], params["gamma2"], params["beta2"],
                      params["mean2"], params["var2"], Cout_p)
    sb = jnp.stack([s1, b1, s2, b2], axis=0).astype(jnp.float32)   # (4, Cout_p)

    # Tiny 2x2-avg-pool matrix, precomputed once (review item: no per-step
    # iota/mask build). p2[w2, dh*W + w] = 0.25 iff w // 2 == w2.
    wj = jnp.arange(2 * W) % W
    p2 = jnp.where((wj[None, :] // 2) == jnp.arange(W2)[:, None],
                   0.25, 0.0).astype(compute_dtype)                 # (W2, 2W)

    out = pl.pallas_call(
        _conv_block_kernel,
        out_shape=jax.ShapeDtypeStruct((N, H2 * W2, Cout_p), jnp.float32),
        grid=(N,),
        in_specs=[
            pl.BlockSpec((1, H, W, Cin), lambda n: (n, 0, 0, 0)),
            pl.BlockSpec((9, Cin, Cout_p), lambda n: (0, 0, 0)),
            pl.BlockSpec((9, Cout_p, Cout_p), lambda n: (0, 0, 0)),
            pl.BlockSpec((4, Cout_p), lambda n: (0, 0)),
            pl.BlockSpec((W2, 2 * W), lambda n: (0, 0)),
        ],
        out_specs=pl.BlockSpec((1, H2 * W2, Cout_p), lambda n: (n, 0, 0)),
        scratch_shapes=[
            pltpu.VMEM((H + 2, LPAD + W + RPAD, Cin), compute_dtype),
            pltpu.VMEM((H + 2, LPAD + W + RPAD, Cout_p), compute_dtype),
        ],
        compiler_params=pltpu.CompilerParams(
            # Batch axis parallel -> both v7x TensorCores get work (N>=2);
            # harmless on single-TC v5e/v6e.
            dimension_semantics=("parallel",)),
    )(x, w1, w2, sb, p2)

    out = out.reshape(N, H2, W2, Cout_p)[:, :, :, :Cout]   # drop channel padding
    return jnp.transpose(out, (0, 3, 1, 2))                # NHWC -> NCHW


# ----------------------------------------------------------------------------
# Pure-JAX reference (for correctness check); BN is inference-mode.
# ----------------------------------------------------------------------------
def _reference_forward(x_nchw, params):
    x = jnp.transpose(x_nchw, (0, 2, 3, 1))

    def conv_bn_relu(x, w, g, b, m, v):
        w_hwio = jnp.transpose(w, (2, 3, 1, 0))
        y = jax.lax.conv_general_dilated(
            x, w_hwio, window_strides=(1, 1), padding=((1, 1), (1, 1)),
            dimension_numbers=("NHWC", "HWIO", "NHWC"),
            precision=jax.lax.Precision.HIGHEST)
        s = g / jnp.sqrt(v + EPS)
        return jnp.maximum(y * s + (b - m * s), 0.0)

    x = conv_bn_relu(x, params["w1"], params["gamma1"], params["beta1"],
                     params["mean1"], params["var1"])
    x = conv_bn_relu(x, params["w2"], params["gamma2"], params["beta2"],
                     params["mean2"], params["var2"])
    N, H, W, C = x.shape
    x = x.reshape(N, H // 2, 2, W // 2, 2, C).mean(axis=(2, 4))
    return jnp.transpose(x, (0, 3, 1, 2))


if __name__ == "__main__":
    N, Cin, Cout, H, W = 2, 4, 8, 16, 16
    key = jax.random.PRNGKey(0)
    ks = jax.random.split(key, 11)
    params = {
        "w1": 0.1 * jax.random.normal(ks[0], (Cout, Cin, 3, 3), jnp.float32),
        "w2": 0.1 * jax.random.normal(ks[1], (Cout, Cout, 3, 3), jnp.float32),
        "gamma1": 1.0 + 0.1 * jax.random.normal(ks[2], (Cout,), jnp.float32),
        "beta1": 0.1 * jax.random.normal(ks[3], (Cout,), jnp.float32),
        "mean1": 0.1 * jax.random.normal(ks[4], (Cout,), jnp.float32),
        "var1": 0.5 + jax.random.uniform(ks[5], (Cout,), jnp.float32),
        "gamma2": 1.0 + 0.1 * jax.random.normal(ks[6], (Cout,), jnp.float32),
        "beta2": 0.1 * jax.random.normal(ks[7], (Cout,), jnp.float32),
        "mean2": 0.1 * jax.random.normal(ks[8], (Cout,), jnp.float32),
        "var2": 0.5 + jax.random.uniform(ks[9], (Cout,), jnp.float32),
    }
    x = jax.random.normal(ks[10], (N, Cin, H, W), jnp.float32)

    ref = _reference_forward(x, params)

    # f32 path: tight correctness check of the kernel logic.
    out32 = jax.block_until_ready(
        conv_block_forward(x, params, compute_dtype=jnp.float32))
    assert out32.shape == (N, Cout, H // 2, W // 2), out32.shape
    err32 = float(jnp.max(jnp.abs(out32 - ref)))
    assert jnp.allclose(out32, ref, atol=2e-3, rtol=2e-3), f"f32 max_err={err32}"

    # bf16 MXU path (default on real workloads): looser tolerance.
    out16 = jax.block_until_ready(
        conv_block_forward(x, params, compute_dtype=jnp.bfloat16))
    err16 = float(jnp.max(jnp.abs(out16 - ref)))
    assert jnp.allclose(out16, ref, atol=5e-2, rtol=5e-2), f"bf16 max_err={err16}"

    print("KERNEL_OK")
</pallas_src>

<mosaic_0001>
module attributes {stable_mosaic.version = 11 : i64} {
  func.func @_conv_block_kernel(%arg0: i32, %arg1: memref<1x16x16x4xf32, #tpu.memory_space<vmem>>, %arg2: memref<9x4x128xf32, #tpu.memory_space<vmem>>, %arg3: memref<9x128x128xf32, #tpu.memory_space<vmem>>, %arg4: memref<4x128xf32, #tpu.memory_space<vmem>>, %arg5: memref<8x32xf32, #tpu.memory_space<vmem>>, %arg6: memref<1x64x128xf32, #tpu.memory_space<vmem>>, %arg7: memref<18x32x4xf32, #tpu.memory_space<vmem>>, %arg8: memref<18x32x128xf32, #tpu.memory_space<vmem>>) attributes {dimension_semantics = [#tpu.dimension_semantics<parallel>], iteration_bounds = array<i64: 2>, scalar_prefetch = 0 : i64, scratch_operands = 2 : i64, tpu.core_type = #tpu.core_type<tc>, window_params = [{transform_indices = @transform_0, window_bounds = array<i64: 1, 16, 16, 4>}, {pipeline_mode = #tpu.pipeline_mode<synchronous>, transform_indices = @transform_1, window_bounds = array<i64: 9, 4, 128>}, {pipeline_mode = #tpu.pipeline_mode<synchronous>, transform_indices = @transform_2, window_bounds = array<i64: 9, 128, 128>}, {pipeline_mode = #tpu.pipeline_mode<synchronous>, transform_indices = @transform_3, window_bounds = array<i64: 4, 128>}, {pipeline_mode = #tpu.pipeline_mode<synchronous>, transform_indices = @transform_4, window_bounds = array<i64: 8, 32>}, {transform_indices = @transform_5, window_bounds = array<i64: 1, 64, 128>}]} {
    %cst = arith.constant 0.000000e+00 : f32
    %0 = vector.broadcast %cst : f32 to vector<1x32x4xf32>
    %c0 = arith.constant 0 : index
    %c0_0 = arith.constant 0 : index
    %c0_1 = arith.constant 0 : index
    %1 = vector.load %arg7[%c0, %c0_0, %c0_1] : memref<18x32x4xf32, #tpu.memory_space<vmem>>, vector<1x32x4xf32>
    tpu.vector_store %arg7[%c0, %c0_0, %c0_1], %0 {strides = array<i32>} : memref<18x32x4xf32, #tpu.memory_space<vmem>>, vector<1x32x4xf32>,
    %cst_2 = arith.constant 0.000000e+00 : f32
    %2 = vector.broadcast %cst_2 : f32 to vector<1x32x4xf32>
    %c17 = arith.constant 17 : index
    %c0_3 = arith.constant 0 : index
    %c0_4 = arith.constant 0 : index
    %3 = vector.load %arg7[%c17, %c0_3, %c0_4] : memref<18x32x4xf32, #tpu.memory_space<vmem>>, vector<1x32x4xf32>
    tpu.vector_store %arg7[%c17, %c0_3, %c0_4], %2 {strides = array<i32>} : memref<18x32x4xf32, #tpu.memory_space<vmem>>, vector<1x32x4xf32>,
    %cst_5 = arith.constant 0.000000e+00 : f32
    %4 = vector.broadcast %cst_5 : f32 to vector<18x8x4xf32>
    %c0_6 = arith.constant 0 : index
    %c0_7 = arith.constant 0 : index
    %c0_8 = arith.constant 0 : index
    %5 = vector.load %arg7[%c0_6, %c0_7, %c0_8] : memref<18x32x4xf32, #tpu.memory_space<vmem>>, vector<18x8x4xf32>
    tpu.vector_store %arg7[%c0_6, %c0_7, %c0_8], %4 {strides = array<i32>} : memref<18x32x4xf32, #tpu.memory_space<vmem>>, vector<18x8x4xf32>,
    %cst_9 = arith.constant 0.000000e+00 : f32
    %6 = vector.broadcast %cst_9 : f32 to vector<18x8x4xf32>
    %c0_10 = arith.constant 0 : index
    %c24 = arith.constant 24 : index
    %c0_11 = arith.constant 0 : index
    %7 = vector.load %arg7[%c0_10, %c24, %c0_11] : memref<18x32x4xf32, #tpu.memory_space<vmem>>, vector<18x8x4xf32>
    tpu.vector_store %arg7[%c0_10, %c24, %c0_11], %6 {strides = array<i32>} : memref<18x32x4xf32, #tpu.memory_space<vmem>>, vector<18x8x4xf32>,
    %c0_12 = arith.constant 0 : index
    %c0_13 = arith.constant 0 : index
    %c0_14 = arith.constant 0 : index
    %c0_15 = arith.constant 0 : index
    %8 = vector.load %arg1[%c0_12, %c0_13, %c0_14, %c0_15] : memref<1x16x16x4xf32, #tpu.memory_space<vmem>>, vector<1x16x16x4xf32>
    %9 = vector.shape_cast %8 : vector<1x16x16x4xf32> to vector<16x16x4xf32>
    %c1 = arith.constant 1 : index
    %c8 = arith.constant 8 : index
    %c0_16 = arith.constant 0 : index
    %10 = vector.load %arg7[%c1, %c8, %c0_16] : memref<18x32x4xf32, #tpu.memory_space<vmem>>, vector<16x16x4xf32>
    tpu.vector_store %arg7[%c1, %c8, %c0_16], %9 {strides = array<i32>} : memref<18x32x4xf32, #tpu.memory_space<vmem>>, vector<16x16x4xf32>,
    %c0_17 = arith.constant 0 : index
    %c0_18 = arith.constant 0 : index
    %11 = vector.load %arg4[%c0_17, %c0_18] : memref<4x128xf32, #tpu.memory_space<vmem>>, vector<1x128xf32>
    %c1_19 = arith.constant 1 : index
    %c0_20 = arith.constant 0 : index
    %12 = vector.load %arg4[%c1_19, %c0_20] : memref<4x128xf32, #tpu.memory_space<vmem>>, vector<1x128xf32>
    %c0_21 = arith.constant 0 : index
    %c7 = arith.constant 7 : index
    %c0_22 = arith.constant 0 : index
    %13 = vector.load %arg7[%c0_21, %c7, %c0_22] : memref<18x32x4xf32, #tpu.memory_space<vmem>>, vector<16x16x4xf32>
    %14 = vector.shape_cast %13 : vector<16x16x4xf32> to vector<256x4xf32>
    %c0_23 = arith.constant 0 : index
    %c0_24 = arith.constant 0 : index
    %c0_25 = arith.constant 0 : index
    %15 = vector.load %arg2[%c0_23, %c0_24, %c0_25] : memref<9x4x128xf32, #tpu.memory_space<vmem>>, vector<1x4x128xf32>
    %16 = vector.shape_cast %15 : vector<1x4x128xf32> to vector<4x128xf32>
    %cst_26 = arith.constant dense<0.000000e+00> : vector<256x128xf32>
    %17 = tpu.matmul %14, %16, %cst_26 {dimension_numbers = #tpu.dot_dimension_numbers<[1], [0], [0], [1], [0, 0, 1, 1], [], []>} : vector<256x4xf32>, vector<4x128xf32>, vector<256x128xf32> -> vector<256x128xf32>
    %c0_27 = arith.constant 0 : index
    %c8_28 = arith.constant 8 : index
    %c0_29 = arith.constant 0 : index
    %18 = vector.load %arg7[%c0_27, %c8_28, %c0_29] : memref<18x32x4xf32, #tpu.memory_space<vmem>>, vector<16x16x4xf32>
    %19 = vector.shape_cast %18 : vector<16x16x4xf32> to vector<256x4xf32>
    %c1_30 = arith.constant 1 : index
    %c0_31 = arith.constant 0 : index
    %c0_32 = arith.constant 0 : index
    %20 = vector.load %arg2[%c1_30, %c0_31, %c0_32] : memref<9x4x128xf32, #tpu.memory_space<vmem>>, vector<1x4x128xf32>
    %21 = vector.shape_cast %20 : vector<1x4x128xf32> to vector<4x128xf32>
    %cst_33 = arith.constant dense<0.000000e+00> : vector<256x128xf32>
    %22 = tpu.matmul %19, %21, %cst_33 {dimension_numbers = #tpu.dot_dimension_numbers<[1], [0], [0], [1], [0, 0, 1, 1], [], []>} : vector<256x4xf32>, vector<4x128xf32>, vector<256x128xf32> -> vector<256x128xf32>
    %23 = arith.addf %17, %22 : vector<256x128xf32>
    %c0_34 = arith.constant 0 : index
    %c9 = arith.constant 9 : index
    %c0_35 = arith.constant 0 : index
    %24 = vector.load %arg7[%c0_34, %c9, %c0_35] : memref<18x32x4xf32, #tpu.memory_space<vmem>>, vector<16x16x4xf32>
    %25 = vector.shape_cast %24 : vector<16x16x4xf32> to vector<256x4xf32>
    %c2 = arith.constant 2 : index
    %c0_36 = arith.constant 0 : index
    %c0_37 = arith.constant 0 : index
    %26 = vector.load %arg2[%c2, %c0_36, %c0_37] : memref<9x4x128xf32, #tpu.memory_space<vmem>>, vector<1x4x128xf32>
    %27 = vector.shape_cast %26 : vector<1x4x128xf32> to vector<4x128xf32>
    %cst_38 = arith.constant dense<0.000000e+00> : vector<256x128xf32>
    %28 = tpu.matmul %25, %27, %cst_38 {dimension_numbers = #tpu.dot_dimension_numbers<[1], [0], [0], [1], [0, 0, 1, 1], [], []>} : vector<256x4xf32>, vector<4x128xf32>, vector<256x128xf32> -> vector<256x128xf32>
    %29 = arith.addf %23, %28 : vector<256x128xf32>
    %c1_39 = arith.constant 1 : index
    %c7_40 = arith.constant 7 : index
    %c0_41 = arith.constant 0 : index
    %30 = vector.load %arg7[%c1_39, %c7_40, %c0_41] : memref<18x32x4xf32, #tpu.memory_space<vmem>>, vector<16x16x4xf32>
    %31 = vector.shape_cast %30 : vector<16x16x4xf32> to vector<256x4xf32>
    %c3 = arith.constant 3 : index
    %c0_42 = arith.constant 0 : index
    %c0_43 = arith.constant 0 : index
    %32 = vector.load %arg2[%c3, %c0_42, %c0_43] : memref<9x4x128xf32, #tpu.memory_space<vmem>>, vector<1x4x128xf32>
    %33 = vector.shape_cast %32 : vector<1x4x128xf32> to vector<4x128xf32>
    %cst_44 = arith.constant dense<0.000000e+00> : vector<256x128xf32>
    %34 = tpu.matmul %31, %33, %cst_44 {dimension_numbers = #tpu.dot_dimension_numbers<[1], [0], [0], [1], [0, 0, 1, 1], [], []>} : vector<256x4xf32>, vector<4x128xf32>, vector<256x128xf32> -> vector<256x128xf32>
    %35 = arith.addf %29, %34 : vector<256x128xf32>
    %c1_45 = arith.constant 1 : index
    %c8_46 = arith.constant 8 : index
    %c0_47 = arith.constant 0 : index
    %36 = vector.load %arg7[%c1_45, %c8_46, %c0_47] : memref<18x32x4xf32, #tpu.memory_space<vmem>>, vector<16x16x4xf32>
    %37 = vector.shape_cast %36 : vector<16x16x4xf32> to vector<256x4xf32>
    %c4 = arith.constant 4 : index
    %c0_48 = arith.constant 0 : index
    %c0_49 = arith.constant 0 : index
    %38 = vector.load %arg2[%c4, %c0_48, %c0_49] : memref<9x4x128xf32, #tpu.memory_space<vmem>>, vector<1x4x128xf32>
    %39 = vector.shape_cast %38 : vector<1x4x128xf32> to vector<4x128xf32>
    %cst_50 = arith.constant dense<0.000000e+00> : vector<256x128xf32>
    %40 = tpu.matmul %37, %39, %cst_50 {dimension_numbers = #tpu.dot_dimension_numbers<[1], [0], [0], [1], [0, 0, 1, 1], [], []>} : vector<256x4xf32>, vector<4x128xf32>, vector<256x128xf32> -> vector<256x128xf32>
    %41 = arith.addf %35, %40 : vector<256x128xf32>
    %c1_51 = arith.constant 1 : index
    %c9_52 = arith.constant 9 : index
    %c0_53 = arith.constant 0 : index
    %42 = vector.load %arg7[%c1_51, %c9_52, %c0_53] : memref<18x32x4xf32, #tpu.memory_space<vmem>>, vector<16x16x4xf32>
    %43 = vector.shape_cast %42 : vector<16x16x4xf32> to vector<256x4xf32>
    %c5 = arith.constant 5 : index
    %c0_54 = arith.constant 0 : index
    %c0_55 = arith.constant 0 : index
    %44 = vector.load %arg2[%c5, %c0_54, %c0_55] : memref<9x4x128xf32, #tpu.memory_space<vmem>>, vector<1x4x128xf32>
    %45 = vector.shape_cast %44 : vector<1x4x128xf32> to vector<4x128xf32>
    %cst_56 = arith.constant dense<0.000000e+00> : vector<256x128xf32>
    %46 = tpu.matmul %43, %45, %cst_56 {dimension_numbers = #tpu.dot_dimension_numbers<[1], [0], [0], [1], [0, 0, 1, 1], [], []>} : vector<256x4xf32>, vector<4x128xf32>, vector<256x128xf32> -> vector<256x128xf32>
    %47 = arith.addf %41, %46 : vector<256x128xf32>
    %c2_57 = arith.constant 2 : index
    %c7_58 = arith.constant 7 : index
    %c0_59 = arith.constant 0 : index
    %48 = vector.load %arg7[%c2_57, %c7_58, %c0_59] : memref<18x32x4xf32, #tpu.memory_space<vmem>>, vector<16x16x4xf32>
    %49 = vector.shape_cast %48 : vector<16x16x4xf32> to vector<256x4xf32>
    %c6 = arith.constant 6 : index
    %c0_60 = arith.constant 0 : index
    %c0_61 = arith.constant 0 : index
    %50 = vector.load %arg2[%c6, %c0_60, %c0_61] : memref<9x4x128xf32, #tpu.memory_space<vmem>>, vector<1x4x128xf32>
    %51 = vector.shape_cast %50 : vector<1x4x128xf32> to vector<4x128xf32>
    %cst_62 = arith.constant dense<0.000000e+00> : vector<256x128xf32>
    %52 = tpu.matmul %49, %51, %cst_62 {dimension_numbers = #tpu.dot_dimension_numbers<[1], [0], [0], [1], [0, 0, 1, 1], [], []>} : vector<256x4xf32>, vector<4x128xf32>, vector<256x128xf32> -> vector<256x128xf32>
    %53 = arith.addf %47, %52 : vector<256x128xf32>
    %c2_63 = arith.constant 2 : index
    %c8_64 = arith.constant 8 : index
    %c0_65 = arith.constant 0 : index
    %54 = vector.load %arg7[%c2_63, %c8_64, %c0_65] : memref<18x32x4xf32, #tpu.memory_space<vmem>>, vector<16x16x4xf32>
    %55 = vector.shape_cast %54 : vector<16x16x4xf32> to vector<256x4xf32>
    %c7_66 = arith.constant 7 : index
    %c0_67 = arith.constant 0 : index
    %c0_68 = arith.constant 0 : index
    %56 = vector.load %arg2[%c7_66, %c0_67, %c0_68] : memref<9x4x128xf32, #tpu.memory_space<vmem>>, vector<1x4x128xf32>
    %57 = vector.shape_cast %56 : vector<1x4x128xf32> to vector<4x128xf32>
    %cst_69 = arith.constant dense<0.000000e+00> : vector<256x128xf32>
    %58 = tpu.matmul %55, %57, %cst_69 {dimension_numbers = #tpu.dot_dimension_numbers<[1], [0], [0], [1], [0, 0, 1, 1], [], []>} : vector<256x4xf32>, vector<4x128xf32>, vector<256x128xf32> -> vector<256x128xf32>
    %59 = arith.addf %53, %58 : vector<256x128xf32>
    %c2_70 = arith.constant 2 : index
    %c9_71 = arith.constant 9 : index
    %c0_72 = arith.constant 0 : index
    %60 = vector.load %arg7[%c2_70, %c9_71, %c0_72] : memref<18x32x4xf32, #tpu.memory_space<vmem>>, vector<16x16x4xf32>
    %61 = vector.shape_cast %60 : vector<16x16x4xf32> to vector<256x4xf32>
    %c8_73 = arith.constant 8 : index
    %c0_74 = arith.constant 0 : index
    %c0_75 = arith.constant 0 : index
    %62 = vector.load %arg2[%c8_73, %c0_74, %c0_75] : memref<9x4x128xf32, #tpu.memory_space<vmem>>, vector<1x4x128xf32>
    %63 = vector.shape_cast %62 : vector<1x4x128xf32> to vector<4x128xf32>
    %cst_76 = arith.constant dense<0.000000e+00> : vector<256x128xf32>
    %64 = tpu.matmul %61, %63, %cst_76 {dimension_numbers = #tpu.dot_dimension_numbers<[1], [0], [0], [1], [0, 0, 1, 1], [], []>} : vector<256x4xf32>, vector<4x128xf32>, vector<256x128xf32> -> vector<256x128xf32>
    %65 = arith.addf %59, %64 : vector<256x128xf32>
    %66 = vector.broadcast %11 : vector<1x128xf32> to vector<256x128xf32>
    %67 = arith.mulf %65, %66 : vector<256x128xf32>
    %68 = vector.broadcast %12 : vector<1x128xf32> to vector<256x128xf32>
    %69 = arith.addf %67, %68 : vector<256x128xf32>
    %cst_77 = arith.constant 0.000000e+00 : f32
    %70 = vector.broadcast %cst_77 : f32 to vector<256x128xf32>
    %71 = arith.maximumf %69, %70 : vector<256x128xf32>
    %cst_78 = arith.constant 0.000000e+00 : f32
    %72 = vector.broadcast %cst_78 : f32 to vector<1x32x128xf32>
    %c0_79 = arith.constant 0 : index
    %c0_80 = arith.constant 0 : index
    %c0_81 = arith.constant 0 : index
    %73 = vector.load %arg8[%c0_79, %c0_80, %c0_81] : memref<18x32x128xf32, #tpu.memory_space<vmem>>, vector<1x32x128xf32>
    tpu.vector_store %arg8[%c0_79, %c0_80, %c0_81], %72 {strides = array<i32>} : memref<18x32x128xf32, #tpu.memory_space<vmem>>, vector<1x32x128xf32>,
    %cst_82 = arith.constant 0.000000e+00 : f32
    %74 = vector.broadcast %cst_82 : f32 to vector<1x32x128xf32>
    %c17_83 = arith.constant 17 : index
    %c0_84 = arith.constant 0 : index
    %c0_85 = arith.constant 0 : index
    %75 = vector.load %arg8[%c17_83, %c0_84, %c0_85] : memref<18x32x128xf32, #tpu.memory_space<vmem>>, vector<1x32x128xf32>
    tpu.vector_store %arg8[%c17_83, %c0_84, %c0_85], %74 {strides = array<i32>} : memref<18x32x128xf32, #tpu.memory_space<vmem>>, vector<1x32x128xf32>,
    %cst_86 = arith.constant 0.000000e+00 : f32
    %76 = vector.broadcast %cst_86 : f32 to vector<18x8x128xf32>
    %c0_87 = arith.constant 0 : index
    %c0_88 = arith.constant 0 : index
    %c0_89 = arith.constant 0 : index
    %77 = vector.load %arg8[%c0_87, %c0_88, %c0_89] : memref<18x32x128xf32, #tpu.memory_space<vmem>>, vector<18x8x128xf32>
    tpu.vector_store %arg8[%c0_87, %c0_88, %c0_89], %76 {strides = array<i32>} : memref<18x32x128xf32, #tpu.memory_space<vmem>>, vector<18x8x128xf32>,
    %cst_90 = arith.constant 0.000000e+00 : f32
    %78 = vector.broadcast %cst_90 : f32 to vector<18x8x128xf32>
    %c0_91 = arith.constant 0 : index
    %c24_92 = arith.constant 24 : index
    %c0_93 = arith.constant 0 : index
    %79 = vector.load %arg8[%c0_91, %c24_92, %c0_93] : memref<18x32x128xf32, #tpu.memory_space<vmem>>, vector<18x8x128xf32>
    tpu.vector_store %arg8[%c0_91, %c24_92, %c0_93], %78 {strides = array<i32>} : memref<18x32x128xf32, #tpu.memory_space<vmem>>, vector<18x8x128xf32>,
    %80 = vector.shape_cast %71 : vector<256x128xf32> to vector<16x16x128xf32>
    %c1_94 = arith.constant 1 : index
    %c8_95 = arith.constant 8 : index
    %c0_96 = arith.constant 0 : index
    %81 = vector.load %arg8[%c1_94, %c8_95, %c0_96] : memref<18x32x128xf32, #tpu.memory_space<vmem>>, vector<16x16x128xf32>
    tpu.vector_store %arg8[%c1_94, %c8_95, %c0_96], %80 {strides = array<i32>} : memref<18x32x128xf32, #tpu.memory_space<vmem>>, vector<16x16x128xf32>,
    %c2_97 = arith.constant 2 : index
    %c0_98 = arith.constant 0 : index
    %82 = vector.load %arg4[%c2_97, %c0_98] : memref<4x128xf32, #tpu.memory_space<vmem>>, vector<1x128xf32>
    %c3_99 = arith.constant 3 : index
    %c0_100 = arith.constant 0 : index
    %83 = vector.load %arg4[%c3_99, %c0_100] : memref<4x128xf32, #tpu.memory_space<vmem>>, vector<1x128xf32>
    %c0_101 = arith.constant 0 : index
    %c7_102 = arith.constant 7 : index
    %c0_103 = arith.constant 0 : index
    %84 = vector.load %arg8[%c0_101, %c7_102, %c0_103] : memref<18x32x128xf32, #tpu.memory_space<vmem>>, vector<16x16x128xf32>
    %85 = vector.shape_cast %84 : vector<16x16x128xf32> to vector<256x128xf32>
    %c0_104 = arith.constant 0 : index
    %c0_105 = arith.constant 0 : index
    %c0_106 = arith.constant 0 : index
    %86 = vector.load %arg3[%c0_104, %c0_105, %c0_106] : memref<9x128x128xf32, #tpu.memory_space<vmem>>, vector<1x128x128xf32>
    %87 = vector.shape_cast %86 : vector<1x128x128xf32> to vector<128x128xf32>
    %cst_107 = arith.constant dense<0.000000e+00> : vector<256x128xf32>
    %88 = tpu.matmul %85, %87, %cst_107 {dimension_numbers = #tpu.dot_dimension_numbers<[1], [0], [0], [1], [0, 0, 1, 1], [], []>} : vector<256x128xf32>, vector<128x128xf32>, vector<256x128xf32> -> vector<256x128xf32>
    %c0_108 = arith.constant 0 : index
    %c8_109 = arith.constant 8 : index
    %c0_110 = arith.constant 0 : index
    %89 = vector.load %arg8[%c0_108, %c8_109, %c0_110] : memref<18x32x128xf32, #tpu.memory_space<vmem>>, vector<16x16x128xf32>
    %90 = vector.shape_cast %89 : vector<16x16x128xf32> to vector<256x128xf32>
    %c1_111 = arith.constant 1 : index
    %c0_112 = arith.constant 0 : index
    %c0_113 = arith.constant 0 : index
    %91 = vector.load %arg3[%c1_111, %c0_112, %c0_113] : memref<9x128x128xf32, #tpu.memory_space<vmem>>, vector<1x128x128xf32>
    %92 = vector.shape_cast %91 : vector<1x128x128xf32> to vector<128x128xf32>
    %cst_114 = arith.constant dense<0.000000e+00> : vector<256x128xf32>
    %93 = tpu.matmul %90, %92, %cst_114 {dimension_numbers = #tpu.dot_dimension_numbers<[1], [0], [0], [1], [0, 0, 1, 1], [], []>} : vector<256x128xf32>, vector<128x128xf32>, vector<256x128xf32> -> vector<256x128xf32>
    %94 = arith.addf %88, %93 : vector<256x128xf32>
    %c0_115 = arith.constant 0 : index
    %c9_116 = arith.constant 9 : index
    %c0_117 = arith.constant 0 : index
    %95 = vector.load %arg8[%c0_115, %c9_116, %c0_117] : memref<18x32x128xf32, #tpu.memory_space<vmem>>, vector<16x16x128xf32>
    %96 = vector.shape_cast %95 : vector<16x16x128xf32> to vector<256x128xf32>
    %c2_118 = arith.constant 2 : index
    %c0_119 = arith.constant 0 : index
    %c0_120 = arith.constant 0 : index
    %97 = vector.load %arg3[%c2_118, %c0_119, %c0_120] : memref<9x128x128xf32, #tpu.memory_space<vmem>>, vector<1x128x128xf32>
    %98 = vector.shape_cast %97 : vector<1x128x128xf32> to vector<128x128xf32>
    %cst_121 = arith.constant dense<0.000000e+00> : vector<256x128xf32>
    %99 = tpu.matmul %96, %98, %cst_121 {dimension_numbers = #tpu.dot_dimension_numbers<[1], [0], [0], [1], [0, 0, 1, 1], [], []>} : vector<256x128xf32>, vector<128x128xf32>, vector<256x128xf32> -> vector<256x128xf32>
    %100 = arith.addf %94, %99 : vector<256x128xf32>
    %c1_122 = arith.constant 1 : index
    %c7_123 = arith.constant 7 : index
    %c0_124 = arith.constant 0 : index
    %101 = vector.load %arg8[%c1_122, %c7_123, %c0_124] : memref<18x32x128xf32, #tpu.memory_space<vmem>>, vector<16x16x128xf32>
    %102 = vector.shape_cast %101 : vector<16x16x128xf32> to vector<256x128xf32>
    %c3_125 = arith.constant 3 : index
    %c0_126 = arith.constant 0 : index
    %c0_127 = arith.constant 0 : index
    %103 = vector.load %arg3[%c3_125, %c0_126, %c0_127] : memref<9x128x128xf32, #tpu.memory_space<vmem>>, vector<1x128x128xf32>
    %104 = vector.shape_cast %103 : vector<1x128x128xf32> to vector<128x128xf32>
    %cst_128 = arith.constant dense<0.000000e+00> : vector<256x128xf32>
    %105 = tpu.matmul %102, %104, %cst_128 {dimension_numbers = #tpu.dot_dimension_numbers<[1], [0], [0], [1], [0, 0, 1, 1], [], []>} : vector<256x128xf32>, vector<128x128xf32>, vector<256x128xf32> -> vector<256x128xf32>
    %106 = arith.addf %100, %105 : vector<256x128xf32>
    %c1_129 = arith.constant 1 : index
    %c8_130 = arith.constant 8 : index
    %c0_131 = arith.constant 0 : index
    %107 = vector.load %arg8[%c1_129, %c8_130, %c0_131] : memref<18x32x128xf32, #tpu.memory_space<vmem>>, vector<16x16x128xf32>
    %108 = vector.shape_cast %107 : vector<16x16x128xf32> to vector<256x128xf32>
    %c4_132 = arith.constant 4 : index
    %c0_133 = arith.constant 0 : index
    %c0_134 = arith.constant 0 : index
    %109 = vector.load %arg3[%c4_132, %c0_133, %c0_134] : memref<9x128x128xf32, #tpu.memory_space<vmem>>, vector<1x128x128xf32>
    %110 = vector.shape_cast %109 : vector<1x128x128xf32> to vector<128x128xf32>
    %cst_135 = arith.constant dense<0.000000e+00> : vector<256x128xf32>
    %111 = tpu.matmul %108, %110, %cst_135 {dimension_numbers = #tpu.dot_dimension_numbers<[1], [0], [0], [1], [0, 0, 1, 1], [], []>} : vector<256x128xf32>, vector<128x128xf32>, vector<256x128xf32> -> vector<256x128xf32>
    %112 = arith.addf %106, %111 : vector<256x128xf32>
    %c1_136 = arith.constant 1 : index
    %c9_137 = arith.constant 9 : index
    %c0_138 = arith.constant 0 : index
    %113 = vector.load %arg8[%c1_136, %c9_137, %c0_138] : memref<18x32x128xf32, #tpu.memory_space<vmem>>, vector<16x16x128xf32>
    %114 = vector.shape_cast %113 : vector<16x16x128xf32> to vector<256x128xf32>
    %c5_139 = arith.constant 5 : index
    %c0_140 = arith.constant 0 : index
    %c0_141 = arith.constant 0 : index
    %115 = vector.load %arg3[%c5_139, %c0_140, %c0_141] : memref<9x128x128xf32, #tpu.memory_space<vmem>>, vector<1x128x128xf32>
    %116 = vector.shape_cast %115 : vector<1x128x128xf32> to vector<128x128xf32>
    %cst_142 = arith.constant dense<0.000000e+00> : vector<256x128xf32>
    %117 = tpu.matmul %114, %116, %cst_142 {dimension_numbers = #tpu.dot_dimension_numbers<[1], [0], [0], [1], [0, 0, 1, 1], [], []>} : vector<256x128xf32>, vector<128x128xf32>, vector<256x128xf32> -> vector<256x128xf32>
    %118 = arith.addf %112, %117 : vector<256x128xf32>
    %c2_143 = arith.constant 2 : index
    %c7_144 = arith.constant 7 : index
    %c0_145 = arith.constant 0 : index
    %119 = vector.load %arg8[%c2_143, %c7_144, %c0_145] : memref<18x32x128xf32, #tpu.memory_space<vmem>>, vector<16x16x128xf32>
    %120 = vector.shape_cast %119 : vector<16x16x128xf32> to vector<256x128xf32>
    %c6_146 = arith.constant 6 : index
    %c0_147 = arith.constant 0 : index
    %c0_148 = arith.constant 0 : index
    %121 = vector.load %arg3[%c6_146, %c0_147, %c0_148] : memref<9x128x128xf32, #tpu.memory_space<vmem>>, vector<1x128x128xf32>
    %122 = vector.shape_cast %121 : vector<1x128x128xf32> to vector<128x128xf32>
    %cst_149 = arith.constant dense<0.000000e+00> : vector<256x128xf32>
    %123 = tpu.matmul %120, %122, %cst_149 {dimension_numbers = #tpu.dot_dimension_numbers<[1], [0], [0], [1], [0, 0, 1, 1], [], []>} : vector<256x128xf32>, vector<128x128xf32>, vector<256x128xf32> -> vector<256x128xf32>
    %124 = arith.addf %118, %123 : vector<256x128xf32>
    %c2_150 = arith.constant 2 : index
    %c8_151 = arith.constant 8 : index
    %c0_152 = arith.constant 0 : index
    %125 = vector.load %arg8[%c2_150, %c8_151, %c0_152] : memref<18x32x128xf32, #tpu.memory_space<vmem>>, vector<16x16x128xf32>
    %126 = vector.shape_cast %125 : vector<16x16x128xf32> to vector<256x128xf32>
    %c7_153 = arith.constant 7 : index
    %c0_154 = arith.constant 0 : index
    %c0_155 = arith.constant 0 : index
    %127 = vector.load %arg3[%c7_153, %c0_154, %c0_155] : memref<9x128x128xf32, #tpu.memory_space<vmem>>, vector<1x128x128xf32>
    %128 = vector.shape_cast %127 : vector<1x128x128xf32> to vector<128x128xf32>
    %cst_156 = arith.constant dense<0.000000e+00> : vector<256x128xf32>
    %129 = tpu.matmul %126, %128, %cst_156 {dimension_numbers = #tpu.dot_dimension_numbers<[1], [0], [0], [1], [0, 0, 1, 1], [], []>} : vector<256x128xf32>, vector<128x128xf32>, vector<256x128xf32> -> vector<256x128xf32>
    %130 = arith.addf %124, %129 : vector<256x128xf32>
    %c2_157 = arith.constant 2 : index
    %c9_158 = arith.constant 9 : index
    %c0_159 = arith.constant 0 : index
    %131 = vector.load %arg8[%c2_157, %c9_158, %c0_159] : memref<18x32x128xf32, #tpu.memory_space<vmem>>, vector<16x16x128xf32>
    %132 = vector.shape_cast %131 : vector<16x16x128xf32> to vector<256x128xf32>
    %c8_160 = arith.constant 8 : index
    %c0_161 = arith.constant 0 : index
    %c0_162 = arith.constant 0 : index
    %133 = vector.load %arg3[%c8_160, %c0_161, %c0_162] : memref<9x128x128xf32, #tpu.memory_space<vmem>>, vector<1x128x128xf32>
    %134 = vector.shape_cast %133 : vector<1x128x128xf32> to vector<128x128xf32>
    %cst_163 = arith.constant dense<0.000000e+00> : vector<256x128xf32>
    %135 = tpu.matmul %132, %134, %cst_163 {dimension_numbers = #tpu.dot_dimension_numbers<[1], [0], [0], [1], [0, 0, 1, 1], [], []>} : vector<256x128xf32>, vector<128x128xf32>, vector<256x128xf32> -> vector<256x128xf32>
    %136 = arith.addf %130, %135 : vector<256x128xf32>
    %137 = vector.broadcast %82 : vector<1x128xf32> to vector<256x128xf32>
    %138 = arith.mulf %136, %137 : vector<256x128xf32>
    %139 = vector.broadcast %83 : vector<1x128xf32> to vector<256x128xf32>
    %140 = arith.addf %138, %139 : vector<256x128xf32>
    %cst_164 = arith.constant 0.000000e+00 : f32
    %141 = vector.broadcast %cst_164 : f32 to vector<256x128xf32>
    %142 = arith.maximumf %140, %141 : vector<256x128xf32>
    %c0_165 = arith.constant 0 : index
    %c0_166 = arith.constant 0 : index
    %143 = vector.load %arg5[%c0_165, %c0_166] : memref<8x32xf32, #tpu.memory_space<vmem>>, vector<8x32xf32>
    %144 = vector.extract_strided_slice %142 {offsets = [0, 0], sizes = [32, 128], strides = [1, 1]} : vector<256x128xf32> to vector<32x128xf32>
    %cst_167 = arith.constant dense<0.000000e+00> : vector<8x128xf32>
    %145 = tpu.matmul %143, %144, %cst_167 {dimension_numbers = #tpu.dot_dimension_numbers<[1], [0], [0], [1], [0, 0, 1, 1], [], []>} : vector<8x32xf32>, vector<32x128xf32>, vector<8x128xf32> -> vector<8x128xf32>
    %c0_168 = arith.constant 0 : index
    %c0_169 = arith.constant 0 : index
    %c0_170 = arith.constant 0 : index
    %146 = vector.load %arg6[%c0_168, %c0_169, %c0_170] : memref<1x64x128xf32, #tpu.memory_space<vmem>>, vector<1x8x128xf32>
    %147 = vector.shape_cast %146 : vector<1x8x128xf32> to vector<8x128xf32>
    %148 = vector.shape_cast %145 : vector<8x128xf32> to vector<1x8x128xf32>
    tpu.vector_store %arg6[%c0_168, %c0_169, %c0_170], %148 {strides = array<i32>} : memref<1x64x128xf32, #tpu.memory_space<vmem>>, vector<1x8x128xf32>,
    %149 = vector.extract_strided_slice %142 {offsets = [32, 0], sizes = [32, 128], strides = [1, 1]} : vector<256x128xf32> to vector<32x128xf32>
    %cst_171 = arith.constant dense<0.000000e+00> : vector<8x128xf32>
    %150 = tpu.matmul %143, %149, %cst_171 {dimension_numbers = #tpu.dot_dimension_numbers<[1], [0], [0], [1], [0, 0, 1, 1], [], []>} : vector<8x32xf32>, vector<32x128xf32>, vector<8x128xf32> -> vector<8x128xf32>
    %c0_172 = arith.constant 0 : index
    %c8_173 = arith.constant 8 : index
    %c0_174 = arith.constant 0 : index
    %151 = vector.load %arg6[%c0_172, %c8_173, %c0_174] : memref<1x64x128xf32, #tpu.memory_space<vmem>>, vector<1x8x128xf32>
    %152 = vector.shape_cast %151 : vector<1x8x128xf32> to vector<8x128xf32>
    %153 = vector.shape_cast %150 : vector<8x128xf32> to vector<1x8x128xf32>
    tpu.vector_store %arg6[%c0_172, %c8_173, %c0_174], %153 {strides = array<i32>} : memref<1x64x128xf32, #tpu.memory_space<vmem>>, vector<1x8x128xf32>,
    %154 = vector.extract_strided_slice %142 {offsets = [64, 0], sizes = [32, 128], strides = [1, 1]} : vector<256x128xf32> to vector<32x128xf32>
    %cst_175 = arith.constant dense<0.000000e+00> : vector<8x128xf32>
    %155 = tpu.matmul %143, %154, %cst_175 {dimension_numbers = #tpu.dot_dimension_numbers<[1], [0], [0], [1], [0, 0, 1, 1], [], []>} : vector<8x32xf32>, vector<32x128xf32>, vector<8x128xf32> -> vector<8x128xf32>
    %c0_176 = arith.constant 0 : index
    %c16 = arith.constant 16 : index
    %c0_177 = arith.constant 0 : index
    %156 = vector.load %arg6[%c0_176, %c16, %c0_177] : memref<1x64x128xf32, #tpu.memory_space<vmem>>, vector<1x8x128xf32>
    %157 = vector.shape_cast %156 : vector<1x8x128xf32> to vector<8x128xf32>
    %158 = vector.shape_cast %155 : vector<8x128xf32> to vector<1x8x128xf32>
    tpu.vector_store %arg6[%c0_176, %c16, %c0_177], %158 {strides = array<i32>} : memref<1x64x128xf32, #tpu.memory_space<vmem>>, vector<1x8x128xf32>,
    %159 = vector.extract_strided_slice %142 {offsets = [96, 0], sizes = [32, 128], strides = [1, 1]} : vector<256x128xf32> to vector<32x128xf32>
    %cst_178 = arith.constant dense<0.000000e+00> : vector<8x128xf32>
    %160 = tpu.matmul %143, %159, %cst_178 {dimension_numbers = #tpu.dot_dimension_numbers<[1], [0], [0], [1], [0, 0, 1, 1], [], []>} : vector<8x32xf32>, vector<32x128xf32>, vector<8x128xf32> -> vector<8x128xf32>
    %c0_179 = arith.constant 0 : index
    %c24_180 = arith.constant 24 : index
    %c0_181 = arith.constant 0 : index
    %161 = vector.load %arg6[%c0_179, %c24_180, %c0_181] : memref<1x64x128xf32, #tpu.memory_space<vmem>>, vector<1x8x128xf32>
    %162 = vector.shape_cast %161 : vector<1x8x128xf32> to vector<8x128xf32>
    %163 = vector.shape_cast %160 : vector<8x128xf32> to vector<1x8x128xf32>
    tpu.vector_store %arg6[%c0_179, %c24_180, %c0_181], %163 {strides = array<i32>} : memref<1x64x128xf32, #tpu.memory_space<vmem>>, vector<1x8x128xf32>,
    %164 = vector.extract_strided_slice %142 {offsets = [128, 0], sizes = [32, 128], strides = [1, 1]} : vector<256x128xf32> to vector<32x128xf32>
    %cst_182 = arith.constant dense<0.000000e+00> : vector<8x128xf32>
    %165 = tpu.matmul %143, %164, %cst_182 {dimension_numbers = #tpu.dot_dimension_numbers<[1], [0], [0], [1], [0, 0, 1, 1], [], []>} : vector<8x32xf32>, vector<32x128xf32>, vector<8x128xf32> -> vector<8x128xf32>
    %c0_183 = arith.constant 0 : index
    %c32 = arith.constant 32 : index
    %c0_184 = arith.constant 0 : index
    %166 = vector.load %arg6[%c0_183, %c32, %c0_184] : memref<1x64x128xf32, #tpu.memory_space<vmem>>, vector<1x8x128xf32>
    %167 = vector.shape_cast %166 : vector<1x8x128xf32> to vector<8x128xf32>
    %168 = vector.shape_cast %165 : vector<8x128xf32> to vector<1x8x128xf32>
    tpu.vector_store %arg6[%c0_183, %c32, %c0_184], %168 {strides = array<i32>} : memref<1x64x128xf32, #tpu.memory_space<vmem>>, vector<1x8x128xf32>,
    %169 = vector.extract_strided_slice %142 {offsets = [160, 0], sizes = [32, 128], strides = [1, 1]} : vector<256x128xf32> to vector<32x128xf32>
    %cst_185 = arith.constant dense<0.000000e+00> : vector<8x128xf32>
    %170 = tpu.matmul %143, %169, %cst_185 {dimension_numbers = #tpu.dot_dimension_numbers<[1], [0], [0], [1], [0, 0, 1, 1], [], []>} : vector<8x32xf32>, vector<32x128xf32>, vector<8x128xf32> -> vector<8x128xf32>
    %c0_186 = arith.constant 0 : index
    %c40 = arith.constant 40 : index
    %c0_187 = arith.constant 0 : index
    %171 = vector.load %arg6[%c0_186, %c40, %c0_187] : memref<1x64x128xf32, #tpu.memory_space<vmem>>, vector<1x8x128xf32>
    %172 = vector.shape_cast %171 : vector<1x8x128xf32> to vector<8x128xf32>
    %173 = vector.shape_cast %170 : vector<8x128xf32> to vector<1x8x128xf32>
    tpu.vector_store %arg6[%c0_186, %c40, %c0_187], %173 {strides = array<i32>} : memref<1x64x128xf32, #tpu.memory_space<vmem>>, vector<1x8x128xf32>,
    %174 = vector.extract_strided_slice %142 {offsets = [192, 0], sizes = [32, 128], strides = [1, 1]} : vector<256x128xf32> to vector<32x128xf32>
    %cst_188 = arith.constant dense<0.000000e+00> : vector<8x128xf32>
    %175 = tpu.matmul %143, %174, %cst_188 {dimension_numbers = #tpu.dot_dimension_numbers<[1], [0], [0], [1], [0, 0, 1, 1], [], []>} : vector<8x32xf32>, vector<32x128xf32>, vector<8x128xf32> -> vector<8x128xf32>
    %c0_189 = arith.constant 0 : index
    %c48 = arith.constant 48 : index
    %c0_190 = arith.constant 0 : index
    %176 = vector.load %arg6[%c0_189, %c48, %c0_190] : memref<1x64x128xf32, #tpu.memory_space<vmem>>, vector<1x8x128xf32>
    %177 = vector.shape_cast %176 : vector<1x8x128xf32> to vector<8x128xf32>
    %178 = vector.shape_cast %175 : vector<8x128xf32> to vector<1x8x128xf32>
    tpu.vector_store %arg6[%c0_189, %c48, %c0_190], %178 {strides = array<i32>} : memref<1x64x128xf32, #tpu.memory_space<vmem>>, vector<1x8x128xf32>,
    %179 = vector.extract_strided_slice %142 {offsets = [224, 0], sizes = [32, 128], strides = [1, 1]} : vector<256x128xf32> to vector<32x128xf32>
    %cst_191 = arith.constant dense<0.000000e+00> : vector<8x128xf32>
    %180 = tpu.matmul %143, %179, %cst_191 {dimension_numbers = #tpu.dot_dimension_numbers<[1], [0], [0], [1], [0, 0, 1, 1], [], []>} : vector<8x32xf32>, vector<32x128xf32>, vector<8x128xf32> -> vector<8x128xf32>
    %c0_192 = arith.constant 0 : index
    %c56 = arith.constant 56 : index
    %c0_193 = arith.constant 0 : index
    %181 = vector.load %arg6[%c0_192, %c56, %c0_193] : memref<1x64x128xf32, #tpu.memory_space<vmem>>, vector<1x8x128xf32>
    %182 = vector.shape_cast %181 : vector<1x8x128xf32> to vector<8x128xf32>
    %183 = vector.shape_cast %180 : vector<8x128xf32> to vector<1x8x128xf32>
    tpu.vector_store %arg6[%c0_192, %c56, %c0_193], %183 {strides = array<i32>} : memref<1x64x128xf32, #tpu.memory_space<vmem>>, vector<1x8x128xf32>,
    return
  }
  func.func @transform_0(%arg0: i32) -> (i32, i32, i32, i32) {
    %c0_i32 = arith.constant 0 : i32
    %c0_i32_0 = arith.constant 0 : i32
    %c0_i32_1 = arith.constant 0 : i32
    %c0_i32_2 = arith.constant 0 : i32
    return %arg0, %c0_i32, %c0_i32_0, %c0_i32_1 : i32, i32, i32, i32
  }
  func.func @transform_1(%arg0: i32) -> (i32, i32, i32) {
    %c0_i32 = arith.constant 0 : i32
    %c0_i32_0 = arith.constant 0 : i32
    %c0_i32_1 = arith.constant 0 : i32
    %c0_i32_2 = arith.constant 0 : i32
    return %c0_i32, %c0_i32_0, %c0_i32_1 : i32, i32, i32
  }
  func.func @transform_2(%arg0: i32) -> (i32, i32, i32) {
    %c0_i32 = arith.constant 0 : i32
    %c0_i32_0 = arith.constant 0 : i32
    %c0_i32_1 = arith.constant 0 : i32
    %c0_i32_2 = arith.constant 0 : i32
    return %c0_i32, %c0_i32_0, %c0_i32_1 : i32, i32, i32
  }
  func.func @transform_3(%arg0: i32) -> (i32, i32) {
    %c0_i32 = arith.constant 0 : i32
    %c0_i32_0 = arith.constant 0 : i32
    %c0_i32_1 = arith.constant 0 : i32
    return %c0_i32, %c0_i32_0 : i32, i32
  }
  func.func @transform_4(%arg0: i32) -> (i32, i32) {
    %c0_i32 = arith.constant 0 : i32
    %c0_i32_0 = arith.constant 0 : i32
    %c0_i32_1 = arith.constant 0 : i32
    return %c0_i32, %c0_i32_0 : i32, i32
  }
  func.func @transform_5(%arg0: i32) -> (i32, i32, i32) {
    %c0_i32 = arith.constant 0 : i32
    %c0_i32_0 = arith.constant 0 : i32
    %c0_i32_1 = arith.constant 0 : i32
    return %arg0, %c0_i32, %c0_i32_0 : i32, i32, i32
  }
}

</mosaic_0001>

<bundles_post_ra>
// kernel: tpu_custom_call.1
= control target key start
LH: loop header
LB: loop body
LE: loop exit
PB: predicated region body
PF: predicated region fallthrough
CT: control target
= control target key end

     0   :  { %10 = vsyncpa [#allocation5], 0  ;;  %s12926_s0 = inlined_call_operand.vmem [shape: f32[2,16,16,4], index: 0, kind: input, shape index: {}]   ;;  %s12927_s1 = inlined_call_operand.vmem [shape: f32[9,4,128], index: 1, kind: input, shape index: {}]   ;;  %s12928_s2 = inlined_call_operand.hbm [shape: f32[9,128,128], index: 2, kind: input, shape index: {}]   ;;  %s12929_s3 = inlined_call_operand.vmem [shape: f32[4,128], index: 3, kind: input, shape index: {}]   ;;  %s12930_s4 = inlined_call_operand.vmem [shape: f32[8,32], index: 4, kind: input, shape index: {}]   ;;  %s12931_s5 = inlined_call_operand.hbm [shape: f32[2,64,128], index: 5, kind: output, shape index: {}]  }
   0x1   :  { %11 = vsyncpa [#allocation6], 0 }
   0x2   :  { %13 = vsyncpa [#allocation6 + $0x1], 0  ;;  %s9986_s18 = smov 0   ;;  %s9988_s19 = smov 0  }
   0x3   :  { %s9990_s20 = smov 0   ;;  %s9992_s21 = smov 0  }
   0x4 LB: > { %s10007_s22 = sadd.s32 4294967295, %s9946_s21   ;;  %s7437_s23 = sadd.s32 4294967294, %s9946_s21   ;;  %s9946_s21 = sphi %s9992_s21, %s13282_s21   ;;  %s9942_s20 = sphi %s9990_s20, %s13281_s20   ;;  %s9938_s19 = sphi %s9988_s19, %s13280_s19   ;;  %s9934_s18 = sphi %s9986_s18, %s13279_s18  }
   0x5   : > { %s10011_s24 = sadd.s32 1, %s9946_s21   ;;  %s136_s25 = sadd.s32 1, %s9942_s20 }
   0x6   : > { %s133_s26 = ssub.s32 %s9946_s21, %s10011_s24  ;;  %p146_p0 = scmp.ne.s32.totalorder %s9942_s20, %s9938_s19 }
   0x7   : > { %p134_p1 = scmp.eq.s32.totalorder %s133_s26, 0  ;;  %p147_p2 = scmp.eq.s32.totalorder %s10007_s22, 1 }
   0x8   : > { %p152_p3 = scmp.ne.s32.totalorder %s9938_s19, %s9934_s18  ;;  %p153_p4 = scmp.eq.s32.totalorder %s7437_s23, 1 }
   0x9   : > { %s10022_s27 = scalar_select %p134_p1, %s9942_s20, %s136_s25  }
   0xa   : > { %p10024_p5 = por %p147_p2, %p146_p0  ;;  %p10028_p6 = por %p153_p4, %p152_p3 }
   0xb   : > { %p7438_p7 = scmp.ge.s32.totalorder %s9946_s21, 1  ;;  %p160_p8 = scmp.lt.s32.totalorder %s9946_s21, 3 }
   0xc   : > { %s12966_s29 = scalar_select %p10028_p6, 1, 0 }
   0xd   : > { %p9811_p9 = scmp.eq.s32.totalorder %s10007_s22, 0  ;;  %p10035_p10 = pnand %p7438_p7, %p160_p8 }
   0xe   : > { %s9948_s6 = smov [#allocation4]  }
   0xf   : > { %s175_s7 = sshll.u32 %s9948_s6, 4  ;;  %p9803_p11 = pneg %p10035_p10  ;;  %s176_s7 = int_to_ptr.vmem [resolvable:$true] %s175_s7 }
  0x10   : > { %s9867_s8 = scalar_lea.vmem %s176_s7, 18432  ;;  %p9875_p3 = scmp.lt.s32.totalorder %s176_s7, %s176_s7 }
  0x11   : > { %p9804_p12 = pnand %p9811_p9, %p9803_p11  ;;  %p9868_p0 = scmp.ne.s32.totalorder %s176_s7, %s9867_s8 }
  0x12   : > { %p9876_p4 = scmp.lt.s32.totalorder %s9867_s8, %s9867_s8 }
  0x13   : > { %p9858_p13 = pneg %p9804_p12 }
  0x14   : > { %p9877_p6 = por %p9876_p4, %p9875_p3 }
  0x15   : > { %p9870_p1 = pnand %p9868_p0, %p9858_p13 }
  0x17   : > { %p9871_p2 = pneg %p9870_p1 }
  0x19   : > { %p9878_p7 = pnand %p9877_p6, %p9871_p2 }
  0x1b   : > { %9881 = shalt.err (!%p9878_p7)
}
  0x1c   : > { %s9949_s9 = smov 128   ;;  %s9950_s10 = smov 8  }
  0x1d   : > { %9806 = dma.hbm_to_vmem [thread:$0]  (!%p9804_p12), %s12928_s2, 18432, %s176_s7, [#allocation5], %s9949_s9, %s9949_s9, %s9950_s10  }
  0x1e   : > { %205 = sbr.rel (%p10035_p10) target bundleno = 1275 (0x4fb), region = 40 }
  0x23   : > { %9925 = dma.done.wait (%p9811_p9), [#allocation5], 18432  }
  0x24   : > { %9927 = vsyncadd (%p9811_p9), [#allocation5], 4294948864  ;;  %vm238_vm0 = vcmask 31744   ;;  %p233_p8 = scmp.lt.s32.totalorder %s10007_s22, 1  ;;  %v9951_v0 = vmov 0.0   ;;  %vm514_vm1 = vcmask 1043456  }
  0x25   : > { %240 = vst.msk [vmem:[#allocation2 + $0x8] sm:$0xff] %vm238_vm0, %v9951_v0  ;;  %239 = vst.msk [vmem:[#allocation2] sm:$0xff] %vm238_vm0, %v9951_v0  ;;  %v7446_v1 = vld [vmem:[%s12927_s1 + $0x4] sm:$0xf]  ;;  %v383_v2 = vld [vmem:[%s12927_s1] sm:$0xf] }
  0x26   : > { %241 = vst.msk [vmem:[#allocation2 + $0x10] sm:$0xff] %vm238_vm0, %v9951_v0  ;;  %242 = vst.msk [vmem:[#allocation2 + $0x18] sm:$0xff] %vm238_vm0, %v9951_v0  ;;  %s234_s13 = scalar_select %p233_p8, %s10007_s22, 1  ;;  %8539 = vmatprep.subr.msk.mxu0 %vm514_vm1, %v7446_v1  ;;  %8589 = vmatprep.subr.msk.mxu1 %vm514_vm1, %v383_v2  ;;  %v7513_v22 = vld [vmem:[%s12927_s1 + $0x8] sm:$0xf]  ;;  %vm9952_vm2 = vmmov 0  }
  0x27   : > { %244 = vst.msk [vmem:[#allocation2 + $0x220] sm:$0xff] %vm238_vm0, %v9951_v0  ;;  %245 = vst.msk [vmem:[#allocation2 + $0x228] sm:$0xff] %vm238_vm0, %v9951_v0  ;;  %8540 = vmatpush3.msk.msra.mxu0 %vm514_vm1, %v7446_v1  ;;  %8590 = vmatpush3.msk.msra.mxu1 %vm514_vm1, %v383_v2  ;;  %v7547_v60 = vld [vmem:[%s12927_s1 + $0xc] sm:$0xf]  ;;  %vm6777_vm3 = vcmask 261120   ;;  %s7769_s23 = sshll.u32 %s10007_s22, 10 }
  0x28   : > { %246 = vst.msk [vmem:[#allocation2 + $0x230] sm:$0xff] %vm238_vm0, %v9951_v0  ;;  %247 = vst.msk [vmem:[#allocation2 + $0x238] sm:$0xff] %vm238_vm0, %v9951_v0  ;;  %s7768_s14 = sshll.u32 %s234_s13, 8  ;;  %8639 = vmatprep.subr.msk.mxu0 %vm514_vm1, %v7513_v22  ;;  %8689 = vmatprep.subr.msk.mxu1 %vm514_vm1, %v7547_v60  ;;  %s12882_s30 = scalar_lea.hbm %s12931_s5, %s7769_s23 }
  0x29   : > { %249 = vst.msk [vmem:[#allocation2 + $0x20] sm:$0xff] %vm238_vm0, %v9951_v0  ;;  %250 = vst.msk [vmem:[#allocation2 + $0x40] sm:$0xff] %vm238_vm0, %v9951_v0  ;;  %s10187_s17 = scalar_lea.vmem %s12926_s0, %s7768_s14  ;;  %s230_s14 = sand.u32 1, %s9938_s19  }
  0x2a   : > { %251 = vst.msk [vmem:[#allocation2 + $0x60] sm:$0xff] %vm238_vm0, %v9951_v0  ;;  %252 = vst.msk [vmem:[#allocation2 + $0x80] sm:$0xff] %vm238_vm0, %v9951_v0  ;;  %v284_v3 = vld [vmem:[%s10187_s17] sm:$0xff]  ;;  %v285_v8 = vld [vmem:[%s10187_s17 + $0x8] sm:$0xff]  ;;  %s7443_s15 = sshll.u32 %s230_s14, 6  ;;  %s12886_s6 = scalar_lea.sflag [#allocation6], %s230_s14 }
  0x2b   : > { %253 = vst.msk [vmem:[#allocation2 + $0xa0] sm:$0xff] %vm238_vm0, %v9951_v0  ;;  %254 = vst.msk [vmem:[#allocation2 + $0xc0] sm:$0xff] %vm238_vm0, %v9951_v0  ;;  %v286_v9 = vld [vmem:[%s10187_s17 + $0x10] sm:$0xff]  ;;  %v287_v10 = vld [vmem:[%s10187_s17 + $0x18] sm:$0xff]  ;;  %s232_s16 = scalar_lea.vmem [#allocation7], %s7443_s15  ;;  %s9953_s22 = smov [#allocation7]  }
  0x2c   : > { %255 = vst.msk [vmem:[#allocation2 + $0xe0] sm:$0xff] %vm238_vm0, %v9951_v0  ;;  %256 = vst.msk [vmem:[#allocation2 + $0x100] sm:$0xff] %vm238_vm0, %v9951_v0  ;;  %v384_v4 = vld [vmem:[#allocation2 + $0x8] sm:$0xff]  ;;  %v288_v11 = vld [vmem:[%s10187_s17 + $0x20] sm:$0xff]  ;;  %s9886_s8 = sshll.u32 %s9953_s22, 4  ;;  %s9887_s8 = int_to_ptr.vmem [resolvable:$false] %s9886_s8 }
  0x2d   : > { %257 = vst.msk [vmem:[#allocation2 + $0x120] sm:$0xff] %vm238_vm0, %v9951_v0  ;;  %258 = vst.msk [vmem:[#allocation2 + $0x140] sm:$0xff] %vm238_vm0, %v9951_v0  ;;  %v385_v5 = vld [vmem:[#allocation2 + $0x10] sm:$0xff]  ;;  %8541 = vmatprep.mubr.msk.f32.mxu0 %vm238_vm0, %v384_v4  ;;  %v289_v12 = vld [vmem:[%s10187_s17 + $0x28] sm:$0xff]  ;;  %s9888_s9 = scalar_lea.vmem %s9887_s8, 2048 }
  0x2e   : > { %259 = vst.msk [vmem:[#allocation2 + $0x160] sm:$0xff] %vm238_vm0, %v9951_v0  ;;  %260 = vst.msk [vmem:[#allocation2 + $0x180] sm:$0xff] %vm238_vm0, %v9951_v0  ;;  %v352_v6 = vld [vmem:[#allocation2 + $0xf] sm:$0xff]  ;;  %8542 = vmatmul.mubr.msk.f32.vlgmr.msra.gmra.mxu0 %vm238_vm0, %v385_v5  ;;  %v291_v14 = vld [vmem:[%s10187_s17 + $0x38] sm:$0xff] }
  0x2f   : > { %261 = vst.msk [vmem:[#allocation2 + $0x1a0] sm:$0xff] %vm238_vm0, %v9951_v0  ;;  %262 = vst.msk [vmem:[#allocation2 + $0x1c0] sm:$0xff] %vm238_vm0, %v9951_v0  ;;  %v290_v13 = vld [vmem:[%s10187_s17 + $0x30] sm:$0xff]  ;;  %v292_v15 = vld [vmem:[%s10187_s17 + $0x40] sm:$0xff]  ;;  %8640 = vmatpush3.msk.msra.mxu0 %vm514_vm1, %v7513_v22 }
  0x30   : > { %263 = vst.msk [vmem:[#allocation2 + $0x1e0] sm:$0xff] %vm238_vm0, %v9951_v0  ;;  %264 = vst.msk [vmem:[#allocation2 + $0x200] sm:$0xff] %vm238_vm0, %v9951_v0  ;;  %v293_v16 = vld [vmem:[%s10187_s17 + $0x48] sm:$0xff]  ;;  %v294_v17 = vld [vmem:[%s10187_s17 + $0x50] sm:$0xff] }
  0x31   : > { %267 = vst.msk [vmem:[#allocation2 + $0x38] sm:$0xff] %vm238_vm0, %v9951_v0  ;;  %268 = vst.msk [vmem:[#allocation2 + $0x58] sm:$0xff] %vm238_vm0, %v9951_v0  ;;  %v295_v18 = vld [vmem:[%s10187_s17 + $0x58] sm:$0xff]  ;;  %v296_v19 = vld [vmem:[%s10187_s17 + $0x60] sm:$0xff] }
  0x32   : > { %269 = vst.msk [vmem:[#allocation2 + $0x78] sm:$0xff] %vm238_vm0, %v9951_v0  ;;  %270 = vst.msk [vmem:[#allocation2 + $0x98] sm:$0xff] %vm238_vm0, %v9951_v0  ;;  %v297_v20 = vld [vmem:[%s10187_s17 + $0x68] sm:$0xff]  ;;  %v298_v21 = vld [vmem:[%s10187_s17 + $0x70] sm:$0xff] }
  0x33   : > { %271 = vst.msk [vmem:[#allocation2 + $0xb8] sm:$0xff] %vm238_vm0, %v9951_v0  ;;  %272 = vst.msk [vmem:[#allocation2 + $0xd8] sm:$0xff] %vm238_vm0, %v9951_v0  ;;  %v299_v23 = vld [vmem:[%s10187_s17 + $0x78] sm:$0xff]  ;;  %v300_v24 = vld [vmem:[%s10187_s17 + $0x80] sm:$0xff] }
  0x34   : > { %273 = vst.msk [vmem:[#allocation2 + $0xf8] sm:$0xff] %vm238_vm0, %v9951_v0  ;;  %274 = vst.msk [vmem:[#allocation2 + $0x118] sm:$0xff] %vm238_vm0, %v9951_v0  ;;  %v301_v27 = vld [vmem:[%s10187_s17 + $0x88] sm:$0xff]  ;;  %v302_v28 = vld [vmem:[%s10187_s17 + $0x90] sm:$0xff] }
  0x35   : > { %275 = vst.msk [vmem:[#allocation2 + $0x138] sm:$0xff] %vm238_vm0, %v9951_v0  ;;  %276 = vst.msk [vmem:[#allocation2 + $0x158] sm:$0xff] %vm238_vm0, %v9951_v0  ;;  %v303_v29 = vld [vmem:[%s10187_s17 + $0x98] sm:$0xff]  ;;  %v304_v30 = vld [vmem:[%s10187_s17 + $0xa0] sm:$0xff] }
  0x36   : > { %277 = vst.msk [vmem:[#allocation2 + $0x178] sm:$0xff] %vm238_vm0, %v9951_v0  ;;  %278 = vst.msk [vmem:[#allocation2 + $0x198] sm:$0xff] %vm238_vm0, %v9951_v0  ;;  %v305_v51 = vld [vmem:[%s10187_s17 + $0xa8] sm:$0xff]  ;;  %v306_v52 = vld [vmem:[%s10187_s17 + $0xb0] sm:$0xff] }
  0x37   : > { %279 = vst.msk [vmem:[#allocation2 + $0x1b8] sm:$0xff] %vm238_vm0, %v9951_v0  ;;  %280 = vst.msk [vmem:[#allocation2 + $0x1d8] sm:$0xff] %vm238_vm0, %v9951_v0  ;;  %v307_v53 = vld [vmem:[%s10187_s17 + $0xb8] sm:$0xff]  ;;  %v308_v54 = vld [vmem:[%s10187_s17 + $0xc0] sm:$0xff] }
  0x38   : > { %281 = vst.msk [vmem:[#allocation2 + $0x1f8] sm:$0xff] %vm238_vm0, %v9951_v0  ;;  %282 = vst.msk [vmem:[#allocation2 + $0x218] sm:$0xff] %vm238_vm0, %v9951_v0  ;;  %v309_v55 = vld [vmem:[%s10187_s17 + $0xc8] sm:$0xff]  ;;  %v310_v56 = vld [vmem:[%s10187_s17 + $0xd0] sm:$0xff] }
  0x39   : > { %3903 = vst [vmem:[#allocation3 + $0x8] sm:$0xff] %v9951_v0  ;;  %3904 = vst [vmem:[#allocation3 + $0x10] sm:$0xff] %v9951_v0  ;;  %v311_v57 = vld [vmem:[%s10187_s17 + $0xd8] sm:$0xff]  ;;  %v312_v58 = vld [vmem:[%s10187_s17 + $0xe0] sm:$0xff] }
  0x3a   : > { %3908 = vst [vmem:[#allocation3 + $0x228] sm:$0xff] %v9951_v0  ;;  %3909 = vst [vmem:[#allocation3 + $0x230] sm:$0xff] %v9951_v0  ;;  %v313_v59 = vld [vmem:[%s10187_s17 + $0xe8] sm:$0xff] }
  0x3b   : > { %3912 = vst [vmem:[#allocation3 + $0x20] sm:$0xff] %v9951_v0  ;;  %3913 = vst [vmem:[#allocation3 + $0x40] sm:$0xff] %v9951_v0 }
  0x3c   : > { %3914 = vst [vmem:[#allocation3 + $0x60] sm:$0xff] %v9951_v0  ;;  %3915 = vst [vmem:[#allocation3 + $0x80] sm:$0xff] %v9951_v0 }
  0x3d   : > { %3916 = vst [vmem:[#allocation3 + $0xa0] sm:$0xff] %v9951_v0  ;;  %3917 = vst [vmem:[#allocation3 + $0xc0] sm:$0xff] %v9951_v0 }
  0x3e   : > { %3918 = vst [vmem:[#allocation3 + $0xe0] sm:$0xff] %v9951_v0  ;;  %3919 = vst [vmem:[#allocation3 + $0x100] sm:$0xff] %v9951_v0 }
  0x3f   : > { %3920 = vst [vmem:[#allocation3 + $0x120] sm:$0xff] %v9951_v0  ;;  %3921 = vst [vmem:[#allocation3 + $0x140] sm:$0xff] %v9951_v0 }
  0x40   : > { %3922 = vst [vmem:[#allocation3 + $0x160] sm:$0xff] %v9951_v0  ;;  %3923 = vst [vmem:[#allocation3 + $0x180] sm:$0xff] %v9951_v0 }
  0x41   : > { %3924 = vst [vmem:[#allocation3 + $0x1a0] sm:$0xff] %v9951_v0  ;;  %3925 = vst [vmem:[#allocation3 + $0x1c0] sm:$0xff] %v9951_v0 }
  0x42   : > { %3926 = vst [vmem:[#allocation3 + $0x1e0] sm:$0xff] %v9951_v0  ;;  %3927 = vst [vmem:[#allocation3 + $0x200] sm:$0xff] %v9951_v0 }
  0x43   : > { %3930 = vst [vmem:[#allocation3 + $0x38] sm:$0xff] %v9951_v0  ;;  %3931 = vst [vmem:[#allocation3 + $0x58] sm:$0xff] %v9951_v0 }
  0x44   : > { %3932 = vst [vmem:[#allocation3 + $0x78] sm:$0xff] %v9951_v0  ;;  %3933 = vst [vmem:[#allocation3 + $0x98] sm:$0xff] %v9951_v0 }
  0x45   : > { %3934 = vst [vmem:[#allocation3 + $0xb8] sm:$0xff] %v9951_v0  ;;  %3935 = vst [vmem:[#allocation3 + $0xd8] sm:$0xff] %v9951_v0 }
  0x46   : > { %3936 = vst [vmem:[#allocation3 + $0xf8] sm:$0xff] %v9951_v0  ;;  %3937 = vst [vmem:[#allocation3 + $0x118] sm:$0xff] %v9951_v0 }
  0x47   : > { %3938 = vst [vmem:[#allocation3 + $0x138] sm:$0xff] %v9951_v0  ;;  %3939 = vst [vmem:[#allocation3 + $0x158] sm:$0xff] %v9951_v0 }
  0x48   : > { %3940 = vst [vmem:[#allocation3 + $0x178] sm:$0xff] %v9951_v0  ;;  %3941 = vst [vmem:[#allocation3 + $0x198] sm:$0xff] %v9951_v0 }
  0x49   : > { %3942 = vst [vmem:[#allocation3 + $0x1b8] sm:$0xff] %v9951_v0  ;;  %3943 = vst [vmem:[#allocation3 + $0x1d8] sm:$0xff] %v9951_v0 }
  0x4a   : > { %3944 = vst [vmem:[#allocation3 + $0x1f8] sm:$0xff] %v9951_v0  ;;  %3945 = vst [vmem:[#allocation3 + $0x218] sm:$0xff] %v9951_v0 }
  0x4b   : > { %3911 = vst [vmem:[#allocation3] sm:$0xff] %v9951_v0  ;;  %3928 = vst [vmem:[#allocation3 + $0x220] sm:$0xff] %v9951_v0 }
  0x4c   : > { %3929 = vst [vmem:[#allocation3 + $0x18] sm:$0xff] %v9951_v0  ;;  %3946 = vst [vmem:[#allocation3 + $0x238] sm:$0xff] %v9951_v0 }
  0x4d   : > { %248 = vst.msk [vmem:[#allocation2] sm:$0xff] %vm238_vm0, %v9951_v0  ;;  %265 = vst.msk [vmem:[#allocation2 + $0x220] sm:$0xff] %vm238_vm0, %v9951_v0 }
  0x4e   : > { %266 = vst.msk [vmem:[#allocation2 + $0x18] sm:$0xff] %vm238_vm0, %v9951_v0  ;;  %283 = vst.msk [vmem:[#allocation2 + $0x238] sm:$0xff] %vm238_vm0, %v9951_v0 }
  0x4f   : > { %317 = vst.msk [vmem:[#allocation2 + $0x28] sm:$0xff] %vm238_vm0, %v284_v3  ;;  %318 = vst.msk [vmem:[#allocation2 + $0x30] sm:$0xff] %vm238_vm0, %v285_v8 }
  0x50   : > { %319 = vst.msk [vmem:[#allocation2 + $0x48] sm:$0xff] %vm238_vm0, %v286_v9  ;;  %320 = vst.msk [vmem:[#allocation2 + $0x50] sm:$0xff] %vm238_vm0, %v287_v10  ;;  %v10404_v9 = vld [vmem:[%s12927_s1 + $0x10] sm:$0xf] }
  0x51   : > { %321 = vst.msk [vmem:[#allocation2 + $0x68] sm:$0xff] %vm238_vm0, %v288_v11  ;;  %322 = vst.msk [vmem:[#allocation2 + $0x70] sm:$0xff] %vm238_vm0, %v289_v12  ;;  %8739 = vmatprep.subr.msk.mxu0 %vm514_vm1, %v10404_v9 }
  0x52   : > { %323 = vst.msk [vmem:[#allocation2 + $0x88] sm:$0xff] %vm238_vm0, %v290_v13  ;;  %324 = vst.msk [vmem:[#allocation2 + $0x90] sm:$0xff] %vm238_vm0, %v291_v14 }
  0x53   : > { %325 = vst.msk [vmem:[#allocation2 + $0xa8] sm:$0xff] %vm238_vm0, %v292_v15  ;;  %326 = vst.msk [vmem:[#allocation2 + $0xb0] sm:$0xff] %vm238_vm0, %v293_v16  ;;  %v314_v15 = vld [vmem:[%s10187_s17 + $0xf0] sm:$0xff] }
  0x54   : > { %v351_v7 = vld [vmem:[#allocation2 + $0x7] sm:$0xff]  ;;  %327 = vst.msk [vmem:[#allocation2 + $0xc8] sm:$0xff] %vm238_vm0, %v294_v17  ;;  %328 = vst.msk [vmem:[#allocation2 + $0xd0] sm:$0xff] %vm238_vm0, %v295_v18  ;;  %v315_v17 = vld [vmem:[%s10187_s17 + $0xf8] sm:$0xff]  ;;  %s7363_s17 = sshll.u32 %s232_s16, 4  ;;  %s12877_s17 = int_to_ptr.vmem [resolvable:$true] %s7363_s17 }
  0x55   : > { %8591 = vmatprep.mubr.msk.f32.mxu1 %vm238_vm0, %v351_v7  ;;  %329 = vst.msk [vmem:[#allocation2 + $0xe8] sm:$0xff] %vm238_vm0, %v296_v19  ;;  %330 = vst.msk [vmem:[#allocation2 + $0xf0] sm:$0xff] %vm238_vm0, %v297_v20  ;;  %v7615_v18 = vld [vmem:[%s12927_s1 + $0x14] sm:$0xf]  ;;  %s9882_s7 = scalar_lea.vmem %s12877_s17, 1024  ;;  %p9889_p11 = scmp.lt.s32.totalorder %s12877_s17, %s9887_s8 }
  0x56   : > { %8592 = vmatmul.mubr.msk.f32.vlgmr.msra.gmra.mxu1 %vm238_vm0, %v352_v6  ;;  %331 = vst.msk [vmem:[#allocation2 + $0x108] sm:$0xff] %vm238_vm0, %v298_v21  ;;  %v10238_v25 = vld [vmem:[#allocation2 + $0x28] sm:$0xff]  ;;  %332 = vst.msk [vmem:[#allocation2 + $0x110] sm:$0xff] %vm238_vm0, %v299_v23  ;;  %v10254_v31 = vld [vmem:[#allocation2 + $0x30] sm:$0xff]  ;;  %p9883_p6 = scmp.ne.s32.totalorder %s12877_s17, %s9882_s7  ;;  %p9890_p12 = scmp.lt.s32.totalorder %s9888_s9, %s9882_s7 }
  0x57   : > { %v10240_v26 = vld [vmem:[#allocation2 + $0x27] sm:$0xff]  ;;  %333 = vst.msk [vmem:[#allocation2 + $0x128] sm:$0xff] %vm238_vm0, %v300_v24  ;;  %8544 = vmatprep.mubr.msk.f32.mxu0 %vm238_vm0, %v10238_v25  ;;  %334 = vst.msk [vmem:[#allocation2 + $0x130] sm:$0xff] %vm238_vm0, %v301_v27  ;;  %v10256_v32 = vld [vmem:[#allocation2 + $0x2f] sm:$0xff]  ;;  %8690 = vmatpush3.msk.msra.mxu1 %vm514_vm1, %v7547_v60 }
  0x58   : > { %8594 = vmatprep.mubr.msk.f32.mxu1 %vm238_vm0, %v10240_v26  ;;  %v10258_v33 = vld [vmem:[#allocation2 + $0x48] sm:$0xff]  ;;  %335 = vst.msk [vmem:[#allocation2 + $0x148] sm:$0xff] %vm238_vm0, %v302_v28  ;;  %336 = vst.msk [vmem:[#allocation2 + $0x150] sm:$0xff] %vm238_vm0, %v303_v29  ;;  %8545 = vmatmul.mubr.msk.f32.gmra.mxu0 %vm238_vm0, %v10254_v31  ;;  %v10274_v35 = vld [vmem:[#allocation2 + $0x50] sm:$0xff]  ;;  %p9884_p9 = pnand %p9883_p6, %p10024_p5  ;;  %p9891_p13 = por %p9890_p12, %p9889_p11 }
  0x59   : > { %337 = vst.msk [vmem:[#allocation2 + $0x168] sm:$0xff] %vm238_vm0, %v304_v30  ;;  %v10268_v34 = vld [vmem:[#allocation2 + $0x47] sm:$0xff]  ;;  %8547 = vmatprep.mubr.msk.f32.mxu0 %vm238_vm0, %v10258_v33  ;;  %v10276_v36 = vld [vmem:[#allocation2 + $0x4f] sm:$0xff]  ;;  %338 = vst.msk [vmem:[#allocation2 + $0x170] sm:$0xff] %vm238_vm0, %v305_v51  ;;  %8789 = vmatprep.subr.msk.mxu1 %vm514_vm1, %v7615_v18 }
  0x5a   : > { %8595 = vmatmul.mubr.msk.f32.gmra.mxu1 %vm238_vm0, %v10256_v32  ;;  %12968 = vst [vmem:[#allocation10_spill] sm:$0xff] %v10268_v34  ;;  %12969 = vst [vmem:[#allocation11_spill] sm:$0xff] %v10276_v36  ;;  %v10278_v37 = vld [vmem:[#allocation2 + $0x68] sm:$0xff]  ;;  %v10290_v39 = vld [vmem:[#allocation2 + $0x70] sm:$0xff]  ;;  %p9885_p10 = pneg %p9884_p9 }
  0x5b   : > { %8597 = vmatprep.mubr.msk.f32.mxu1 %vm238_vm0, %v10268_v34  ;;  %v10280_v38 = vld [vmem:[#allocation2 + $0x67] sm:$0xff]  ;;  %v10292_v40 = vld [vmem:[#allocation2 + $0x6f] sm:$0xff]  ;;  %339 = vst.msk [vmem:[#allocation2 + $0x188] sm:$0xff] %vm238_vm0, %v306_v52  ;;  %340 = vst.msk [vmem:[#allocation2 + $0x190] sm:$0xff] %vm238_vm0, %v307_v53 }
  0x5c   : > { %12970 = vst [vmem:[#allocation12_spill] sm:$0xff] %v10280_v38  ;;  %8548 = vmatmul.mubr.msk.f32.gmra.mxu0 %vm238_vm0, %v10274_v35  ;;  %12971 = vst [vmem:[#allocation13_spill] sm:$0xff] %v10292_v40  ;;  %v10294_v41 = vld [vmem:[#allocation2 + $0x88] sm:$0xff]  ;;  %v10306_v43 = vld [vmem:[#allocation2 + $0x90] sm:$0xff]  ;;  %p9892_p0 = pnand %p9891_p13, %p9885_p10 }
  0x5d   : > { %8550 = vmatprep.mubr.msk.f32.mxu0 %vm238_vm0, %v10278_v37  ;;  %v10296_v42 = vld [vmem:[#allocation2 + $0x87] sm:$0xff]  ;;  %v10308_v44 = vld [vmem:[#allocation2 + $0x8f] sm:$0xff]  ;;  %341 = vst.msk [vmem:[#allocation2 + $0x1a8] sm:$0xff] %vm238_vm0, %v308_v54  ;;  %342 = vst.msk [vmem:[#allocation2 + $0x1b0] sm:$0xff] %vm238_vm0, %v309_v55 }
  0x5e   : > { %8598 = vmatmul.mubr.msk.f32.gmra.mxu1 %vm238_vm0, %v10276_v36  ;;  %12972 = vst [vmem:[#allocation14_spill] sm:$0xff] %v10296_v42  ;;  %12973 = vst [vmem:[#allocation15_spill] sm:$0xff] %v10308_v44  ;;  %v10310_v45 = vld [vmem:[#allocation2 + $0xa8] sm:$0xff]  ;;  %v10314_v47 = vld [vmem:[#allocation2 + $0xb0] sm:$0xff] }
  0x5f   : > { %8600 = vmatprep.mubr.msk.f32.mxu1 %vm238_vm0, %v10280_v38  ;;  %v10312_v46 = vld [vmem:[#allocation2 + $0xa7] sm:$0xff]  ;;  %v10316_v48 = vld [vmem:[#allocation2 + $0xaf] sm:$0xff]  ;;  %343 = vst.msk [vmem:[#allocation2 + $0x1c8] sm:$0xff] %vm238_vm0, %v310_v56  ;;  %344 = vst.msk [vmem:[#allocation2 + $0x1d0] sm:$0xff] %vm238_vm0, %v311_v57 }
  0x60   : > { %8551 = vmatmul.mubr.msk.f32.gmra.mxu0 %vm238_vm0, %v10290_v39  ;;  %12974 = vst [vmem:[#allocation16_spill] sm:$0xff] %v10312_v46  ;;  %12975 = vst [vmem:[#allocation17_spill] sm:$0xff] %v10316_v48  ;;  %v10322_v49 = vld [vmem:[#allocation2 + $0xc8] sm:$0xff]  ;;  %v10359_v61 = vld [vmem:[#allocation2 + $0xd0] sm:$0xff] }
  0x61   : > { %8553 = vmatprep.mubr.msk.f32.mxu0 %vm238_vm0, %v10294_v41  ;;  %v10324_v50 = vld [vmem:[#allocation2 + $0xc7] sm:$0xff]  ;;  %345 = vst.msk [vmem:[#allocation2 + $0x1e8] sm:$0xff] %vm238_vm0, %v312_v58  ;;  %346 = vst.msk [vmem:[#allocation2 + $0x1f0] sm:$0xff] %vm238_vm0, %v313_v59  ;;  %v10361_v62 = vld [vmem:[#allocation2 + $0xcf] sm:$0xff] }
  0x62   : > { %8601 = vmatmul.mubr.msk.f32.gmra.mxu1 %vm238_vm0, %v10292_v40  ;;  %12976 = vst [vmem:[#allocation18_spill] sm:$0xff] %v10324_v50  ;;  %12977 = vst [vmem:[#allocation19_spill] sm:$0xff] %v10361_v62  ;;  %v10363_v63 = vld [vmem:[#allocation2 + $0xe8] sm:$0xff]  ;;  %v10377_v1 = vld [vmem:[#allocation2 + $0xf0] sm:$0xff] }
  0x63   : > { %8603 = vmatprep.mubr.msk.f32.mxu1 %vm238_vm0, %v10296_v42  ;;  %v10365_v0 = vld [vmem:[#allocation2 + $0xe7] sm:$0xff]  ;;  %v10379_v2 = vld [vmem:[#allocation2 + $0xef] sm:$0xff]  ;;  %347 = vst.msk [vmem:[#allocation2 + $0x208] sm:$0xff] %vm238_vm0, %v314_v15  ;;  %348 = vst.msk [vmem:[#allocation2 + $0x210] sm:$0xff] %vm238_vm0, %v315_v17 }
  0x64   : > { %8554 = vmatmul.mubr.msk.f32.gmra.mxu0 %vm238_vm0, %v10306_v43  ;;  %12978 = vst [vmem:[#allocation20_spill] sm:$0xff] %v10365_v0  ;;  %12979 = vst [vmem:[#allocation21_spill] sm:$0xff] %v10379_v2  ;;  %v10381_v3 = vld [vmem:[#allocation2 + $0x108] sm:$0xff]  ;;  %v10393_v5 = vld [vmem:[#allocation2 + $0x110] sm:$0xff] }
  0x65   : > { %8556 = vmatprep.mubr.msk.f32.mxu0 %vm238_vm0, %v10310_v45  ;;  %v10383_v4 = vld [vmem:[#allocation2 + $0x107] sm:$0xff]  ;;  %v10395_v6 = vld [vmem:[#allocation2 + $0x10f] sm:$0xff] }
  0x66   : > { %8604 = vmatmul.mubr.msk.f32.gmra.mxu1 %vm238_vm0, %v10308_v44  ;;  %12980 = vst [vmem:[#allocation22_spill] sm:$0xff] %v10383_v4  ;;  %12981 = vst [vmem:[#allocation23_spill] sm:$0xff] %v10395_v6  ;;  %v10397_v7 = vld [vmem:[#allocation2 + $0x128] sm:$0xff]  ;;  %v10414_v10 = vld [vmem:[#allocation2 + $0x130] sm:$0xff] }
  0x67   : > { %8606 = vmatprep.mubr.msk.f32.mxu1 %vm238_vm0, %v10312_v46  ;;  %v10399_v8 = vld [vmem:[#allocation2 + $0x127] sm:$0xff]  ;;  %v10416_v11 = vld [vmem:[#allocation2 + $0x12f] sm:$0xff] }
  0x68   : > { %8557 = vmatmul.mubr.msk.f32.gmra.mxu0 %vm238_vm0, %v10314_v47  ;;  %12982 = vst [vmem:[#allocation24_spill] sm:$0xff] %v10399_v8  ;;  %12983 = vst [vmem:[#allocation25_spill] sm:$0xff] %v10416_v11  ;;  %v10418_v12 = vld [vmem:[#allocation2 + $0x148] sm:$0xff]  ;;  %v10428_v14 = vld [vmem:[#allocation2 + $0x150] sm:$0xff] }
  0x69   : > { %8559 = vmatprep.mubr.msk.f32.mxu0 %vm238_vm0, %v10322_v49  ;;  %v10420_v13 = vld [vmem:[#allocation2 + $0x147] sm:$0xff]  ;;  %v10435_v16 = vld [vmem:[#allocation2 + $0x14f] sm:$0xff] }
  0x6a   : > { %8607 = vmatmul.mubr.msk.f32.gmra.mxu1 %vm238_vm0, %v10316_v48  ;;  %12984 = vst [vmem:[#allocation26_spill] sm:$0xff] %v10420_v13  ;;  %12985 = vst [vmem:[#allocation27_spill] sm:$0xff] %v10435_v16  ;;  %v10442_v19 = vld [vmem:[#allocation2 + $0x168] sm:$0xff]  ;;  %v10456_v21 = vld [vmem:[#allocation2 + $0x170] sm:$0xff] }
  0x6b   : > { %8609 = vmatprep.mubr.msk.f32.mxu1 %vm238_vm0, %v10324_v50  ;;  %v10444_v20 = vld [vmem:[#allocation2 + $0x167] sm:$0xff]  ;;  %v10458_v22 = vld [vmem:[#allocation2 + $0x16f] sm:$0xff] }
  0x6c   : > { %8560 = vmatmul.mubr.msk.f32.gmra.mxu0 %vm238_vm0, %v10359_v61  ;;  %12986 = vst [vmem:[#allocation28_spill] sm:$0xff] %v10444_v20  ;;  %12987 = vst [vmem:[#allocation29_spill] sm:$0xff] %v10458_v22  ;;  %v10460_v23 = vld [vmem:[#allocation2 + $0x188] sm:$0xff]  ;;  %v10472_v27 = vld [vmem:[#allocation2 + $0x190] sm:$0xff] }
  0x6d   : > { %8562 = vmatprep.mubr.msk.f32.mxu0 %vm238_vm0, %v10363_v63  ;;  %v10462_v24 = vld [vmem:[#allocation2 + $0x187] sm:$0xff]  ;;  %v10474_v28 = vld [vmem:[#allocation2 + $0x18f] sm:$0xff] }
  0x6e   : > { %8610 = vmatmul.mubr.msk.f32.gmra.mxu1 %vm238_vm0, %v10361_v62  ;;  %12988 = vst [vmem:[#allocation30_spill] sm:$0xff] %v10462_v24  ;;  %12989 = vst [vmem:[#allocation31_spill] sm:$0xff] %v10474_v28  ;;  %v10476_v29 = vld [vmem:[#allocation2 + $0x1a8] sm:$0xff]  ;;  %v10488_v51 = vld [vmem:[#allocation2 + $0x1b0] sm:$0xff] }
  0x6f   : > { %8612 = vmatprep.mubr.msk.f32.mxu1 %vm238_vm0, %v10365_v0  ;;  %v10478_v30 = vld [vmem:[#allocation2 + $0x1a7] sm:$0xff]  ;;  %v10490_v52 = vld [vmem:[#allocation2 + $0x1af] sm:$0xff] }
  0x70   : > { %8563 = vmatmul.mubr.msk.f32.gmra.mxu0 %vm238_vm0, %v10377_v1  ;;  %12990 = vst [vmem:[#allocation32_spill] sm:$0xff] %v10478_v30  ;;  %12991 = vst [vmem:[#allocation33_spill] sm:$0xff] %v10490_v52  ;;  %v10492_v53 = vld [vmem:[#allocation2 + $0x1c8] sm:$0xff]  ;;  %v10504_v55 = vld [vmem:[#allocation2 + $0x1d0] sm:$0xff] }
  0x71   : > { %8565 = vmatprep.mubr.msk.f32.mxu0 %vm238_vm0, %v10381_v3  ;;  %v10494_v54 = vld [vmem:[#allocation2 + $0x1c7] sm:$0xff]  ;;  %v10506_v56 = vld [vmem:[#allocation2 + $0x1cf] sm:$0xff] }
  0x72   : > { %8613 = vmatmul.mubr.msk.f32.gmra.mxu1 %vm238_vm0, %v10379_v2  ;;  %12992 = vst [vmem:[#allocation34_spill] sm:$0xff] %v10494_v54  ;;  %12993 = vst [vmem:[#allocation35_spill] sm:$0xff] %v10506_v56  ;;  %v10508_v57 = vld [vmem:[#allocation2 + $0x1e8] sm:$0xff]  ;;  %v10520_v59 = vld [vmem:[#allocation2 + $0x1f0] sm:$0xff] }
  0x73   : > { %8615 = vmatprep.mubr.msk.f32.mxu1 %vm238_vm0, %v10383_v4  ;;  %12994 = vst [vmem:[#allocation36_spill] sm:$0xff] %v10508_v57  ;;  %v10510_v58 = vld [vmem:[#allocation2 + $0x1e7] sm:$0xff]  ;;  %12995 = vst [vmem:[#allocation37_spill] sm:$0xff] %v10520_v59  ;;  %v10522_v60 = vld [vmem:[#allocation2 + $0x1ef] sm:$0xff] }
  0x74   : > { %8566 = vmatmul.mubr.msk.f32.gmra.mxu0 %vm238_vm0, %v10393_v5  ;;  %v1067_v15 = vld [vmem:[#allocation2 + $0x9] sm:$0xff]  ;;  %v1068_v17 = vld [vmem:[#allocation2 + $0x11] sm:$0xff] }
  0x75   : > { %8568 = vmatprep.mubr.msk.f32.mxu0 %vm238_vm0, %v10397_v7 }
  0x76   : > { %8616 = vmatmul.mubr.msk.f32.gmra.mxu1 %vm238_vm0, %v10395_v6 }
  0x77   : > { %8618 = vmatprep.mubr.msk.f32.mxu1 %vm238_vm0, %v10399_v8 }
  0x78   : > { %8569 = vmatmul.mubr.msk.f32.gmra.mxu0 %vm238_vm0, %v10414_v10 }
  0x79   : > { %8571 = vmatprep.mubr.msk.f32.mxu0 %vm238_vm0, %v10418_v12 }
  0x7a   : > { %8619 = vmatmul.mubr.msk.f32.gmra.mxu1 %vm238_vm0, %v10416_v11 }
  0x7b   : > { %8621 = vmatprep.mubr.msk.f32.mxu1 %vm238_vm0, %v10420_v13 }
  0x7c   : > { %8572 = vmatmul.mubr.msk.f32.gmra.mxu0 %vm238_vm0, %v10428_v14 }
  0x7d   : > { %8574 = vmatprep.mubr.msk.f32.mxu0 %vm238_vm0, %v10442_v19 }
  0x7e   : > { %8622 = vmatmul.mubr.msk.f32.gmra.mxu1 %vm238_vm0, %v10435_v16 }
  0x7f   : > { %8624 = vmatprep.mubr.msk.f32.mxu1 %vm238_vm0, %v10444_v20 }
  0x80   : > { %8575 = vmatmul.mubr.msk.f32.gmra.mxu0 %vm238_vm0, %v10456_v21 }
  0x81   : > { %8577 = vmatprep.mubr.msk.f32.mxu0 %vm238_vm0, %v10460_v23 }
  0x82   : > { %8625 = vmatmul.mubr.msk.f32.gmra.mxu1 %vm238_vm0, %v10458_v22 }
  0x83   : > { %8627 = vmatprep.mubr.msk.f32.mxu1 %vm238_vm0, %v10462_v24 }
  0x84   : > { %8578 = vmatmul.mubr.msk.f32.gmra.mxu0 %vm238_vm0, %v10472_v27 }
  0x85   : > { %8580 = vmatprep.mubr.msk.f32.mxu0 %vm238_vm0, %v10476_v29 }
  0x86   : > { %8628 = vmatmul.mubr.msk.f32.gmra.mxu1 %vm238_vm0, %v10474_v28 }
  0x87   : > { %8630 = vmatprep.mubr.msk.f32.mxu1 %vm238_vm0, %v10478_v30 }
  0x88   : > { %8581 = vmatmul.mubr.msk.f32.gmra.mxu0 %vm238_vm0, %v10488_v51 }
  0x89   : > { %8583 = vmatprep.mubr.msk.f32.mxu0 %vm238_vm0, %v10492_v53 }
  0x8a   : > { %8631 = vmatmul.mubr.msk.f32.gmra.mxu1 %vm238_vm0, %v10490_v52 }
  0x8b   : > { %8633 = vmatprep.mubr.msk.f32.mxu1 %vm238_vm0, %v10494_v54 }
  0x8c   : > { %8584 = vmatmul.mubr.msk.f32.gmra.mxu0 %vm238_vm0, %v10504_v55 }
  0x8d   : > { %8586 = vmatprep.mubr.msk.f32.mxu0 %vm238_vm0, %v10508_v57  ;;  %v10531_v57 = vld [vmem:[#allocation2 + $0x29] sm:$0xff] }
  0x8e   : > { %8634 = vmatmul.mubr.msk.f32.gmra.mxu1 %vm238_vm0, %v10506_v56 }
  0x8f   : > { %8636 = vmatprep.mubr.msk.f32.mxu1 %vm238_vm0, %v10510_v58 }
  0x90   : > { %8587 = vmatmul.mubr.msk.f32.gmra.mxu0 %vm238_vm0, %v10520_v59  ;;  %v10539_v59 = vld [vmem:[%s12927_s1 + $0x18] sm:$0xf] }
  0x91   : > { %8641 = vmatprep.mubr.msk.f32.mxu0 %vm238_vm0, %v1067_v15  ;;  %v10544_v15 = vld [vmem:[%s12927_s1 + $0x1c] sm:$0xf] }
  0x92   : > { %8637 = vmatmul.mubr.msk.f32.gmra.mxu1 %vm238_vm0, %v10522_v60 }
  0x93   : > { %8691 = vmatprep.mubr.msk.f32.mxu1 %vm238_vm0, %v10240_v26  ;;  %v10548_v26 = vld [vmem:[#allocation2 + $0x31] sm:$0xff] }
  0x94   : > { %8642 = vmatmul.mubr.msk.f32.vlgmr.msra.gmra.mxu0 %vm238_vm0, %v1068_v17  ;;  %v10552_v17 = vld [vmem:[#allocation2 + $0x49] sm:$0xff] }
  0x95   : > { %8644 = vmatprep.mubr.msk.f32.mxu0 %vm238_vm0, %v10531_v57  ;;  %8740 = vmatpush3.msk.msra.mxu0 %vm514_vm1, %v10404_v9  ;;  %v10571_v9 = vld [vmem:[#allocation2 + $0x69] sm:$0xff] }
  0x96   : > { %8692 = vmatmul.mubr.msk.f32.vlgmr.msra.gmra.mxu1 %vm238_vm0, %v10256_v32  ;;  %8839 = vmatprep.subr.msk.mxu0 %vm514_vm1, %v10539_v59  ;;  %v10567_v32 = vld [vmem:[#allocation2 + $0x51] sm:$0xff] }
  0x97   : > { %8694 = vmatprep.mubr.msk.f32.mxu1 %vm238_vm0, %v10268_v34  ;;  %8790 = vmatpush3.msk.msra.mxu1 %vm514_vm1, %v7615_v18  ;;  %v10579_v18 = vld [vmem:[#allocation2 + $0x71] sm:$0xff]  ;;  %v10717_v34 = vld [vmem:[#allocation2 + $0x207] sm:$0xff] }
  0x98   : > { %8889 = vmatprep.subr.msk.mxu1 %vm514_vm1, %v10544_v15  ;;  %8645 = vmatmul.mubr.msk.f32.gmra.mxu0 %vm238_vm0, %v10548_v26  ;;  %12996 = vst [vmem:[#allocation38_spill] sm:$0xff] %v10717_v34 }
  0x99   : > { %8647 = vmatprep.mubr.msk.f32.mxu0 %vm238_vm0, %v10552_v17 }
  0x9a   : > { %8695 = vmatmul.mubr.msk.f32.gmra.mxu1 %vm238_vm0, %v10276_v36  ;;  %v10583_v36 = vld [vmem:[#allocation2 + $0x89] sm:$0xff] }
  0x9b   : > { %8697 = vmatprep.mubr.msk.f32.mxu1 %vm238_vm0, %v10280_v38  ;;  %v10595_v38 = vld [vmem:[#allocation2 + $0xa9] sm:$0xff] }
  0x9c   : > { %8648 = vmatmul.mubr.msk.f32.gmra.mxu0 %vm238_vm0, %v10567_v32 }
  0x9d   : > { %8650 = vmatprep.mubr.msk.f32.mxu0 %vm238_vm0, %v10571_v9 }
  0x9e   : > { %8698 = vmatmul.mubr.msk.f32.gmra.mxu1 %vm238_vm0, %v10292_v40  ;;  %v10591_v40 = vld [vmem:[#allocation2 + $0x91] sm:$0xff] }
  0x9f   : > { %8700 = vmatprep.mubr.msk.f32.mxu1 %vm238_vm0, %v10296_v42  ;;  %v10607_v42 = vld [vmem:[#allocation2 + $0xc9] sm:$0xff] }
  0xa0   : > { %8651 = vmatmul.mubr.msk.f32.gmra.mxu0 %vm238_vm0, %v10579_v18 }
  0xa1   : > { %8653 = vmatprep.mubr.msk.f32.mxu0 %vm238_vm0, %v10583_v36 }
  0xa2   : > { %8701 = vmatmul.mubr.msk.f32.gmra.mxu1 %vm238_vm0, %v10308_v44  ;;  %v10603_v44 = vld [vmem:[#allocation2 + $0xb1] sm:$0xff] }
  0xa3   : > { %8703 = vmatprep.mubr.msk.f32.mxu1 %vm238_vm0, %v10312_v46  ;;  %v10619_v46 = vld [vmem:[#allocation2 + $0xe9] sm:$0xff] }
  0xa4   : > { %8654 = vmatmul.mubr.msk.f32.gmra.mxu0 %vm238_vm0, %v10591_v40 }
  0xa5   : > { %8656 = vmatprep.mubr.msk.f32.mxu0 %vm238_vm0, %v10595_v38 }
  0xa6   : > { %8704 = vmatmul.mubr.msk.f32.gmra.mxu1 %vm238_vm0, %v10316_v48  ;;  %v10615_v48 = vld [vmem:[#allocation2 + $0xd1] sm:$0xff] }
  0xa7   : > { %8706 = vmatprep.mubr.msk.f32.mxu1 %vm238_vm0, %v10324_v50  ;;  %v10631_v50 = vld [vmem:[#allocation2 + $0x109] sm:$0xff] }
  0xa8   : > { %8657 = vmatmul.mubr.msk.f32.gmra.mxu0 %vm238_vm0, %v10603_v44 }
  0xa9   : > { %8659 = vmatprep.mubr.msk.f32.mxu0 %vm238_vm0, %v10607_v42 }
  0xaa   : > { %8707 = vmatmul.mubr.msk.f32.gmra.mxu1 %vm238_vm0, %v10361_v62  ;;  %v10627_v62 = vld [vmem:[#allocation2 + $0xf1] sm:$0xff] }
  0xab   : > { %8709 = vmatprep.mubr.msk.f32.mxu1 %vm238_vm0, %v10365_v0  ;;  %v10643_v0 = vld [vmem:[#allocation2 + $0x129] sm:$0xff] }
  0xac   : > { %8660 = vmatmul.mubr.msk.f32.gmra.mxu0 %vm238_vm0, %v10615_v48 }
  0xad   : > { %8662 = vmatprep.mubr.msk.f32.mxu0 %vm238_vm0, %v10619_v46 }
  0xae   : > { %8710 = vmatmul.mubr.msk.f32.gmra.mxu1 %vm238_vm0, %v10379_v2  ;;  %v10639_v2 = vld [vmem:[#allocation2 + $0x111] sm:$0xff] }
  0xaf   : > { %8712 = vmatprep.mubr.msk.f32.mxu1 %vm238_vm0, %v10383_v4  ;;  %v10655_v4 = vld [vmem:[#allocation2 + $0x149] sm:$0xff] }
  0xb0   : > { %8663 = vmatmul.mubr.msk.f32.gmra.mxu0 %vm238_vm0, %v10627_v62 }
  0xb1   : > { %8665 = vmatprep.mubr.msk.f32.mxu0 %vm238_vm0, %v10631_v50 }
  0xb2   : > { %8713 = vmatmul.mubr.msk.f32.gmra.mxu1 %vm238_vm0, %v10395_v6  ;;  %v10651_v6 = vld [vmem:[#allocation2 + $0x131] sm:$0xff] }
  0xb3   : > { %8715 = vmatprep.mubr.msk.f32.mxu1 %vm238_vm0, %v10399_v8  ;;  %v10667_v8 = vld [vmem:[#allocation2 + $0x169] sm:$0xff] }
  0xb4   : > { %8666 = vmatmul.mubr.msk.f32.gmra.mxu0 %vm238_vm0, %v10639_v2 }
  0xb5   : > { %8668 = vmatprep.mubr.msk.f32.mxu0 %vm238_vm0, %v10643_v0 }
  0xb6   : > { %8716 = vmatmul.mubr.msk.f32.gmra.mxu1 %vm238_vm0, %v10416_v11  ;;  %v10663_v11 = vld [vmem:[#allocation2 + $0x151] sm:$0xff] }
  0xb7   : > { %8718 = vmatprep.mubr.msk.f32.mxu1 %vm238_vm0, %v10420_v13  ;;  %v10679_v13 = vld [vmem:[#allocation2 + $0x189] sm:$0xff] }
  0xb8   : > { %8669 = vmatmul.mubr.msk.f32.gmra.mxu0 %vm238_vm0, %v10651_v6 }
  0xb9   : > { %8671 = vmatprep.mubr.msk.f32.mxu0 %vm238_vm0, %v10655_v4 }
  0xba   : > { %8719 = vmatmul.mubr.msk.f32.gmra.mxu1 %vm238_vm0, %v10435_v16  ;;  %v10675_v16 = vld [vmem:[#allocation2 + $0x171] sm:$0xff] }
  0xbb   : > { %8721 = vmatprep.mubr.msk.f32.mxu1 %vm238_vm0, %v10444_v20  ;;  %v10691_v20 = vld [vmem:[#allocation2 + $0x1a9] sm:$0xff] }
  0xbc   : > { %8672 = vmatmul.mubr.msk.f32.gmra.mxu0 %vm238_vm0, %v10663_v11 }
  0xbd   : > { %8674 = vmatprep.mubr.msk.f32.mxu0 %vm238_vm0, %v10667_v8 }
  0xbe   : > { %8722 = vmatmul.mubr.msk.f32.gmra.mxu1 %vm238_vm0, %v10458_v22  ;;  %v10687_v22 = vld [vmem:[#allocation2 + $0x191] sm:$0xff] }
  0xbf   : > { %8724 = vmatprep.mubr.msk.f32.mxu1 %vm238_vm0, %v10462_v24  ;;  %v10703_v24 = vld [vmem:[#allocation2 + $0x1c9] sm:$0xff] }
  0xc0   : > { %8675 = vmatmul.mubr.msk.f32.gmra.mxu0 %vm238_vm0, %v10675_v16 }
  0xc1   : > { %8677 = vmatprep.mubr.msk.f32.mxu0 %vm238_vm0, %v10679_v13 }
  0xc2   : > { %8725 = vmatmul.mubr.msk.f32.gmra.mxu1 %vm238_vm0, %v10474_v28  ;;  %v10699_v28 = vld [vmem:[#allocation2 + $0x1b1] sm:$0xff] }
  0xc3   : > { %8727 = vmatprep.mubr.msk.f32.mxu1 %vm238_vm0, %v10478_v30  ;;  %v10715_v30 = vld [vmem:[#allocation2 + $0x1e9] sm:$0xff] }
  0xc4   : > { %8678 = vmatmul.mubr.msk.f32.gmra.mxu0 %vm238_vm0, %v10687_v22 }
  0xc5   : > { %8680 = vmatprep.mubr.msk.f32.mxu0 %vm238_vm0, %v10691_v20 }
  0xc6   : > { %8728 = vmatmul.mubr.msk.f32.gmra.mxu1 %vm238_vm0, %v10490_v52  ;;  %v10711_v52 = vld [vmem:[#allocation2 + $0x1d1] sm:$0xff] }
  0xc7   : > { %8730 = vmatprep.mubr.msk.f32.mxu1 %vm238_vm0, %v10494_v54  ;;  %v10729_v54 = vld [vmem:[#allocation2 + $0x20f] sm:$0xff] }
  0xc8   : > { %8681 = vmatmul.mubr.msk.f32.gmra.mxu0 %vm238_vm0, %v10699_v28 }
  0xc9   : > { %8683 = vmatprep.mubr.msk.f32.mxu0 %vm238_vm0, %v10703_v24 }
  0xca   : > { %8731 = vmatmul.mubr.msk.f32.gmra.mxu1 %vm238_vm0, %v10506_v56  ;;  %v10725_v56 = vld [vmem:[#allocation2 + $0x1f1] sm:$0xff] }
  0xcb   : > { %8733 = vmatprep.mubr.msk.f32.mxu1 %vm238_vm0, %v10510_v58 }
  0xcc   : > { %8684 = vmatmul.mubr.msk.f32.gmra.mxu0 %vm238_vm0, %v10711_v52 }
  0xcd   : > { %8686 = vmatprep.mubr.msk.f32.mxu0 %vm238_vm0, %v10715_v30 }
  0xce   : > { %8734 = vmatmul.mubr.msk.f32.gmra.mxu1 %vm238_vm0, %v10522_v60 }
  0xcf   : > { %8736 = vmatprep.mubr.msk.f32.mxu1 %vm238_vm0, %v10717_v34  ;;  %v10746_v34 = vld [vmem:[%s12927_s1 + $0x20] sm:$0xf] }
  0xd0   : > { %8687 = vmatmul.mubr.msk.f32.gmra.mxu0 %vm238_vm0, %v10725_v56 }
  0xd1   : > { %8741 = vmatprep.mubr.msk.f32.mxu0 %vm238_vm0, %v10238_v25  ;;  %v12997_v25 = vld [vmem:[#allocation36_spill] sm:$0xff] }
  0xd2   : > { %8737 = vmatmul.mubr.msk.f32.gmra.mxu1 %vm238_vm0, %v10729_v54 }
  0xd3   : > { %8791 = vmatprep.mubr.msk.f32.mxu1 %vm238_vm0, %v10531_v57  ;;  %v13000_v57 = vld [vmem:[#allocation11_spill] sm:$0xff] }
  0xd4   : > { %8742 = vmatmul.mubr.msk.f32.vlgmr.msra.gmra.mxu0 %vm238_vm0, %v10254_v31  ;;  %v10862_v31 = vld [vmem:[#allocation2 + $0x208] sm:$0xff] }
  0xd5   : > { %8744 = vmatprep.mubr.msk.f32.mxu0 %vm238_vm0, %v10258_v33  ;;  %8840 = vmatpush3.msk.msra.mxu0 %vm514_vm1, %v10539_v59  ;;  %v13001_v59 = vld [vmem:[#allocation12_spill] sm:$0xff] }
  0xd6   : > { %8792 = vmatmul.mubr.msk.f32.vlgmr.msra.gmra.mxu1 %vm238_vm0, %v10548_v26  ;;  %8939 = vmatprep.subr.msk.mxu0 %vm514_vm1, %v10746_v34  ;;  %v13002_v26 = vld [vmem:[#allocation13_spill] sm:$0xff] }
  0xd7   : > { %8794 = vmatprep.mubr.msk.f32.mxu1 %vm238_vm0, %v10552_v17  ;;  %8890 = vmatpush3.msk.msra.mxu1 %vm514_vm1, %v10544_v15 }
  0xd8   : > { %8745 = vmatmul.mubr.msk.f32.gmra.mxu0 %vm238_vm0, %v10274_v35 }
  0xd9   : > { %8747 = vmatprep.mubr.msk.f32.mxu0 %vm238_vm0, %v10278_v37 }
  0xda   : > { %8795 = vmatmul.mubr.msk.f32.gmra.mxu1 %vm238_vm0, %v10567_v32 }
  0xdb   : > { %8797 = vmatprep.mubr.msk.f32.mxu1 %vm238_vm0, %v10571_v9 }
  0xdc   : > { %8748 = vmatmul.mubr.msk.f32.gmra.mxu0 %vm238_vm0, %v10290_v39 }
  0xdd   : > { %8750 = vmatprep.mubr.msk.f32.mxu0 %vm238_vm0, %v10294_v41 }
  0xde   : > { %8798 = vmatmul.mubr.msk.f32.gmra.mxu1 %vm238_vm0, %v10579_v18 }
  0xdf   : > { %8800 = vmatprep.mubr.msk.f32.mxu1 %vm238_vm0, %v10583_v36 }
  0xe0   : > { %8751 = vmatmul.mubr.msk.f32.gmra.mxu0 %vm238_vm0, %v10306_v43 }
  0xe1   : > { %8753 = vmatprep.mubr.msk.f32.mxu0 %vm238_vm0, %v10310_v45 }
  0xe2   : > { %8801 = vmatmul.mubr.msk.f32.gmra.mxu1 %vm238_vm0, %v10591_v40 }
  0xe3   : > { %8803 = vmatprep.mubr.msk.f32.mxu1 %vm238_vm0, %v10595_v38 }
  0xe4   : > { %8754 = vmatmul.mubr.msk.f32.gmra.mxu0 %vm238_vm0, %v10314_v47 }
  0xe5   : > { %8756 = vmatprep.mubr.msk.f32.mxu0 %vm238_vm0, %v10322_v49 }
  0xe6   : > { %8804 = vmatmul.mubr.msk.f32.gmra.mxu1 %vm238_vm0, %v10603_v44 }
  0xe7   : > { %8806 = vmatprep.mubr.msk.f32.mxu1 %vm238_vm0, %v10607_v42 }
  0xe8   : > { %8757 = vmatmul.mubr.msk.f32.gmra.mxu0 %vm238_vm0, %v10359_v61 }
  0xe9   : > { %8759 = vmatprep.mubr.msk.f32.mxu0 %vm238_vm0, %v10363_v63 }
  0xea   : > { %8807 = vmatmul.mubr.msk.f32.gmra.mxu1 %vm238_vm0, %v10615_v48 }
  0xeb   : > { %8809 = vmatprep.mubr.msk.f32.mxu1 %vm238_vm0, %v10619_v46 }
  0xec   : > { %8760 = vmatmul.mubr.msk.f32.gmra.mxu0 %vm238_vm0, %v10377_v1 }
  0xed   : > { %8762 = vmatprep.mubr.msk.f32.mxu0 %vm238_vm0, %v10381_v3 }
  0xee   : > { %8810 = vmatmul.mubr.msk.f32.gmra.mxu1 %vm238_vm0, %v10627_v62 }
  0xef   : > { %8812 = vmatprep.mubr.msk.f32.mxu1 %vm238_vm0, %v10631_v50 }
  0xf0   : > { %8763 = vmatmul.mubr.msk.f32.gmra.mxu0 %vm238_vm0, %v10393_v5 }
  0xf1   : > { %8765 = vmatprep.mubr.msk.f32.mxu0 %vm238_vm0, %v10397_v7 }
  0xf2   : > { %8813 = vmatmul.mubr.msk.f32.gmra.mxu1 %vm238_vm0, %v10639_v2 }
  0xf3   : > { %8815 = vmatprep.mubr.msk.f32.mxu1 %vm238_vm0, %v10643_v0 }
  0xf4   : > { %8766 = vmatmul.mubr.msk.f32.gmra.mxu0 %vm238_vm0, %v10414_v10 }
  0xf5   : > { %8768 = vmatprep.mubr.msk.f32.mxu0 %vm238_vm0, %v10418_v12 }
  0xf6   : > { %8816 = vmatmul.mubr.msk.f32.gmra.mxu1 %vm238_vm0, %v10651_v6 }
  0xf7   : > { %8818 = vmatprep.mubr.msk.f32.mxu1 %vm238_vm0, %v10655_v4 }
  0xf8   : > { %8769 = vmatmul.mubr.msk.f32.gmra.mxu0 %vm238_vm0, %v10428_v14 }
  0xf9   : > { %8771 = vmatprep.mubr.msk.f32.mxu0 %vm238_vm0, %v10442_v19 }
  0xfa   : > { %8819 = vmatmul.mubr.msk.f32.gmra.mxu1 %vm238_vm0, %v10663_v11  ;;  %v12998_v11 = vld [vmem:[#allocation37_spill] sm:$0xff] }
  0xfb   : > { %8821 = vmatprep.mubr.msk.f32.mxu1 %vm238_vm0, %v10667_v8  ;;  %v10864_v8 = vld [vmem:[#allocation2 + $0x209] sm:$0xff] }
  0xfc   : > { %8772 = vmatmul.mubr.msk.f32.gmra.mxu0 %vm238_vm0, %v10456_v21 }
  0xfd   : > { %8774 = vmatprep.mubr.msk.f32.mxu0 %vm238_vm0, %v10460_v23 }
  0xfe   : > { %8822 = vmatmul.mubr.msk.f32.gmra.mxu1 %vm238_vm0, %v10675_v16  ;;  %v10876_v16 = vld [vmem:[#allocation2 + $0x211] sm:$0xff] }
  0xff   : > { %8824 = vmatprep.mubr.msk.f32.mxu1 %vm238_vm0, %v10679_v13  ;;  %v10872_v13 = vld [vmem:[#allocation2 + $0x210] sm:$0xff] }
 0x100   : > { %8775 = vmatmul.mubr.msk.f32.gmra.mxu0 %vm238_vm0, %v10472_v27 }
 0x101   : > { %8777 = vmatprep.mubr.msk.f32.mxu0 %vm238_vm0, %v10476_v29 }
 0x102   : > { %8825 = vmatmul.mubr.msk.f32.gmra.mxu1 %vm238_vm0, %v10687_v22 }
 0x103   : > { %8827 = vmatprep.mubr.msk.f32.mxu1 %vm238_vm0, %v10691_v20  ;;  %v8543_v20 = vpop.f32.mrf.mxu0 }
 0x104   : > { %8778 = vmatmul.mubr.msk.f32.gmra.mxu0 %vm238_vm0, %v10488_v51 }
 0x105   : > { %8780 = vmatprep.mubr.msk.f32.mxu0 %vm238_vm0, %v10492_v53 }
 0x106   : > { %8828 = vmatmul.mubr.msk.f32.gmra.mxu1 %vm238_vm0, %v10699_v28 }
 0x107   : > { %8830 = vmatprep.mubr.msk.f32.mxu1 %vm238_vm0, %v10703_v24  ;;  %v12999_v24 = vld [vmem:[#allocation10_spill] sm:$0xff] }
 0x108   : > { %8781 = vmatmul.mubr.msk.f32.gmra.mxu0 %vm238_vm0, %v10504_v55 }
 0x109   : > { %8783 = vmatprep.mubr.msk.f32.mxu0 %vm238_vm0, %v12997_v25 }
 0x10a   : > { %8831 = vmatmul.mubr.msk.f32.gmra.mxu1 %vm238_vm0, %v10711_v52 }
 0x10b   : > { %8833 = vmatprep.mubr.msk.f32.mxu1 %vm238_vm0, %v10715_v30  ;;  %v584_v30 = vpop.f32.mrf.mxu0 }
 0x10c   : > { %8784 = vmatmul.mubr.msk.f32.gmra.mxu0 %vm238_vm0, %v12998_v11 }
 0x10d   : > { %8786 = vmatprep.mubr.msk.f32.mxu0 %vm238_vm0, %v10862_v31 }
 0x10e   : > { %8834 = vmatmul.mubr.msk.f32.gmra.mxu1 %vm238_vm0, %v10725_v56 }
 0x10f   : > { %8836 = vmatprep.mubr.msk.f32.mxu1 %vm238_vm0, %v10864_v8 }
 0x110   : > { %8787 = vmatmul.mubr.msk.f32.gmra.mxu0 %vm238_vm0, %v10872_v13 }
 0x111   : > { %8841 = vmatprep.mubr.msk.f32.mxu0 %vm238_vm0, %v12999_v24 }
 0x112   : > { %8837 = vmatmul.mubr.msk.f32.gmra.mxu1 %vm238_vm0, %v10876_v16 }
 0x113   : > { %8891 = vmatprep.mubr.msk.f32.mxu1 %vm238_vm0, %v10258_v33 }
 0x114   : > { %8842 = vmatmul.mubr.msk.f32.vlgmr.msra.gmra.mxu0 %vm238_vm0, %v13000_v57  ;;  %v13005_v57 = vld [vmem:[#allocation16_spill] sm:$0xff] }
 0x115   : > { %8844 = vmatprep.mubr.msk.f32.mxu0 %vm238_vm0, %v13001_v59  ;;  %8940 = vmatpush3.msk.msra.mxu0 %vm514_vm1, %v10746_v34 }
 0x116   : > { %v8593_v22 = vpop.f32.mrf.mxu1  ;;  %8892 = vmatmul.mubr.msk.f32.vlgmr.msra.gmra.mxu1 %vm238_vm0, %v10274_v35  ;;  %v13003_v35 = vld [vmem:[#allocation14_spill] sm:$0xff] }
 0x117   : > { %v10886_v28 = vadd.f32 %v8593_v22, %v8543_v20  ;;  %8894 = vmatprep.mubr.msk.f32.mxu1 %vm238_vm0, %v10278_v37 }
 0x118   : > { %v908_v52 = vpop.f32.mrf.mxu1  ;;  %v8546_v33 = vpop.f32.mrf.mxu0  ;;  %8845 = vmatmul.mubr.msk.f32.gmra.mxu0 %vm238_vm0, %v13002_v26 }
 0x119   : > { %v10888_v56 = vadd.f32 %v908_v52, %v584_v30  ;;  %8847 = vmatprep.mubr.msk.f32.mxu0 %vm238_vm0, %v13003_v35  ;;  %v13004_v52 = vld [vmem:[#allocation15_spill] sm:$0xff]  ;;  %v13006_v35 = vld [vmem:[#allocation17_spill] sm:$0xff] }
 0x11a   : > { %v8596_v15 = vpop.f32.mrf.mxu1  ;;  %8895 = vmatmul.mubr.msk.f32.gmra.mxu1 %vm238_vm0, %v10290_v39  ;;  %v594_v37 = vpop.f32.mrf.mxu0 }
 0x11b   : > { %v10904_v20 = vadd.f32 %v8596_v15, %v8546_v33  ;;  %8897 = vmatprep.mubr.msk.f32.mxu1 %vm238_vm0, %v10294_v41 }
 0x11c   : > { %v918_v22 = vpop.f32.mrf.mxu1  ;;  %v8549_v34 = vpop.f32.mrf.mxu0  ;;  %8848 = vmatmul.mubr.msk.f32.gmra.mxu0 %vm238_vm0, %v13004_v52 }
 0x11d   : > { %v10910_v24 = vadd.f32 %v918_v22, %v594_v37  ;;  %8850 = vmatprep.mubr.msk.f32.mxu0 %vm238_vm0, %v13005_v57  ;;  %v13007_v37 = vld [vmem:[#allocation18_spill] sm:$0xff]  ;;  %v13008_v57 = vld [vmem:[#allocation19_spill] sm:$0xff] }
 0x11e   : > { %v8599_v30 = vpop.f32.mrf.mxu1  ;;  %8898 = vmatmul.mubr.msk.f32.gmra.mxu1 %vm238_vm0, %v10306_v43  ;;  %v604_v41 = vpop.f32.mrf.mxu0 }
 0x11f   : > { %v10916_v39 = vadd.f32 %v8599_v30, %v8549_v34  ;;  %8900 = vmatprep.mubr.msk.f32.mxu1 %vm238_vm0, %v10310_v45 }
 0x120   : > { %v928_v59 = vpop.f32.mrf.mxu1  ;;  %v8552_v15 = vpop.f32.mrf.mxu0  ;;  %8851 = vmatmul.mubr.msk.f32.gmra.mxu0 %vm238_vm0, %v13006_v35 }
 0x121   : > { %v10922_v33 = vadd.f32 %v928_v59, %v604_v41  ;;  %8853 = vmatprep.mubr.msk.f32.mxu0 %vm238_vm0, %v13007_v37  ;;  %v13009_v41 = vld [vmem:[#allocation20_spill] sm:$0xff]  ;;  %v13010_v37 = vld [vmem:[#allocation21_spill] sm:$0xff] }
 0x122   : > { %v8602_v26 = vpop.f32.mrf.mxu1  ;;  %8901 = vmatmul.mubr.msk.f32.gmra.mxu1 %vm238_vm0, %v10314_v47  ;;  %v614_v45 = vpop.f32.mrf.mxu0 }
 0x123   : > { %v10928_v43 = vadd.f32 %v8602_v26, %v8552_v15  ;;  %8903 = vmatprep.mubr.msk.f32.mxu1 %vm238_vm0, %v10322_v49 }
 0x124   : > { %v938_v22 = vpop.f32.mrf.mxu1  ;;  %v8555_v30 = vpop.f32.mrf.mxu0  ;;  %8854 = vmatmul.mubr.msk.f32.gmra.mxu0 %vm238_vm0, %v13008_v57 }
 0x125   : > { %v10934_v34 = vadd.f32 %v938_v22, %v614_v45  ;;  %8856 = vmatprep.mubr.msk.f32.mxu0 %vm238_vm0, %v13009_v41  ;;  %v13011_v45 = vld [vmem:[#allocation22_spill] sm:$0xff]  ;;  %v13012_v41 = vld [vmem:[#allocation23_spill] sm:$0xff] }
 0x126   : > { %v8605_v52 = vpop.f32.mrf.mxu1  ;;  %8904 = vmatmul.mubr.msk.f32.gmra.mxu1 %vm238_vm0, %v10359_v61  ;;  %v624_v49 = vpop.f32.mrf.mxu0 }
 0x127   : > { %v10940_v47 = vadd.f32 %v8605_v52, %v8555_v30  ;;  %8906 = vmatprep.mubr.msk.f32.mxu1 %vm238_vm0, %v10363_v63 }
 0x128   : > { %v948_v59 = vpop.f32.mrf.mxu1  ;;  %v8558_v26 = vpop.f32.mrf.mxu0  ;;  %8857 = vmatmul.mubr.msk.f32.gmra.mxu0 %vm238_vm0, %v13010_v37 }
 0x129   : > { %v10946_v15 = vadd.f32 %v948_v59, %v624_v49  ;;  %8859 = vmatprep.mubr.msk.f32.mxu0 %vm238_vm0, %v13011_v45  ;;  %v13013_v49 = vld [vmem:[#allocation24_spill] sm:$0xff]  ;;  %v13014_v45 = vld [vmem:[#allocation25_spill] sm:$0xff] }
 0x12a   : > { %v8608_v35 = vpop.f32.mrf.mxu1  ;;  %8907 = vmatmul.mubr.msk.f32.gmra.mxu1 %vm238_vm0, %v10377_v1  ;;  %v634_v63 = vpop.f32.mrf.mxu0 }
 0x12b   : > { %v10952_v61 = vadd.f32 %v8608_v35, %v8558_v26  ;;  %8909 = vmatprep.mubr.msk.f32.mxu1 %vm238_vm0, %v10381_v3 }
 0x12c   : > { %v958_v22 = vpop.f32.mrf.mxu1  ;;  %v8561_v52 = vpop.f32.mrf.mxu0  ;;  %8860 = vmatmul.mubr.msk.f32.gmra.mxu0 %vm238_vm0, %v13012_v41 }
 0x12d   : > { %v10958_v30 = vadd.f32 %v958_v22, %v634_v63  ;;  %8862 = vmatprep.mubr.msk.f32.mxu0 %vm238_vm0, %v13013_v49  ;;  %v13015_v63 = vld [vmem:[#allocation26_spill] sm:$0xff]  ;;  %v13016_v49 = vld [vmem:[#allocation27_spill] sm:$0xff] }
 0x12e   : > { %v8611_v57 = vpop.f32.mrf.mxu1  ;;  %8910 = vmatmul.mubr.msk.f32.gmra.mxu1 %vm238_vm0, %v10393_v5  ;;  %v644_v3 = vpop.f32.mrf.mxu0 }
 0x12f   : > { %v10964_v1 = vadd.f32 %v8611_v57, %v8561_v52  ;;  %8912 = vmatprep.mubr.msk.f32.mxu1 %vm238_vm0, %v10397_v7 }
 0x130   : > { %v968_v59 = vpop.f32.mrf.mxu1  ;;  %v8564_v35 = vpop.f32.mrf.mxu0  ;;  %8863 = vmatmul.mubr.msk.f32.gmra.mxu0 %vm238_vm0, %v13014_v45  ;;  %v13018_v45 = vld [vmem:[#allocation29_spill] sm:$0xff] }
 0x131   : > { %v10970_v26 = vadd.f32 %v968_v59, %v644_v3  ;;  %8865 = vmatprep.mubr.msk.f32.mxu0 %vm238_vm0, %v13015_v63  ;;  %v13017_v3 = vld [vmem:[#allocation28_spill] sm:$0xff]  ;;  %v13019_v63 = vld [vmem:[#allocation30_spill] sm:$0xff] }
 0x132   : > { %v8614_v37 = vpop.f32.mrf.mxu1  ;;  %8913 = vmatmul.mubr.msk.f32.gmra.mxu1 %vm238_vm0, %v10414_v10  ;;  %v654_v7 = vpop.f32.mrf.mxu0 }
 0x133   : > { %v10976_v5 = vadd.f32 %v8614_v37, %v8564_v35  ;;  %8915 = vmatprep.mubr.msk.f32.mxu1 %vm238_vm0, %v10418_v12 }
 0x134   : > { %v978_v22 = vpop.f32.mrf.mxu1  ;;  %v8567_v57 = vpop.f32.mrf.mxu0  ;;  %8866 = vmatmul.mubr.msk.f32.gmra.mxu0 %vm238_vm0, %v13016_v49  ;;  %v13021_v49 = vld [vmem:[#allocation32_spill] sm:$0xff] }
 0x135   : > { %v10982_v52 = vadd.f32 %v978_v22, %v654_v7  ;;  %8868 = vmatprep.mubr.msk.f32.mxu0 %vm238_vm0, %v13017_v3 }
 0x136   : > { %v8617_v41 = vpop.f32.mrf.mxu1  ;;  %8916 = vmatmul.mubr.msk.f32.gmra.mxu1 %vm238_vm0, %v10428_v14  ;;  %v10994_v12 = vpop.f32.mrf.mxu0 }
 0x137   : > { %v10988_v10 = vadd.f32 %v8617_v41, %v8567_v57  ;;  %8918 = vmatprep.mubr.msk.f32.mxu1 %vm238_vm0, %v10442_v19  ;;  %v13020_v41 = vld [vmem:[#allocation31_spill] sm:$0xff] }
 0x138   : > { %v10996_v59 = vpop.f32.mrf.mxu1  ;;  %v8570_v35 = vpop.f32.mrf.mxu0  ;;  %8869 = vmatmul.mubr.msk.f32.gmra.mxu0 %vm238_vm0, %v13018_v45  ;;  %v13022_v45 = vld [vmem:[#allocation33_spill] sm:$0xff] }
 0x139   : > { %8871 = vmatprep.mubr.msk.f32.mxu0 %vm238_vm0, %v13019_v63  ;;  %v13023_v63 = vld [vmem:[#allocation34_spill] sm:$0xff] }
 0x13a   : > { %v8620_v37 = vpop.f32.mrf.mxu1  ;;  %8919 = vmatmul.mubr.msk.f32.gmra.mxu1 %vm238_vm0, %v10456_v21  ;;  %v11008_v19 = vpop.f32.mrf.mxu0 }
 0x13b   : > { %v11002_v14 = vadd.f32 %v8620_v37, %v8570_v35  ;;  %8921 = vmatprep.mubr.msk.f32.mxu1 %vm238_vm0, %v10460_v23 }
 0x13c   : > { %v11010_v7 = vpop.f32.mrf.mxu1  ;;  %v8573_v22 = vpop.f32.mrf.mxu0  ;;  %8872 = vmatmul.mubr.msk.f32.gmra.mxu0 %vm238_vm0, %v13020_v41 }
 0x13d   : > { %8874 = vmatprep.mubr.msk.f32.mxu0 %vm238_vm0, %v13021_v49  ;;  %v13024_v49 = vld [vmem:[#allocation35_spill] sm:$0xff] }
 0x13e   : > { %v8623_v57 = vpop.f32.mrf.mxu1  ;;  %8922 = vmatmul.mubr.msk.f32.gmra.mxu1 %vm238_vm0, %v10472_v27  ;;  %v11022_v23 = vpop.f32.mrf.mxu0 }
 0x13f   : > { %v11016_v21 = vadd.f32 %v8623_v57, %v8573_v22  ;;  %8924 = vmatprep.mubr.msk.f32.mxu1 %vm238_vm0, %v10476_v29 }
 0x140   : > { %v11024_v3 = vpop.f32.mrf.mxu1  ;;  %v8576_v35 = vpop.f32.mrf.mxu0  ;;  %8875 = vmatmul.mubr.msk.f32.gmra.mxu0 %vm238_vm0, %v13022_v45 }
 0x141   : > { %8877 = vmatprep.mubr.msk.f32.mxu0 %vm238_vm0, %v13023_v63  ;;  %v13026_v63 = vld [vmem:[#allocation38_spill] sm:$0xff] }
 0x142   : > { %v8626_v37 = vpop.f32.mrf.mxu1  ;;  %8925 = vmatmul.mubr.msk.f32.gmra.mxu1 %vm238_vm0, %v10488_v51  ;;  %v11036_v29 = vpop.f32.mrf.mxu0 }
 0x143   : > { %v11030_v27 = vadd.f32 %v8626_v37, %v8576_v35  ;;  %8927 = vmatprep.mubr.msk.f32.mxu1 %vm238_vm0, %v10492_v53 }
 0x144   : > { %v11038_v22 = vpop.f32.mrf.mxu1  ;;  %v8579_v57 = vpop.f32.mrf.mxu0  ;;  %8878 = vmatmul.mubr.msk.f32.gmra.mxu0 %vm238_vm0, %v13024_v49 }
 0x145   : > { %8880 = vmatprep.mubr.msk.f32.mxu0 %vm238_vm0, %v10510_v58 }
 0x146   : > { %v8629_v41 = vpop.f32.mrf.mxu1  ;;  %8928 = vmatmul.mubr.msk.f32.gmra.mxu1 %vm238_vm0, %v10504_v55  ;;  %v11050_v53 = vpop.f32.mrf.mxu0 }
 0x147   : > { %v11044_v51 = vadd.f32 %v8629_v41, %v8579_v57  ;;  %8930 = vmatprep.mubr.msk.f32.mxu1 %vm238_vm0, %v12997_v25  ;;  %v2658_v57 = vld [vmem:[#allocation2 + $0x227] sm:$0xff] }
 0x148   : > { %v11052_v35 = vpop.f32.mrf.mxu1  ;;  %v8582_v37 = vpop.f32.mrf.mxu0  ;;  %8881 = vmatmul.mubr.msk.f32.gmra.mxu0 %vm238_vm0, %v10522_v60  ;;  %v3048_v41 = vld [vmem:[#allocation2 + $0x228] sm:$0xff] }
 0x149   : > { %13025 = vst [vmem:[#allocation36_spill] sm:$0xff] %v11052_v35  ;;  %8883 = vmatprep.mubr.msk.f32.mxu0 %vm238_vm0, %v13026_v63 }
 0x14a   : > { %v8632_v45 = vpop.f32.mrf.mxu1  ;;  %8931 = vmatmul.mubr.msk.f32.gmra.mxu1 %vm238_vm0, %v12998_v11  ;;  %v11064_v58 = vpop.f32.mrf.mxu0  ;;  %v2659_v11 = vld [vmem:[#allocation2 + $0x22f] sm:$0xff] }
 0x14b   : > { %v11058_v55 = vadd.f32 %v8632_v45, %v8582_v37  ;;  %8933 = vmatprep.mubr.msk.f32.mxu1 %vm238_vm0, %v10862_v31  ;;  %v3049_v31 = vld [vmem:[#allocation2 + $0x230] sm:$0xff] }
 0x14c   : > { %v11066_v25 = vpop.f32.mrf.mxu1  ;;  %v8585_v49 = vpop.f32.mrf.mxu0  ;;  %8884 = vmatmul.mubr.msk.f32.gmra.mxu0 %vm238_vm0, %v10729_v54 }
 0x14d   : > { %13027 = vst [vmem:[#allocation37_spill] sm:$0xff] %v11066_v25  ;;  %8886 = vmatprep.mubr.msk.f32.mxu0 %vm238_vm0, %v2658_v57 }
 0x14e   : > { %v8635_v35 = vpop.f32.mrf.mxu1  ;;  %8934 = vmatmul.mubr.msk.f32.gmra.mxu1 %vm238_vm0, %v10872_v13  ;;  %v11076_v37 = vpop.f32.mrf.mxu0  ;;  %v11086_v13 = vld [vmem:[#allocation3 + $0x8] sm:$0xff] }
 0x14f   : > { %v11072_v60 = vadd.f32 %v8635_v35, %v8585_v49  ;;  %8936 = vmatprep.mubr.msk.f32.mxu1 %vm238_vm0, %v3048_v41 }
 0x150   : > { %v11078_v45 = vpop.f32.mrf.mxu1  ;;  %v8588_v63 = vpop.f32.mrf.mxu0  ;;  %8887 = vmatmul.mubr.msk.f32.gmra.mxu0 %vm238_vm0, %v2659_v11 }
 0x151   : > { %8941 = vmatprep.mubr.msk.f32.mxu0 %vm238_vm0, %v10552_v17 }
 0x152   : > { %v8638_v25 = vpop.f32.mrf.mxu1  ;;  %8937 = vmatmul.mubr.msk.f32.gmra.mxu1 %vm238_vm0, %v3049_v31  ;;  %v11089_v35 = vpop.f32.mrf.mxu0 }
 0x153   : > { %v11082_v54 = vadd.f32 %v8638_v25, %v8588_v63  ;;  %9021 = vmatprep.mubr.f32.mxu1 %v11086_v13  ;;  %13028 = vst [vmem:[#allocation10_spill] sm:$0xff] %v11089_v35 }
 0x154   : > { %v11091_v57 = vpop.f32.mrf.mxu1  ;;  %v8643_v41 = vpop.f32.mrf.mxu0  ;;  %8942 = vmatmul.mubr.msk.f32.vlgmr.msra.gmra.mxu0 %vm238_vm0, %v10567_v32 }
 0x155   : > { %13029 = vst [vmem:[#allocation11_spill] sm:$0xff] %v11091_v57  ;;  %v1426_v11 = vadd.f32 %v8643_v41, %v10886_v28  ;;  %8944 = vmatprep.mubr.msk.f32.mxu0 %vm238_vm0, %v10571_v9 }
 0x156   : > { %v8693_v49 = vpop.f32.mrf.mxu1  ;;  %v1266_v25 = vpop.f32.mrf.mxu0 }
 0x157   : > { %v11101_v31 = vadd.f32 %v1266_v25, %v10888_v56  ;;  %v11103_v63 = vadd.f32 %v8693_v49, %v1426_v11 }
 0x158   : > { %v11098_v17 = vpop.f32.mrf.mxu1  ;;  %v8646_v35 = vpop.f32.mrf.mxu0  ;;  %8945 = vmatmul.mubr.msk.f32.gmra.mxu0 %vm238_vm0, %v10579_v18 }
 0x159   : > { %v1428_v32 = vadd.f32 %v8646_v35, %v10904_v20  ;;  %8947 = vmatprep.mubr.msk.f32.mxu0 %vm238_vm0, %v10583_v36 }
 0x15a   : > { %v8696_v57 = vpop.f32.mrf.mxu1  ;;  %v1276_v28 = vpop.f32.mrf.mxu0 }
 0x15b   : > { %v11113_v41 = vadd.f32 %v1276_v28, %v10910_v24  ;;  %v11115_v56 = vadd.f32 %v8696_v57, %v1428_v32 }
 0x15c   : > { %v11110_v9 = vpop.f32.mrf.mxu1  ;;  %v8649_v49 = vpop.f32.mrf.mxu0  ;;  %8948 = vmatmul.mubr.msk.f32.gmra.mxu0 %vm238_vm0, %v10591_v40 }
 0x15d   : > { %v1430_v18 = vadd.f32 %v8649_v49, %v10916_v39  ;;  %8950 = vmatprep.mubr.msk.f32.mxu0 %vm238_vm0, %v10595_v38 }
 0x15e   : > { %v8699_v11 = vpop.f32.mrf.mxu1  ;;  %v1286_v20 = vpop.f32.mrf.mxu0 }
 0x15f   : > { %v11125_v35 = vadd.f32 %v1286_v20, %v10922_v33  ;;  %v11127_v24 = vadd.f32 %v8699_v11, %v1430_v18 }
 0x160   : > { %v11122_v36 = vpop.f32.mrf.mxu1  ;;  %v8652_v57 = vpop.f32.mrf.mxu0  ;;  %8951 = vmatmul.mubr.msk.f32.gmra.mxu0 %vm238_vm0, %v10603_v44 }
 0x161   : > { %v1432_v40 = vadd.f32 %v8652_v57, %v10928_v43  ;;  %8953 = vmatprep.mubr.msk.f32.mxu0 %vm238_vm0, %v10607_v42 }
 0x162   : > { %v8702_v25 = vpop.f32.mrf.mxu1  ;;  %v1296_v39 = vpop.f32.mrf.mxu0 }
 0x163   : > { %v11137_v32 = vadd.f32 %v1296_v39, %v10934_v34  ;;  %v11139_v33 = vadd.f32 %v8702_v25, %v1432_v40 }
 0x164   : > { %v11134_v38 = vpop.f32.mrf.mxu1  ;;  %v8655_v28 = vpop.f32.mrf.mxu0  ;;  %8954 = vmatmul.mubr.msk.f32.gmra.mxu0 %vm238_vm0, %v10615_v48 }
 0x165   : > { %v1434_v44 = vadd.f32 %v8655_v28, %v10940_v47  ;;  %8956 = vmatprep.mubr.msk.f32.mxu0 %vm238_vm0, %v10619_v46 }
 0x166   : > { %v8705_v49 = vpop.f32.mrf.mxu1  ;;  %v1306_v43 = vpop.f32.mrf.mxu0 }
 0x167   : > { %v11149_v11 = vadd.f32 %v1306_v43, %v10946_v15  ;;  %v11151_v34 = vadd.f32 %v8705_v49, %v1434_v44  ;;  %v3426_v43 = vld [vmem:[#allocation2 + $0x169] sm:$0xff] }
 0x168   : > { %v11146_v42 = vpop.f32.mrf.mxu1  ;;  %v8658_v18 = vpop.f32.mrf.mxu0  ;;  %8957 = vmatmul.mubr.msk.f32.gmra.mxu0 %vm238_vm0, %v10627_v62 }
 0x169   : > { %v1436_v48 = vadd.f32 %v8658_v18, %v10952_v61  ;;  %8959 = vmatprep.mubr.msk.f32.mxu0 %vm238_vm0, %v10631_v50 }
 0x16a   : > { %v8708_v20 = vpop.f32.mrf.mxu1  ;;  %v1316_v47 = vpop.f32.mrf.mxu0 }
 0x16b   : > { %v11161_v57 = vadd.f32 %v1316_v47, %v10958_v30  ;;  %v11163_v15 = vadd.f32 %v8708_v20, %v1436_v48 }
 0x16c   : > { %v11158_v46 = vpop.f32.mrf.mxu1  ;;  %v8661_v25 = vpop.f32.mrf.mxu0  ;;  %8960 = vmatmul.mubr.msk.f32.gmra.mxu0 %vm238_vm0, %v10639_v2 }
 0x16d   : > { %v1438_v62 = vadd.f32 %v8661_v25, %v10964_v1  ;;  %8962 = vmatprep.mubr.msk.f32.mxu0 %vm238_vm0, %v10643_v0  ;;  %v3425_v1 = vld [vmem:[#allocation2 + $0x151] sm:$0xff] }
 0x16e   : > { %v8711_v40 = vpop.f32.mrf.mxu1  ;;  %v1326_v61 = vpop.f32.mrf.mxu0 }
 0x16f   : > { %v11173_v39 = vadd.f32 %v1326_v61, %v10970_v26  ;;  %v11175_v30 = vadd.f32 %v8711_v40, %v1438_v62  ;;  %v3428_v40 = vld [vmem:[#allocation2 + $0x189] sm:$0xff] }
 0x170   : > { %v11170_v50 = vpop.f32.mrf.mxu1  ;;  %v8664_v28 = vpop.f32.mrf.mxu0  ;;  %8963 = vmatmul.mubr.msk.f32.gmra.mxu0 %vm238_vm0, %v10651_v6 }
 0x171   : > { %v1440_v2 = vadd.f32 %v8664_v28, %v10976_v5  ;;  %8965 = vmatprep.mubr.msk.f32.mxu0 %vm238_vm0, %v10655_v4  ;;  %v989_v5 = vadd.f32 %v10996_v59, %v10994_v12  ;;  %v3427_v4 = vld [vmem:[#allocation2 + $0x171] sm:$0xff] }
 0x172   : > { %v8714_v49 = vpop.f32.mrf.mxu1  ;;  %v1336_v0 = vpop.f32.mrf.mxu0  ;;  %v4078_v12 = vld [vmem:[#allocation4 + $0xf8] sm:$0xff] }
 0x173   : > { %v11185_v26 = vadd.f32 %v1336_v0, %v10982_v52  ;;  %v11187_v18 = vadd.f32 %v8714_v49, %v1440_v2  ;;  %v4029_v59 = vld [vmem:[#allocation4 + $0x78] sm:$0xff]  ;;  %v3430_v0 = vld [vmem:[#allocation2 + $0x1a9] sm:$0xff]  ;;  %8989 = vmatprep.subr.mxu1 %v4078_v12 }
 0x174   : > { %v11182_v44 = vpop.f32.mrf.mxu1  ;;  %v8667_v20 = vpop.f32.mrf.mxu0  ;;  %8966 = vmatmul.mubr.msk.f32.gmra.mxu0 %vm238_vm0, %v3425_v1  ;;  %9069 = vmatprep.subr.mxu0 %v4029_v59 }
 0x175   : > { %v1442_v48 = vadd.f32 %v8667_v20, %v10988_v10  ;;  %8968 = vmatprep.mubr.msk.f32.mxu0 %vm238_vm0, %v3426_v43  ;;  %v3429_v10 = vld [vmem:[#allocation2 + $0x191] sm:$0xff]  ;;  %8990 = vmatpush3.msra.mxu1 %v4078_v12 }
 0x176   : > { %v8717_v6 = vpop.f32.mrf.mxu1  ;;  %v1346_v47 = vpop.f32.mrf.mxu0  ;;  %9070 = vmatpush3.msra.mxu0 %v4029_v59  ;;  %v4077_v20 = vld [vmem:[#allocation4 + $0xf0] sm:$0xff]  ;;  %v4026_v59 = vld [vmem:[#allocation4 + $0x60] sm:$0xff] }
 0x177   : > { %v11196_v52 = vadd.f32 %v1346_v47, %v989_v5  ;;  %v11198_v62 = vadd.f32 %v8717_v6, %v1442_v48  ;;  %v4028_v6 = vld [vmem:[#allocation4 + $0x70] sm:$0xff]  ;;  %8991 = vmatprep.subr.mxu1 %v4077_v20  ;;  %v4076_v47 = vld [vmem:[#allocation4 + $0xe8] sm:$0xff] }
 0x178   : > { %v11194_v25 = vpop.f32.mrf.mxu1  ;;  %v8670_v61 = vpop.f32.mrf.mxu0  ;;  %8969 = vmatmul.mubr.msk.f32.gmra.mxu0 %vm238_vm0, %v3427_v4  ;;  %v3431_v4 = vld [vmem:[#allocation2 + $0x1b1] sm:$0xff]  ;;  %9071 = vmatprep.subr.mxu0 %v4028_v6 }
 0x179   : > { %13030 = vst [vmem:[#allocation12_spill] sm:$0xff] %v11194_v25  ;;  %13031 = vst [vmem:[#allocation13_spill] sm:$0xff] %v11196_v52  ;;  %v1444_v49 = vadd.f32 %v8670_v61, %v11002_v14  ;;  %8971 = vmatprep.mubr.msk.f32.mxu0 %vm238_vm0, %v3428_v40  ;;  %v4027_v40 = vld [vmem:[#allocation4 + $0x68] sm:$0xff]  ;;  %8992 = vmatpush3.msra.mxu1 %v4077_v20 }
 0x17a   : > { %v8720_v28 = vpop.f32.mrf.mxu1  ;;  %v11203_v2 = vpop.f32.mrf.mxu0  ;;  %9072 = vmatpush3.msra.mxu0 %v4028_v6  ;;  %8993 = vmatprep.subr.mxu1 %v4076_v47 }
 0x17b   : > { %v11207_v43 = vadd.f32 %v8720_v28, %v1444_v49  ;;  %v3432_v49 = vld [vmem:[#allocation2 + $0x1c9] sm:$0xff]  ;;  %9073 = vmatprep.subr.mxu0 %v4027_v40  ;;  %8994 = vmatpush3.msra.mxu1 %v4076_v47 }
 0x17c   : > { %v11205_v1 = vpop.f32.mrf.mxu1  ;;  %v8673_v5 = vpop.f32.mrf.mxu0  ;;  %8972 = vmatmul.mubr.msk.f32.gmra.mxu0 %vm238_vm0, %v3429_v10  ;;  %v4075_v10 = vld [vmem:[#allocation4 + $0xe0] sm:$0xff]  ;;  %v4073_v47 = vld [vmem:[#allocation4 + $0xd0] sm:$0xff] }
 0x17d   : > { %13032 = vst [vmem:[#allocation14_spill] sm:$0xff] %v11205_v1  ;;  %v1446_v48 = vadd.f32 %v8673_v5, %v11016_v21  ;;  %8974 = vmatprep.mubr.msk.f32.mxu0 %vm238_vm0, %v3430_v0  ;;  %v3433_v1 = vld [vmem:[#allocation2 + $0x1d1] sm:$0xff]  ;;  %9074 = vmatpush3.msra.mxu0 %v4027_v40 }
 0x17e   : > { %v8723_v14 = vpop.f32.mrf.mxu1  ;;  %v11212_v61 = vpop.f32.mrf.mxu0  ;;  %8995 = vmatprep.subr.mxu1 %v4075_v10  ;;  %9075 = vmatprep.subr.mxu0 %v4026_v59  ;;  %v4024_v40 = vld [vmem:[#allocation4 + $0x50] sm:$0xff] }
 0x17f   : > { %v11216_v12 = vadd.f32 %v8723_v14, %v1446_v48  ;;  %v3434_v14 = vld [vmem:[#allocation2 + $0x1e9] sm:$0xff]  ;;  %v4025_v48 = vld [vmem:[#allocation4 + $0x58] sm:$0xff]  ;;  %8996 = vmatpush3.msra.mxu1 %v4075_v10  ;;  %9076 = vmatpush3.msra.mxu0 %v4026_v59 }
 0x180   : > { %v11214_v28 = vpop.f32.mrf.mxu1  ;;  %v8676_v21 = vpop.f32.mrf.mxu0  ;;  %8975 = vmatmul.mubr.msk.f32.gmra.mxu0 %vm238_vm0, %v3431_v4  ;;  %9077 = vmatprep.subr.mxu0 %v4025_v48  ;;  %v4023_v59 = vld [vmem:[#allocation4 + $0x48] sm:$0xff] }
 0x181   : > { %13033 = vst [vmem:[#allocation15_spill] sm:$0xff] %v11214_v28  ;;  %v1448_v5 = vadd.f32 %v8676_v21, %v11030_v27  ;;  %8977 = vmatprep.mubr.msk.f32.mxu0 %vm238_vm0, %v3432_v49  ;;  %v4074_v28 = vld [vmem:[#allocation4 + $0xd8] sm:$0xff]  ;;  %9078 = vmatpush3.msra.mxu0 %v4025_v48 }
 0x182   : > { %v8726_v0 = vpop.f32.mrf.mxu1  ;;  %v11221_v20 = vpop.f32.mrf.mxu0  ;;  %8997 = vmatprep.subr.mxu1 %v4074_v28  ;;  %v3435_v21 = vld [vmem:[#allocation2 + $0x1f1] sm:$0xff]  ;;  %9079 = vmatprep.subr.mxu0 %v4024_v40 }
 0x183   : > { %v11225_v25 = vadd.f32 %v8726_v0, %v1448_v5  ;;  %8998 = vmatpush3.msra.mxu1 %v4074_v28  ;;  %9080 = vmatpush3.msra.mxu0 %v4024_v40  ;;  %v4021_v40 = vld [vmem:[#allocation4 + $0x38] sm:$0xff] }
 0x184   : > { %v11223_v6 = vpop.f32.mrf.mxu1  ;;  %v8679_v4 = vpop.f32.mrf.mxu0  ;;  %8978 = vmatmul.mubr.msk.f32.gmra.mxu0 %vm238_vm0, %v3433_v1  ;;  %8999 = vmatprep.subr.mxu1 %v4073_v47  ;;  %v4072_v1 = vld [vmem:[#allocation4 + $0xc8] sm:$0xff] }
 0x185   : > { %13034 = vst [vmem:[#allocation16_spill] sm:$0xff] %v11223_v6  ;;  %v1450_v49 = vadd.f32 %v8679_v4, %v11044_v51  ;;  %8980 = vmatprep.mubr.msk.f32.mxu0 %vm238_vm0, %v3434_v14  ;;  %9000 = vmatpush3.msra.mxu1 %v4073_v47  ;;  %v4071_v14 = vld [vmem:[#allocation4 + $0xc0] sm:$0xff]  ;;  %v3438_v4 = vld [vmem:[#allocation2 + $0x229] sm:$0xff] }
 0x186   : > { %v8729_v27 = vpop.f32.mrf.mxu1  ;;  %v11230_v6 = vpop.f32.mrf.mxu0  ;;  %9001 = vmatprep.subr.mxu1 %v4072_v1  ;;  %9081 = vmatprep.subr.mxu0 %v4023_v59 }
 0x187   : > { %13035 = vst [vmem:[#allocation17_spill] sm:$0xff] %v11230_v6  ;;  %v11234_v10 = vadd.f32 %v8729_v27, %v1450_v49  ;;  %v4022_v27 = vld [vmem:[#allocation4 + $0x40] sm:$0xff]  ;;  %9002 = vmatpush3.msra.mxu1 %v4072_v1  ;;  %9082 = vmatpush3.msra.mxu0 %v4023_v59  ;;  %v4069_v1 = vld [vmem:[#allocation4 + $0xb0] sm:$0xff] }
 0x188   : > { %v11232_v52 = vpop.f32.mrf.mxu1  ;;  %v8682_v0 = vpop.f32.mrf.mxu0  ;;  %8981 = vmatmul.mubr.msk.f32.gmra.mxu0 %vm238_vm0, %v3435_v21  ;;  %9003 = vmatprep.subr.mxu1 %v4071_v14 }
 0x189   : > { %13036 = vst [vmem:[#allocation18_spill] sm:$0xff] %v11232_v52  ;;  %v1452_v5 = vadd.f32 %v8682_v0, %v11058_v55  ;;  %8983 = vmatprep.mubr.msk.f32.mxu0 %vm238_vm0, %v10864_v8  ;;  %v4070_v8 = vld [vmem:[#allocation4 + $0xb8] sm:$0xff]  ;;  %9083 = vmatprep.subr.mxu0 %v4022_v27 }
 0x18a   : > { %v8732_v51 = vpop.f32.mrf.mxu1  ;;  %v11240_v28 = vpop.f32.mrf.mxu0  ;;  %v3439_v0 = vld [vmem:[#allocation2 + $0x231] sm:$0xff]  ;;  %9004 = vmatpush3.msra.mxu1 %v4071_v14  ;;  %9084 = vmatpush3.msra.mxu0 %v4022_v27  ;;  %v4067_v27 = vld [vmem:[#allocation4 + $0xa0] sm:$0xff] }
 0x18b   : > { %13037 = vst [vmem:[#allocation19_spill] sm:$0xff] %v11240_v28  ;;  %v11244_v49 = vadd.f32 %v8732_v51, %v1452_v5  ;;  %9005 = vmatprep.subr.mxu1 %v4070_v8  ;;  %9085 = vmatprep.subr.mxu0 %v4021_v40 }
 0x18c   : > { %v11242_v48 = vpop.f32.mrf.mxu1  ;;  %v8685_v47 = vpop.f32.mrf.mxu0  ;;  %8984 = vmatmul.mubr.msk.f32.gmra.mxu0 %vm238_vm0, %v10876_v16  ;;  %v4020_v16 = vld [vmem:[#allocation4 + $0x30] sm:$0xff]  ;;  %9006 = vmatpush3.msra.mxu1 %v4070_v8 }
 0x18d   : > { %13038 = vst [vmem:[#allocation20_spill] sm:$0xff] %v11242_v48  ;;  %v1454_v21 = vadd.f32 %v8685_v47, %v11072_v60  ;;  %8986 = vmatprep.mubr.msk.f32.mxu0 %vm238_vm0, %v3438_v4  ;;  %v4068_v4 = vld [vmem:[#allocation4 + $0xa8] sm:$0xff]  ;;  %9086 = vmatpush3.msra.mxu0 %v4021_v40 }
 0x18e   : > { %v8735_v55 = vpop.f32.mrf.mxu1  ;;  %v11250_v48 = vpop.f32.mrf.mxu0  ;;  %9007 = vmatprep.subr.mxu1 %v4069_v1  ;;  %9087 = vmatprep.subr.mxu0 %v4020_v16 }
 0x18f   : > { %13039 = vst [vmem:[#allocation21_spill] sm:$0xff] %v11250_v48  ;;  %v11254_v59 = vadd.f32 %v8735_v55, %v1454_v21  ;;  %v4019_v48 = vld [vmem:[#allocation4 + $0x28] sm:$0xff]  ;;  %9008 = vmatpush3.msra.mxu1 %v4069_v1  ;;  %9088 = vmatpush3.msra.mxu0 %v4020_v16  ;;  %v4018_v21 = vld [vmem:[#allocation4 + $0x20] sm:$0xff]  ;;  %v4065_v16 = vld [vmem:[#allocation4 + $0x90] sm:$0xff] }
 0x190   : > { %v11252_v51 = vpop.f32.mrf.mxu1  ;;  %v8688_v5 = vpop.f32.mrf.mxu0  ;;  %8987 = vmatmul.mubr.msk.f32.gmra.mxu0 %vm238_vm0, %v3439_v0  ;;  %9009 = vmatprep.subr.mxu1 %v4068_v4 }
 0x191   : > { %13040 = vst [vmem:[#allocation22_spill] sm:$0xff] %v11252_v51  ;;  %v1456_v47 = vadd.f32 %v8688_v5, %v11082_v54  ;;  %9089 = vmatprep.subr.mxu0 %v4019_v48  ;;  %9010 = vmatpush3.msra.mxu1 %v4068_v4  ;;  %v4066_v54 = vld [vmem:[#allocation4 + $0x98] sm:$0xff]  ;;  %v4015_v4 = vld [vmem:[#allocation4 + $0x8] sm:$0xff] }
 0x192   : > { %v8738_v60 = vpop.f32.mrf.mxu1  ;;  %v11258_v51 = vpop.f32.mrf.mxu0  ;;  %9090 = vmatpush3.msra.mxu0 %v4019_v48  ;;  %9011 = vmatprep.subr.mxu1 %v4067_v27  ;;  %v4017_v5 = vld [vmem:[#allocation4 + $0x18] sm:$0xff] }
 0x193   : > { %13041 = vst [vmem:[#allocation23_spill] sm:$0xff] %v11258_v51  ;;  %v11262_v55 = vadd.f32 %v8738_v60, %v1456_v47  ;;  %9091 = vmatprep.subr.mxu0 %v4018_v21  ;;  %9012 = vmatpush3.msra.mxu1 %v4067_v27  ;;  %v4016_v60 = vld [vmem:[#allocation4 + $0x10] sm:$0xff]  ;;  %v4063_v27 = vld [vmem:[#allocation4 + $0x80] sm:$0xff] }
 0x194   : > { %v11260_v14 = vpop.f32.mrf.mxu1  ;;  %v8743_v0 = vpop.f32.mrf.mxu0  ;;  %9092 = vmatpush3.msra.mxu0 %v4018_v21  ;;  %9013 = vmatprep.subr.mxu1 %v4066_v54  ;;  %v4014_v21 = vld [vmem:[#allocation4] sm:$0xff] }
 0x195   : > { %13042 = vst [vmem:[#allocation24_spill] sm:$0xff] %v11260_v14  ;;  %v11267_v40 = vadd.f32 %v8743_v0, %v11103_v63  ;;  %9093 = vmatprep.subr.mxu0 %v4017_v5  ;;  %9014 = vmatpush3.msra.mxu1 %v4066_v54  ;;  %v4064_v63 = vld [vmem:[#allocation4 + $0x88] sm:$0xff] }
 0x196   : > { %v11264_v8 = vpop.f32.mrf.mxu1  ;;  %v11269_v14 = vpop.f32.mrf.mxu0  ;;  %9094 = vmatpush3.msra.mxu0 %v4017_v5  ;;  %9015 = vmatprep.subr.mxu1 %v4065_v16  ;;  %v3983_v5 = vld [vmem:[#allocation3 + $0xf] sm:$0xff] }
 0x197   : > { %9095 = vmatprep.subr.mxu0 %v4016_v60  ;;  %9016 = vmatpush3.msra.mxu1 %v4065_v16 }
 0x198   : > { %v11271_v1 = vpop.f32.mrf.mxu1  ;;  %v8746_v47 = vpop.f32.mrf.mxu0  ;;  %9096 = vmatpush3.msra.mxu0 %v4016_v60  ;;  %9017 = vmatprep.subr.mxu1 %v4064_v63 }
 0x199   : > { %v11276_v48 = vadd.f32 %v8746_v47, %v11115_v56  ;;  %9097 = vmatprep.subr.mxu0 %v4015_v4  ;;  %9018 = vmatpush3.msra.mxu1 %v4064_v63  ;;  %v3982_v56 = vld [vmem:[#allocation3 + $0x7] sm:$0xff] }
 0x19a   : > { %v11273_v51 = vpop.f32.mrf.mxu1  ;;  %v11278_v0 = vpop.f32.mrf.mxu0  ;;  %9098 = vmatpush3.msra.mxu0 %v4015_v4  ;;  %9019 = vmatprep.subr.mxu1 %v4063_v27 }
 0x19b   : > { %9099 = vmatprep.subr.mxu0 %v4014_v21  ;;  %9020 = vmatpush3.msra.mxu1 %v4063_v27 }
 0x19c   : > { %v11280_v52 = vpop.f32.mrf.mxu1  ;;  %v8749_v28 = vpop.f32.mrf.mxu0  ;;  %9100 = vmatpush3.msra.mxu0 %v4014_v21  ;;  %9101 = vmatprep.mubr.f32.mxu0 %v3982_v56 }
 0x19d   : > { %13043 = vst [vmem:[#allocation25_spill] sm:$0xff] %v11280_v52  ;;  %v11285_v54 = vadd.f32 %v8749_v28, %v11127_v24  ;;  %9022 = vmatmul.mubr.f32.vlgmr.msra.gmra.mxu1 %v11086_v13  ;;  %9102 = vmatmul.mubr.f32.vlgmr.msra.gmra.mxu0 %v3983_v5 }
 0x19e   : > { %v11282_v6 = vpop.f32.mrf.mxu1  ;;  %v11287_v47 = vpop.f32.mrf.mxu0 }
 0x19f   : > { %13044 = vst [vmem:[#allocation26_spill] sm:$0xff] %v11282_v6 }
 0x1a0   : > { %v11289_v52 = vpop.f32.mrf.mxu1  ;;  %v8752_v16 = vpop.f32.mrf.mxu0 }
 0x1a1   : > { %v11295_v24 = vadd.f32 %v8752_v16, %v11139_v33 }
 0x1a2   : > { %v11291_v60 = vpop.f32.mrf.mxu1  ;;  %v11297_v28 = vpop.f32.mrf.mxu0 }
 0x1a3   : > { %13045 = vst [vmem:[#allocation27_spill] sm:$0xff] %v11291_v60  ;;  %13046 = vst [vmem:[#allocation28_spill] sm:$0xff] %v11295_v24 }
 0x1a4   : > { %v11299_v63 = vpop.f32.mrf.mxu1  ;;  %v8755_v4 = vpop.f32.mrf.mxu0 }
 0x1a5   : > { %13047 = vst [vmem:[#allocation29_spill] sm:$0xff] %v11299_v63  ;;  %v11304_v27 = vadd.f32 %v8755_v4, %v11151_v34 }
 0x1a6   : > { %v11301_v6 = vpop.f32.mrf.mxu1  ;;  %v11306_v21 = vpop.f32.mrf.mxu0 }
 0x1a7   : > { %13048 = vst [vmem:[#allocation30_spill] sm:$0xff] %v11301_v6  ;;  %13049 = vst [vmem:[#allocation31_spill] sm:$0xff] %v11304_v27 }
 0x1a8   : > { %v11308_v56 = vpop.f32.mrf.mxu1  ;;  %v8758_v60 = vpop.f32.mrf.mxu0 }
 0x1a9   : > { %13050 = vst [vmem:[#allocation32_spill] sm:$0xff] %v11308_v56  ;;  %v11313_v33 = vadd.f32 %v8758_v60, %v11163_v15 }
 0x1aa   : > { %v11310_v13 = vpop.f32.mrf.mxu1  ;;  %v11315_v5 = vpop.f32.mrf.mxu0 }
 0x1ab   : > { %13051 = vst [vmem:[#allocation33_spill] sm:$0xff] %v11310_v13  ;;  %13052 = vst [vmem:[#allocation34_spill] sm:$0xff] %v11313_v33 }
 0x1ac   : > { %13053 = vst [vmem:[#allocation35_spill] sm:$0xff] %v11315_v5  ;;  %v11317_v16 = vpop.f32.mrf.mxu1  ;;  %v8761_v63 = vpop.f32.mrf.mxu0 }
 0x1ad   : > { %13054 = vst [vmem:[#allocation38_spill] sm:$0xff] %v11317_v16  ;;  %v11322_v34 = vadd.f32 %v8761_v63, %v11175_v30 }
 0x1ae   : > { %v11319_v24 = vpop.f32.mrf.mxu1  ;;  %v11324_v4 = vpop.f32.mrf.mxu0 }
 0x1af   : > { %13055 = vst [vmem:[#allocation39_spill] sm:$0xff] %v11319_v24  ;;  %13056 = vst [vmem:[#allocation40_spill] sm:$0xff] %v11322_v34 }
 0x1b0   : > { %13057 = vst [vmem:[#allocation41_spill] sm:$0xff] %v11324_v4  ;;  %v11326_v6 = vpop.f32.mrf.mxu1  ;;  %v8764_v56 = vpop.f32.mrf.mxu0 }
 0x1b1   : > { %13058 = vst [vmem:[#allocation42_spill] sm:$0xff] %v11326_v6  ;;  %v11331_v15 = vadd.f32 %v8764_v56, %v11187_v18 }
 0x1b2   : > { %v11328_v27 = vpop.f32.mrf.mxu1  ;;  %v11333_v60 = vpop.f32.mrf.mxu0 }
 0x1b3   : > { %13059 = vst [vmem:[#allocation43_spill] sm:$0xff] %v11328_v27  ;;  %13060 = vst [vmem:[#allocation44_spill] sm:$0xff] %v11331_v15 }
 0x1b4   : > { %13061 = vst [vmem:[#allocation45_spill] sm:$0xff] %v11333_v60  ;;  %v11335_v13 = vpop.f32.mrf.mxu1  ;;  %v8767_v16 = vpop.f32.mrf.mxu0 }
 0x1b5   : > { %13062 = vst [vmem:[#allocation46_spill] sm:$0xff] %v11335_v13  ;;  %v11340_v30 = vadd.f32 %v8767_v16, %v11198_v62  ;;  %v4577_v13 = vld [vmem:[#allocation4 + $0x178] sm:$0xff]  ;;  %v4576_v16 = vld [vmem:[#allocation4 + $0x170] sm:$0xff] }
 0x1b6   : > { %v11337_v33 = vpop.f32.mrf.mxu1  ;;  %v11342_v63 = vpop.f32.mrf.mxu0  ;;  %9149 = vmatprep.subr.mxu1 %v4577_v13 }
 0x1b7   : > { %13063 = vst [vmem:[#allocation47_spill] sm:$0xff] %v11337_v33  ;;  %13064 = vst [vmem:[#allocation48_spill] sm:$0xff] %v11340_v30  ;;  %9150 = vmatpush3.msra.mxu1 %v4577_v13 }
 0x1b8   : > { %13065 = vst [vmem:[#allocation49_spill] sm:$0xff] %v11342_v63  ;;  %v11344_v24 = vpop.f32.mrf.mxu1  ;;  %v8770_v6 = vpop.f32.mrf.mxu0  ;;  %9151 = vmatprep.subr.mxu1 %v4576_v16 }
 0x1b9   : > { %13066 = vst [vmem:[#allocation50_spill] sm:$0xff] %v11344_v24  ;;  %v11349_v18 = vadd.f32 %v8770_v6, %v11207_v43  ;;  %9152 = vmatpush3.msra.mxu1 %v4576_v16  ;;  %v4575_v43 = vld [vmem:[#allocation4 + $0x168] sm:$0xff] }
 0x1ba   : > { %v11346_v34 = vpop.f32.mrf.mxu1  ;;  %v11351_v56 = vpop.f32.mrf.mxu0  ;;  %9153 = vmatprep.subr.mxu1 %v4575_v43 }
 0x1bb   : > { %13067 = vst [vmem:[#allocation51_spill] sm:$0xff] %v11346_v34  ;;  %13068 = vst [vmem:[#allocation52_spill] sm:$0xff] %v11349_v18  ;;  %9154 = vmatpush3.msra.mxu1 %v4575_v43  ;;  %v4572_v43 = vld [vmem:[#allocation4 + $0x150] sm:$0xff] }
 0x1bc   : > { %13069 = vst [vmem:[#allocation53_spill] sm:$0xff] %v11351_v56  ;;  %v11353_v27 = vpop.f32.mrf.mxu1  ;;  %v8773_v15 = vpop.f32.mrf.mxu0 }
 0x1bd   : > { %13070 = vst [vmem:[#allocation54_spill] sm:$0xff] %v11353_v27  ;;  %v11358_v62 = vadd.f32 %v8773_v15, %v11216_v12  ;;  %v4883_v15 = vld [vmem:[#allocation4 + $0x1f8] sm:$0xff] }
 0x1be   : > { %v11355_v33 = vpop.f32.mrf.mxu1  ;;  %v11360_v24 = vpop.f32.mrf.mxu0  ;;  %9229 = vmatprep.subr.mxu0 %v4883_v15 }
 0x1bf   : > { %13071 = vst [vmem:[#allocation55_spill] sm:$0xff] %v11355_v33  ;;  %13072 = vst [vmem:[#allocation56_spill] sm:$0xff] %v11358_v62  ;;  %v4574_v33 = vld [vmem:[#allocation4 + $0x160] sm:$0xff]  ;;  %9230 = vmatpush3.msra.mxu0 %v4883_v15 }
 0x1c0   : > { %13073 = vst [vmem:[#allocation57_spill] sm:$0xff] %v11360_v24  ;;  %v11362_v34 = vpop.f32.mrf.mxu1  ;;  %v8776_v6 = vpop.f32.mrf.mxu0  ;;  %9155 = vmatprep.subr.mxu1 %v4574_v33 }
 0x1c1   : > { %13074 = vst [vmem:[#allocation58_spill] sm:$0xff] %v11362_v34  ;;  %v11367_v27 = vadd.f32 %v8776_v6, %v11225_v25  ;;  %9156 = vmatpush3.msra.mxu1 %v4574_v33  ;;  %v4573_v34 = vld [vmem:[#allocation4 + $0x158] sm:$0xff]  ;;  %v4882_v25 = vld [vmem:[#allocation4 + $0x1f0] sm:$0xff]  ;;  %v4881_v33 = vld [vmem:[#allocation4 + $0x1e8] sm:$0xff] }
 0x1c2   : > { %v11364_v18 = vpop.f32.mrf.mxu1  ;;  %v11369_v12 = vpop.f32.mrf.mxu0  ;;  %9157 = vmatprep.subr.mxu1 %v4573_v34  ;;  %9231 = vmatprep.subr.mxu0 %v4882_v25 }
 0x1c3   : > { %13075 = vst [vmem:[#allocation59_spill] sm:$0xff] %v11364_v18  ;;  %13076 = vst [vmem:[#allocation60_spill] sm:$0xff] %v11367_v27  ;;  %9158 = vmatpush3.msra.mxu1 %v4573_v34  ;;  %9232 = vmatpush3.msra.mxu0 %v4882_v25  ;;  %v4880_v34 = vld [vmem:[#allocation4 + $0x1e0] sm:$0xff]  ;;  %v4879_v25 = vld [vmem:[#allocation4 + $0x1d8] sm:$0xff] }
 0x1c4   : > { %13077 = vst [vmem:[#allocation61_spill] sm:$0xff] %v11369_v12  ;;  %v11371_v13 = vpop.f32.mrf.mxu1  ;;  %v8779_v62 = vpop.f32.mrf.mxu0  ;;  %9159 = vmatprep.subr.mxu1 %v4572_v43  ;;  %9233 = vmatprep.subr.mxu0 %v4881_v33 }
 0x1c5   : > { %13078 = vst [vmem:[#allocation62_spill] sm:$0xff] %v11371_v13  ;;  %v11376_v18 = vadd.f32 %v8779_v62, %v11234_v10  ;;  %9160 = vmatpush3.msra.mxu1 %v4572_v43  ;;  %v4571_v13 = vld [vmem:[#allocation4 + $0x148] sm:$0xff]  ;;  %9234 = vmatpush3.msra.mxu0 %v4881_v33  ;;  %v4570_v62 = vld [vmem:[#allocation4 + $0x140] sm:$0xff]  ;;  %v4569_v43 = vld [vmem:[#allocation4 + $0x138] sm:$0xff] }
 0x1c6   : > { %v11373_v16 = vpop.f32.mrf.mxu1  ;;  %v11378_v6 = vpop.f32.mrf.mxu0  ;;  %9161 = vmatprep.subr.mxu1 %v4571_v13  ;;  %9235 = vmatprep.subr.mxu0 %v4880_v34 }
 0x1c7   : > { %13079 = vst [vmem:[#allocation63_spill] sm:$0xff] %v11373_v16  ;;  %13080 = vst [vmem:[#allocation64_spill] sm:$0xff] %v11376_v18  ;;  %9162 = vmatpush3.msra.mxu1 %v4571_v13  ;;  %9236 = vmatpush3.msra.mxu0 %v4880_v34  ;;  %v4878_v13 = vld [vmem:[#allocation4 + $0x1d0] sm:$0xff]  ;;  %v4877_v34 = vld [vmem:[#allocation4 + $0x1c8] sm:$0xff] }
 0x1c8   : > { %13081 = vst [vmem:[#allocation65_spill] sm:$0xff] %v11378_v6  ;;  %v11380_v27 = vpop.f32.mrf.mxu1  ;;  %v8782_v16 = vpop.f32.mrf.mxu0  ;;  %9163 = vmatprep.subr.mxu1 %v4570_v62  ;;  %9237 = vmatprep.subr.mxu0 %v4879_v25 }
 0x1c9   : > { %13082 = vst [vmem:[#allocation66_spill] sm:$0xff] %v11380_v27  ;;  %v11385_v10 = vadd.f32 %v8782_v16, %v11244_v49  ;;  %9164 = vmatpush3.msra.mxu1 %v4570_v62  ;;  %9238 = vmatpush3.msra.mxu0 %v4879_v25  ;;  %v4568_v16 = vld [vmem:[#allocation4 + $0x130] sm:$0xff]  ;;  %v4567_v62 = vld [vmem:[#allocation4 + $0x128] sm:$0xff]  ;;  %v4566_v25 = vld [vmem:[#allocation4 + $0x120] sm:$0xff] }
 0x1ca   : > { %v11382_v12 = vpop.f32.mrf.mxu1  ;;  %v11387_v15 = vpop.f32.mrf.mxu0  ;;  %9165 = vmatprep.subr.mxu1 %v4569_v43  ;;  %9239 = vmatprep.subr.mxu0 %v4878_v13 }
 0x1cb   : > { %13083 = vst [vmem:[#allocation67_spill] sm:$0xff] %v11382_v12  ;;  %13084 = vst [vmem:[#allocation68_spill] sm:$0xff] %v11385_v10  ;;  %9166 = vmatpush3.msra.mxu1 %v4569_v43  ;;  %9240 = vmatpush3.msra.mxu0 %v4878_v13  ;;  %v4875_v13 = vld [vmem:[#allocation4 + $0x1b8] sm:$0xff] }
 0x1cc   : > { %13085 = vst [vmem:[#allocation69_spill] sm:$0xff] %v11387_v15  ;;  %v11389_v27 = vpop.f32.mrf.mxu1  ;;  %v8785_v12 = vpop.f32.mrf.mxu0  ;;  %9167 = vmatprep.subr.mxu1 %v4568_v16  ;;  %9241 = vmatprep.subr.mxu0 %v4877_v34 }
 0x1cd   : > { %13086 = vst [vmem:[#allocation70_spill] sm:$0xff] %v11389_v27  ;;  %v11394_v49 = vadd.f32 %v8785_v12, %v11254_v59  ;;  %9168 = vmatpush3.msra.mxu1 %v4568_v16  ;;  %9242 = vmatpush3.msra.mxu0 %v4877_v34  ;;  %v4876_v12 = vld [vmem:[#allocation4 + $0x1c0] sm:$0xff]  ;;  %v4565_v16 = vld [vmem:[#allocation4 + $0x118] sm:$0xff] }
 0x1ce   : > { %v11391_v18 = vpop.f32.mrf.mxu1  ;;  %v11396_v33 = vpop.f32.mrf.mxu0  ;;  %9169 = vmatprep.subr.mxu1 %v4567_v62  ;;  %9243 = vmatprep.subr.mxu0 %v4876_v12 }
 0x1cf   : > { %13087 = vst [vmem:[#allocation71_spill] sm:$0xff] %v11391_v18  ;;  %13088 = vst [vmem:[#allocation72_spill] sm:$0xff] %v11394_v49  ;;  %9170 = vmatpush3.msra.mxu1 %v4567_v62  ;;  %9244 = vmatpush3.msra.mxu0 %v4876_v12  ;;  %v4873_v12 = vld [vmem:[#allocation4 + $0x1a8] sm:$0xff] }
 0x1d0   : > { %13089 = vst [vmem:[#allocation73_spill] sm:$0xff] %v11396_v33  ;;  %v11398_v27 = vpop.f32.mrf.mxu1  ;;  %v8788_v18 = vpop.f32.mrf.mxu0  ;;  %9171 = vmatprep.subr.mxu1 %v4566_v25  ;;  %9245 = vmatprep.subr.mxu0 %v4875_v13  ;;  %v4871_v33 = vld [vmem:[#allocation4 + $0x198] sm:$0xff] }
 0x1d1   : > { %13090 = vst [vmem:[#allocation74_spill] sm:$0xff] %v11398_v27  ;;  %v11403_v59 = vadd.f32 %v8788_v18, %v11262_v55  ;;  %9172 = vmatpush3.msra.mxu1 %v4566_v25  ;;  %9246 = vmatpush3.msra.mxu0 %v4875_v13  ;;  %v4874_v55 = vld [vmem:[#allocation4 + $0x1b0] sm:$0xff]  ;;  %v4563_v25 = vld [vmem:[#allocation4 + $0x108] sm:$0xff]  ;;  %v4872_v13 = vld [vmem:[#allocation4 + $0x1a0] sm:$0xff] }
 0x1d2   : > { %v11400_v10 = vpop.f32.mrf.mxu1  ;;  %v11405_v43 = vpop.f32.mrf.mxu0  ;;  %9173 = vmatprep.subr.mxu1 %v4565_v16  ;;  %v4564_v18 = vld [vmem:[#allocation4 + $0x110] sm:$0xff]  ;;  %9247 = vmatprep.subr.mxu0 %v4874_v55 }
 0x1d3   : > { %13091 = vst [vmem:[#allocation75_spill] sm:$0xff] %v11400_v10  ;;  %13092 = vst [vmem:[#allocation76_spill] sm:$0xff] %v11403_v59  ;;  %9174 = vmatpush3.msra.mxu1 %v4565_v16  ;;  %9248 = vmatpush3.msra.mxu0 %v4874_v55  ;;  %v4562_v16 = vld [vmem:[#allocation4 + $0x100] sm:$0xff] }
 0x1d4   : > { %13093 = vst [vmem:[#allocation77_spill] sm:$0xff] %v11405_v43  ;;  %v11407_v27 = vpop.f32.mrf.mxu1  ;;  %v11409_v10 = vpop.f32.mrf.mxu0  ;;  %9175 = vmatprep.subr.mxu1 %v4564_v18  ;;  %9249 = vmatprep.subr.mxu0 %v4873_v12 }
 0x1d5   : > { %13094 = vst [vmem:[#allocation78_spill] sm:$0xff] %v11407_v27  ;;  %9176 = vmatpush3.msra.mxu1 %v4564_v18  ;;  %9250 = vmatpush3.msra.mxu0 %v4873_v12  ;;  %v4870_v18 = vld [vmem:[#allocation4 + $0x190] sm:$0xff]  ;;  %v4869_v12 = vld [vmem:[#allocation4 + $0x188] sm:$0xff] }
 0x1d6   : > { %v11411_v49 = vpop.f32.mrf.mxu1  ;;  %v11413_v34 = vpop.f32.mrf.mxu0  ;;  %9177 = vmatprep.subr.mxu1 %v4563_v25  ;;  %9251 = vmatprep.subr.mxu0 %v4872_v13 }
 0x1d7   : > { %9178 = vmatpush3.msra.mxu1 %v4563_v25  ;;  %9252 = vmatpush3.msra.mxu0 %v4872_v13  ;;  %v4868_v13 = vld [vmem:[#allocation4 + $0x180] sm:$0xff] }
 0x1d8   : > { %v11415_v62 = vpop.f32.mrf.mxu1  ;;  %v11417_v27 = vpop.f32.mrf.mxu0  ;;  %9179 = vmatprep.subr.mxu1 %v4562_v16  ;;  %9253 = vmatprep.subr.mxu0 %v4871_v33 }
 0x1d9   : > { %9180 = vmatpush3.msra.mxu1 %v4562_v16  ;;  %9254 = vmatpush3.msra.mxu0 %v4871_v33 }
 0x1da   : > { %v11419_v59 = vpop.f32.mrf.mxu1  ;;  %v11421_v43 = vpop.f32.mrf.mxu0  ;;  %9255 = vmatprep.subr.mxu0 %v4870_v18 }
 0x1db   : > { %9256 = vmatpush3.msra.mxu0 %v4870_v18 }
 0x1dc   : > { %v11423_v55 = vpop.f32.mrf.mxu0  ;;  %v11425_v15 = vpop.f32.mrf.mxu1  ;;  %9257 = vmatprep.subr.mxu0 %v4869_v12 }
 0x1dd   : > { %9258 = vmatpush3.msra.mxu0 %v4869_v12 }
 0x1de   : > { %v11427_v6 = vpop.f32.mrf.mxu0  ;;  %v11431_v24 = vpop.f32.mrf.mxu1  ;;  %9259 = vmatprep.subr.mxu0 %v4868_v13 }
 0x1df   : > { %9260 = vmatpush3.msra.mxu0 %v4868_v13 }
 0x1e0   : > { %v11429_v25 = vpop.f32.mrf.mxu0  ;;  %v11437_v30 = vpop.f32.mrf.mxu1 }
 0x1e1   : > { %13097 = vst [vmem:[#allocation81_spill] sm:$0xff] %v11437_v30 }
 0x1e2   : > { %v11433_v16 = vpop.f32.mrf.mxu0  ;;  %v11443_v18 = vpop.f32.mrf.mxu1 }
 0x1e3   : > { %13095 = vst [vmem:[#allocation79_spill] sm:$0xff] %v11433_v16  ;;  %13100 = vst [vmem:[#allocation84_spill] sm:$0xff] %v11443_v18 }
 0x1e4   : > { %v11435_v56 = vpop.f32.mrf.mxu0  ;;  %v11449_v12 = vpop.f32.mrf.mxu1 }
 0x1e5   : > { %13096 = vst [vmem:[#allocation80_spill] sm:$0xff] %v11435_v56  ;;  %13103 = vst [vmem:[#allocation87_spill] sm:$0xff] %v11449_v12  ;;  %v11471_v12 = vld [vmem:[#allocation4 + $0x278] sm:$0xff] }
 0x1e6   : > { %v11439_v33 = vpop.f32.mrf.mxu0  ;;  %v11455_v13 = vpop.f32.mrf.mxu1  ;;  %13113 = vst [vmem:[#allocation97_spill] sm:$0xff] %v11471_v12  ;;  %9309 = vmatprep.subr.mxu1 %v11471_v12 }
 0x1e7   : > { %13098 = vst [vmem:[#allocation82_spill] sm:$0xff] %v11439_v33 }
 0x1e8   : > { %v11441_v63 = vpop.f32.mrf.mxu0  ;;  %v11461_v33 = vpop.f32.mrf.mxu1 }
 0x1e9   : > { %13099 = vst [vmem:[#allocation83_spill] sm:$0xff] %v11441_v63  ;;  %13108 = vst [vmem:[#allocation92_spill] sm:$0xff] %v11461_v33 }
 0x1ea   : > { %v11445_v60 = vpop.f32.mrf.mxu0 }
 0x1eb   : > { %13101 = vst [vmem:[#allocation85_spill] sm:$0xff] %v11445_v60  ;;  %v11467_v60 = vpop.f32.mrf.mxu1 }
 0x1ec   : > { %v11447_v4 = vpop.f32.mrf.mxu0  ;;  %13111 = vst [vmem:[#allocation95_spill] sm:$0xff] %v11467_v60 }
 0x1ed   : > { %13102 = vst [vmem:[#allocation86_spill] sm:$0xff] %v11447_v4 }
 0x1ee   : > { %v11451_v5 = vpop.f32.mrf.mxu0 }
 0x1ef   : > { %13104 = vst [vmem:[#allocation88_spill] sm:$0xff] %v11451_v5 }
 0x1f0   : > { %v11453_v16 = vpop.f32.mrf.mxu0 }
 0x1f1   : > { %13105 = vst [vmem:[#allocation89_spill] sm:$0xff] %v11453_v16  ;;  %v11476_v16 = vpop.f32.mrf.mxu1 }
 0x1f2   : > { %v11457_v56 = vpop.f32.mrf.mxu0  ;;  %13115 = vst [vmem:[#allocation99_spill] sm:$0xff] %v11476_v16 }
 0x1f3   : > { %13106 = vst [vmem:[#allocation90_spill] sm:$0xff] %v11457_v56  ;;  %v11482_v33 = vpop.f32.mrf.mxu1 }
 0x1f4   : > { %v11459_v30 = vpop.f32.mrf.mxu0  ;;  %13118 = vst [vmem:[#allocation102_spill] sm:$0xff] %v11482_v33 }
 0x1f5   : > { %13107 = vst [vmem:[#allocation91_spill] sm:$0xff] %v11459_v30 }
 0x1f6   : > { %v11463_v63 = vpop.f32.mrf.mxu0 }
 0x1f7   : > { %13109 = vst [vmem:[#allocation93_spill] sm:$0xff] %v11463_v63 }
 0x1f8   : > { %v11465_v18 = vpop.f32.mrf.mxu0 }
 0x1f9   : > { %13110 = vst [vmem:[#allocation94_spill] sm:$0xff] %v11465_v18  ;;  %v11486_v18 = vld [vmem:[#allocation4 + $0x2f8] sm:$0xff] }
 0x1fa   : > { %v11469_v4 = vpop.f32.mrf.mxu0  ;;  %13120 = vst [vmem:[#allocation104_spill] sm:$0xff] %v11486_v18  ;;  %9389 = vmatprep.subr.mxu0 %v11486_v18  ;;  %v999_v18 = vadd.f32 %v11010_v7, %v11008_v19  ;;  %v1049_v7 = vadd.f32 %v11078_v45, %v11076_v37 }
 0x1fb   : > { %13112 = vst [vmem:[#allocation96_spill] sm:$0xff] %v11469_v4  ;;  %v11491_v4 = vpop.f32.mrf.mxu1 }
 0x1fc   : > { %v11473_v5 = vpop.f32.mrf.mxu0  ;;  %v1443_v37 = vadd.f32 %v11203_v2, %v999_v18  ;;  %v13136_v18 = vld [vmem:[#allocation15_spill] sm:$0xff] }
 0x1fd   : > { %13114 = vst [vmem:[#allocation98_spill] sm:$0xff] %v11473_v5 }
 0x1fe   : > { %v11478_v56 = vpop.f32.mrf.mxu0 }
 0x1ff   : > { %13116 = vst [vmem:[#allocation100_spill] sm:$0xff] %v11478_v56  ;;  %v1815_v56 = vadd.f32 %v11098_v17, %v11101_v31  ;;  %v2596_v17 = vadd.f32 %v11264_v8, %v11267_v40 }
 0x200   : > { %v11480_v30 = vpop.f32.mrf.mxu0 }
 0x201   : > { %13117 = vst [vmem:[#allocation101_spill] sm:$0xff] %v11480_v30  ;;  %v11499_v30 = vpop.f32.mrf.mxu1 }
 0x202   : > { %v11484_v63 = vpop.f32.mrf.mxu0 }
 0x203   : > { %13119 = vst [vmem:[#allocation103_spill] sm:$0xff] %v11484_v63  ;;  %v2205_v63 = vadd.f32 %v11269_v14, %v1815_v56  ;;  %v11514_v31 = vpop.f32.mrf.mxu1  ;;  %v13125_v14 = vld [vmem:[#allocation36_spill] sm:$0xff] }
 0x204   : > { %v11488_v60 = vpop.f32.mrf.mxu0  ;;  %v1029_v56 = vadd.f32 %v13125_v14, %v11050_v53  ;;  %v1821_v53 = vadd.f32 %v11134_v38, %v11137_v32  ;;  %v11554_v38 = vadd.f32 %v11170_v50, %v11173_v39  ;;  %v11558_v32 = vadd.f32 %v11182_v44, %v11185_v26  ;;  %v13131_v50 = vld [vmem:[#allocation13_spill] sm:$0xff]  ;;  %v13132_v39 = vld [vmem:[#allocation12_spill] sm:$0xff]  ;;  %v13133_v44 = vld [vmem:[#allocation14_spill] sm:$0xff] }
 0x205   : > { %13121 = vst [vmem:[#allocation105_spill] sm:$0xff] %v11488_v60  ;;  %v1009_v60 = vadd.f32 %v11024_v3, %v11022_v23  ;;  %v13127_v3 = vld [vmem:[#allocation10_spill] sm:$0xff]  ;;  %v2595_v8 = vadd.f32 %v11271_v1, %v2205_v63  ;;  %v11544_v1 = vadd.f32 %v11158_v46, %v11161_v57  ;;  %v2598_v63 = vadd.f32 %v11273_v51, %v11276_v48  ;;  %v13129_v57 = vld [vmem:[#allocation17_spill] sm:$0xff] }
 0x206   : > { %v11493_v5 = vpop.f32.mrf.mxu0  ;;  %v1449_v2 = vadd.f32 %v13129_v57, %v1029_v56  ;;  %v11573_v26 = vadd.f32 %v13133_v44, %v1443_v37 }
 0x208   : > { %v11495_v12 = vpop.f32.mrf.mxu0 }
 0x209   : > { %13122 = vst [vmem:[#allocation106_spill] sm:$0xff] %v11495_v12  ;;  %v1817_v12 = vadd.f32 %v11110_v9, %v11113_v41  ;;  %v13128_v9 = vld [vmem:[#allocation11_spill] sm:$0xff] }
 0x20a   : > { %v11501_v33 = vpop.f32.mrf.mxu0  ;;  %v11528_v41 = vadd.f32 %v13128_v9, %v13127_v3  ;;  %v2211_v9 = vadd.f32 %v11297_v28, %v1821_v53  ;;  %v13140_v28 = vld [vmem:[#allocation21_spill] sm:$0xff] }
 0x20b   : > { %13123 = vst [vmem:[#allocation107_spill] sm:$0xff] %v11501_v33  ;;  %v1019_v33 = vadd.f32 %v11038_v22, %v11036_v29  ;;  %v2207_v40 = vadd.f32 %v11278_v0, %v1817_v12  ;;  %v2987_v29 = vadd.f32 %v11409_v10, %v2596_v17  ;;  %v1819_v22 = vadd.f32 %v11122_v36, %v11125_v35  ;;  %v11550_v35 = vpop.f32.mrf.mxu1 }
 0x20c   : > { %v11504_v16 = vpop.f32.mrf.mxu0  ;;  %v1445_v0 = vadd.f32 %v11212_v61, %v1009_v60  ;;  %v2986_v36 = vadd.f32 %v11413_v34, %v2595_v8  ;;  %v13130_v61 = vld [vmem:[#allocation25_spill] sm:$0xff]  ;;  %v2989_v60 = vadd.f32 %v11417_v27, %v2598_v63  ;;  %v11570_v10 = vadd.f32 %v13132_v39, %v13131_v50  ;;  %v13139_v63 = vld [vmem:[#allocation20_spill] sm:$0xff] }
 0x20d   : > { %13124 = vst [vmem:[#allocation108_spill] sm:$0xff] %v11504_v16  ;;  %v13126_v16 = vld [vmem:[#allocation37_spill] sm:$0xff]  ;;  %v2597_v51 = vadd.f32 %v13130_v61, %v2207_v40  ;;  %v3377_v48 = vadd.f32 %v11411_v49, %v2987_v29  ;;  %v11588_v14 = vpop.f32.mrf.mxu1  ;;  %v11599_v40 = vld [vmem:[%s12929_s3 + $0x1] ss:$0 sm:$0xff]  ;;  %v1453_v53 = vadd.f32 %v13140_v28, %v1049_v7 }
 0x20e   : > { %v1039_v19 = vadd.f32 %v13126_v16, %v11064_v58  ;;  %v11524_v23 = vpop.f32.mrf.mxu0  ;;  %v1823_v58 = vadd.f32 %v11146_v42, %v11149_v11  ;;  %v1447_v42 = vadd.f32 %v11221_v20, %v1019_v33  ;;  %v2209_v11 = vadd.f32 %v11287_v47, %v1819_v22  ;;  %v13134_v20 = vld [vmem:[#allocation19_spill] sm:$0xff]  ;;  %v13135_v47 = vld [vmem:[#allocation26_spill] sm:$0xff] }
 0x20f   : > { %v2600_v16 = vadd.f32 %v13135_v47, %v11285_v54  ;;  %v11581_v33 = vld [vmem:[%s12929_s3] ss:$0 sm:$0xff]  ;;  %v11584_v27 = vadd.f32 %v13136_v18, %v1445_v0  ;;  %v3376_v12 = vadd.f32 %v11415_v62, %v2986_v36  ;;  %v2988_v17 = vadd.f32 %v11421_v43, %v2597_v51  ;;  %v13142_v36 = vld [vmem:[#allocation27_spill] sm:$0xff] }
 0x210   : > { %v11540_v45 = vpop.f32.mrf.mxu0  ;;  %v1451_v34 = vadd.f32 %v13134_v20, %v1039_v19  ;;  %v13137_v19 = vld [vmem:[#allocation16_spill] sm:$0xff]  ;;  %v2599_v54 = vadd.f32 %v11289_v52, %v2209_v11  ;;  %v13138_v29 = vld [vmem:[#allocation18_spill] sm:$0xff]  ;;  %v3379_v22 = vadd.f32 %v11419_v59, %v2989_v60  ;;  %v13143_v60 = vld [vmem:[#allocation29_spill] sm:$0xff]  ;;  %v2213_v39 = vadd.f32 %v11306_v21, %v1823_v58 }
 0x211   : > { %v11591_v3 = vadd.f32 %v13137_v19, %v1447_v42  ;;  %v2991_v8 = vadd.f32 %v11423_v55, %v2600_v16  ;;  %v11602_v43 = vadd.f32 %v13138_v29, %v1449_v2  ;;  %v13141_v55 = vld [vmem:[#allocation28_spill] sm:$0xff]  ;;  %v3378_v61 = vadd.f32 %v11425_v15, %v2988_v17  ;;  %v11614_v2 = vpop.f32.mrf.mxu1  ;;  %v13144_v16 = vld [vmem:[#allocation22_spill] sm:$0xff]  ;;  %v13145_v18 = vld [vmem:[#allocation31_spill] sm:$0xff] }
 0x212   : > { %v11562_v46 = vpop.f32.mrf.mxu0  ;;  %v11607_v52 = vadd.f32 %v13139_v63, %v1451_v34  ;;  %v2602_v42 = vadd.f32 %v13142_v36, %v13141_v55  ;;  %v2990_v11 = vadd.f32 %v11427_v6, %v2599_v54  ;;  %v2601_v50 = vadd.f32 %v13143_v60, %v2211_v9  ;;  %v13148_v21 = vld [vmem:[#allocation79_spill] sm:$0xff]  ;;  %v13149_v29 = vld [vmem:[#allocation32_spill] sm:$0xff]  ;;  %v13155_v60 = vld [vmem:[#allocation33_spill] sm:$0xff] }
 0x213   : > { %v3381_v7 = vadd.f32 %v11431_v24, %v2991_v8  ;;  %v11631_v54 = vpop.f32.mrf.mxu1  ;;  %v13151_v63 = vld [vmem:[#allocation84_spill] sm:$0xff] }
 0x214   : > { %v8943_v49 = vpop.f32.mrf.mxu0  ;;  %v2993_v44 = vadd.f32 %v11429_v25, %v2602_v42  ;;  %v2992_v58 = vadd.f32 %v13148_v21, %v2601_v50  ;;  %v13160_v21 = vld [vmem:[#allocation83_spill] sm:$0xff] }
 0x215   : > { %v3767_v56 = vadd.f32 %v8943_v49, %v3377_v48  ;;  %v11625_v49 = vadd.f32 %v13144_v16, %v1453_v53  ;;  %v13152_v53 = vld [vmem:[#allocation80_spill] sm:$0xff] }
 0x216   : > { %v3607_v62 = vpop.f32.mrf.mxu0  ;;  %v3383_v28 = vadd.f32 %v13151_v63, %v2993_v44 }
 0x217   : > { %v3803_v37 = vmul.f32 %v11581_v33, %v3767_v56  ;;  %v3766_v0 = vadd.f32 %v3607_v62, %v3376_v12  ;;  %v13146_v12 = vld [vmem:[#allocation30_spill] sm:$0xff]  ;;  %v13147_v56 = vld [vmem:[#allocation81_spill] sm:$0xff] }
 0x218   : > { %v8946_v57 = vpop.f32.mrf.mxu0  ;;  %v2604_v17 = vadd.f32 %v13146_v12, %v13145_v18  ;;  %v3380_v19 = vadd.f32 %v13147_v56, %v2990_v11  ;;  %v13158_v12 = vld [vmem:[#allocation38_spill] sm:$0xff] }
 0x219   : > { %v3839_v59 = vadd.f32 %v11599_v40, %v3803_v37  ;;  %v3802_v51 = vmul.f32 %v11581_v33, %v3766_v0  ;;  %v3769_v48 = vadd.f32 %v8946_v57, %v3379_v22  ;;  %v2603_v22 = vadd.f32 %v13149_v29, %v2213_v39  ;;  %v13150_v37 = vld [vmem:[#allocation35_spill] sm:$0xff] }
 0x21a   : > { %v3617_v20 = vpop.f32.mrf.mxu0  ;;  %v2215_v0 = vadd.f32 %v13150_v37, %v11544_v1  ;;  %v2995_v55 = vadd.f32 %v13152_v53, %v2604_v17  ;;  %v13156_v1 = vld [vmem:[#allocation87_spill] sm:$0xff]  ;;  %v13159_v17 = vld [vmem:[#allocation41_spill] sm:$0xff] }
 0x21b   : > { %v3871_v6 = vmax.f32 %v3839_v59, 0.0  ;;  %v3838_v34 = vadd.f32 %v11599_v40, %v3802_v51  ;;  %v3805_v15 = vmul.f32 %v11581_v33, %v3769_v48  ;;  %v3768_v47 = vadd.f32 %v3617_v20, %v3378_v61  ;;  %v13153_v59 = vld [vmem:[#allocation23_spill] sm:$0xff]  ;;  %v13154_v48 = vld [vmem:[#allocation34_spill] sm:$0xff] }
 0x21c   : > { %v8949_v24 = vpop.f32.mrf.mxu0  ;;  %v1455_v51 = vadd.f32 %v13153_v59, %v11528_v41  ;;  %v2606_v50 = vadd.f32 %v13155_v60, %v13154_v48  ;;  %v3382_v39 = vadd.f32 %v13156_v1, %v2992_v58  ;;  %v2605_v41 = vadd.f32 %v13158_v12, %v2215_v0  ;;  %v13163_v37 = vld [vmem:[#allocation39_spill] sm:$0xff]  ;;  %v13166_v59 = vld [vmem:[#allocation42_spill] sm:$0xff]  ;;  %v13167_v48 = vld [vmem:[#allocation45_spill] sm:$0xff] }
 0x21d   : > { %3949 = vst [vmem:[#allocation3 + $0x30] sm:$0xff] %v3871_v6  ;;  %v3870_v25 = vmax.f32 %v3838_v34, 0.0  ;;  %v3841_v9 = vadd.f32 %v11599_v40, %v3805_v15  ;;  %v3804_v8 = vmul.f32 %v11581_v33, %v3768_v47  ;;  %v3771_v62 = vadd.f32 %v8949_v24, %v3381_v7  ;;  %v13157_v7 = vld [vmem:[#allocation82_spill] sm:$0xff]  ;;  %v11648_v34 = vpop.f32.mrf.mxu1  ;;  %v13171_v12 = vld [vmem:[#allocation43_spill] sm:$0xff] }
 0x21e   : > { %v3627_v36 = vpop.f32.mrf.mxu0  ;;  %v2994_v44 = vadd.f32 %v13157_v7, %v2603_v22  ;;  %v2217_v56 = vadd.f32 %v13159_v17, %v11554_v38  ;;  %v2997_v58 = vadd.f32 %v13160_v21, %v2606_v50  ;;  %v13162_v22 = vld [vmem:[#allocation40_spill] sm:$0xff]  ;;  %v2219_v60 = vadd.f32 %v13167_v48, %v11558_v32  ;;  %v13168_v50 = vld [vmem:[#allocation95_spill] sm:$0xff] }
 0x21f   : > { %3948 = vst [vmem:[#allocation3 + $0x28] sm:$0xff] %v3870_v25  ;;  %v3873_v42 = vmax.f32 %v3841_v9, 0.0  ;;  %v3840_v11 = vadd.f32 %v11599_v40, %v3804_v8  ;;  %v3807_v57 = vmul.f32 %v11581_v33, %v3771_v62  ;;  %v3770_v61 = vadd.f32 %v3627_v36, %v3380_v19  ;;  %9024 = vmatprep.mubr.f32.mxu1 %v3870_v25  ;;  %v13161_v62 = vld [vmem:[#allocation24_spill] sm:$0xff]  ;;  %v13172_v17 = vld [vmem:[#allocation99_spill] sm:$0xff] }
 0x220   : > { %v8952_v20 = vpop.f32.mrf.mxu0  ;;  %9025 = vmatmul.mubr.f32.gmra.mxu1 %v3871_v6  ;;  %v3385_v19 = vadd.f32 %v11455_v13, %v2995_v55  ;;  %v11660_v29 = vadd.f32 %v13161_v62, %v1455_v51  ;;  %v2608_v0 = vadd.f32 %v13163_v37, %v13162_v22  ;;  %v13164_v38 = vld [vmem:[#allocation92_spill] sm:$0xff]  ;;  %v13165_v13 = vld [vmem:[#allocation85_spill] sm:$0xff]  ;;  %v11666_v55 = vpop.f32.mrf.mxu1  ;;  %v2607_v51 = vadd.f32 %v13166_v59, %v2217_v56  ;;  %v13174_v22 = vld [vmem:[#allocation46_spill] sm:$0xff] }
 0x221   : > { %3951 = vst [vmem:[#allocation3 + $0x50] sm:$0xff] %v3873_v42  ;;  %v3872_v15 = vmax.f32 %v3840_v11, 0.0  ;;  %v3843_v47 = vadd.f32 %v11599_v40, %v3807_v57  ;;  %v3806_v16 = vmul.f32 %v11581_v33, %v3770_v61  ;;  %v3773_v18 = vadd.f32 %v8952_v20, %v3383_v28  ;;  %v13170_v32 = vld [vmem:[#allocation44_spill] sm:$0xff]  ;;  %v13179_v48 = vld [vmem:[#allocation47_spill] sm:$0xff] }
 0x222   : > { %v3637_v24 = vpop.f32.mrf.mxu0  ;;  %v3384_v63 = vadd.f32 %v13164_v38, %v2994_v44  ;;  %v2996_v28 = vadd.f32 %v13165_v13, %v2605_v41  ;;  %v3387_v1 = vadd.f32 %v13168_v50, %v2997_v58  ;;  %v2610_v41 = vadd.f32 %v13171_v12, %v13170_v32  ;;  %v13181_v12 = vld [vmem:[#allocation50_spill] sm:$0xff] }
 0x223   : > { %3950 = vst [vmem:[#allocation3 + $0x48] sm:$0xff] %v3872_v15  ;;  %v3875_v6 = vmax.f32 %v3843_v47, 0.0  ;;  %v3842_v25 = vadd.f32 %v11599_v40, %v3806_v16  ;;  %v3809_v9 = vmul.f32 %v11581_v33, %v3773_v18  ;;  %v3772_v8 = vadd.f32 %v3637_v24, %v3382_v39  ;;  %9027 = vmatprep.mubr.f32.mxu1 %v3872_v15  ;;  %v13169_v39 = vld [vmem:[#allocation86_spill] sm:$0xff]  ;;  %v11687_v24 = vpop.f32.mrf.mxu1 }
 0x224   : > { %v8955_v53 = vpop.f32.mrf.mxu0  ;;  %9028 = vmatmul.mubr.f32.gmra.mxu1 %v3873_v42  ;;  %v2999_v7 = vadd.f32 %v13169_v39, %v2608_v0  ;;  %v3386_v56 = vadd.f32 %v13172_v17, %v2996_v28  ;;  %v2609_v37 = vadd.f32 %v13174_v22, %v2219_v60  ;;  %v13175_v0 = vld [vmem:[#allocation49_spill] sm:$0xff] }
 0x225   : > { %3953 = vst [vmem:[#allocation3 + $0x70] sm:$0xff] %v3875_v6  ;;  %v3874_v36 = vmax.f32 %v3842_v25, 0.0  ;;  %v3845_v11 = vadd.f32 %v11599_v40, %v3809_v9  ;;  %v3808_v57 = vmul.f32 %v11581_v33, %v3772_v8  ;;  %v3775_v61 = vadd.f32 %v8955_v53, %v3385_v19  ;;  %v13173_v19 = vld [vmem:[#allocation88_spill] sm:$0xff]  ;;  %v13177_v28 = vld [vmem:[#allocation89_spill] sm:$0xff] }
 0x226   : > { %v3647_v44 = vpop.f32.mrf.mxu0  ;;  %v11675_v42 = vld [vmem:[#allocation3 + $0x27] sm:$0xff]  ;;  %v11677_v20 = vld [vmem:[#allocation3 + $0x2f] sm:$0xff]  ;;  %v2998_v21 = vadd.f32 %v13173_v19, %v2607_v51  ;;  %v2221_v38 = vadd.f32 %v13175_v0, %v11570_v10  ;;  %v3001_v53 = vadd.f32 %v13177_v28, %v2610_v41  ;;  %v13182_v17 = vld [vmem:[#allocation53_spill] sm:$0xff] }
 0x227   : > { %3952 = vst [vmem:[#allocation3 + $0x68] sm:$0xff] %v3874_v36  ;;  %v3877_v15 = vmax.f32 %v3845_v11, 0.0  ;;  %v3844_v47 = vadd.f32 %v11599_v40, %v3808_v57  ;;  %v3811_v16 = vmul.f32 %v11581_v33, %v3775_v61  ;;  %v3774_v18 = vadd.f32 %v3647_v44, %v3384_v63  ;;  %9104 = vmatprep.mubr.f32.mxu0 %v11675_v42  ;;  %v13176_v63 = vld [vmem:[#allocation102_spill] sm:$0xff]  ;;  %v13178_v10 = vld [vmem:[#allocation48_spill] sm:$0xff]  ;;  %v11708_v44 = vpop.f32.mrf.mxu1  ;;  %v13183_v19 = vld [vmem:[#allocation91_spill] sm:$0xff] }
 0x228   : > { %9030 = vmatprep.mubr.f32.mxu1 %v3874_v36  ;;  %v8958_v58 = vpop.f32.mrf.mxu0  ;;  %9105 = vmatmul.mubr.f32.gmra.mxu0 %v11677_v20  ;;  %v3389_v13 = vadd.f32 %v13176_v63, %v2999_v7  ;;  %v2612_v60 = vadd.f32 %v13179_v48, %v13178_v10  ;;  %v3388_v50 = vadd.f32 %v11491_v4, %v2998_v21  ;;  %v13188_v48 = vld [vmem:[#allocation57_spill] sm:$0xff] }
 0x229   : > { %9031 = vmatmul.mubr.f32.gmra.mxu1 %v3875_v6  ;;  %3955 = vst [vmem:[#allocation3 + $0x90] sm:$0xff] %v3877_v15  ;;  %v3876_v25 = vmax.f32 %v3844_v47, 0.0  ;;  %v3847_v9 = vadd.f32 %v11599_v40, %v3811_v16  ;;  %v3810_v8 = vmul.f32 %v11581_v33, %v3774_v18  ;;  %v3777_v62 = vadd.f32 %v8958_v58, %v3387_v1  ;;  %v13180_v1 = vld [vmem:[#allocation90_spill] sm:$0xff]  ;;  %v11729_v28 = vpop.f32.mrf.mxu1 }
 0x22a   : > { %v3657_v36 = vpop.f32.mrf.mxu0  ;;  %v11696_v6 = vld [vmem:[#allocation3 + $0x47] sm:$0xff]  ;;  %v11698_v11 = vld [vmem:[#allocation3 + $0x4f] sm:$0xff]  ;;  %v3000_v39 = vadd.f32 %v13180_v1, %v2609_v37  ;;  %v2611_v41 = vadd.f32 %v13181_v12, %v2221_v38  ;;  %v2223_v4 = vadd.f32 %v13182_v17, %v11573_v26  ;;  %v3003_v21 = vadd.f32 %v13183_v19, %v2612_v60  ;;  %v13186_v38 = vld [vmem:[#allocation93_spill] sm:$0xff] }
 0x22b   : > { %3954 = vst [vmem:[#allocation3 + $0x88] sm:$0xff] %v3876_v25  ;;  %v3879_v57 = vmax.f32 %v3847_v9, 0.0  ;;  %v3846_v61 = vadd.f32 %v11599_v40, %v3810_v8  ;;  %v3813_v59 = vmul.f32 %v11581_v33, %v3777_v62  ;;  %v3776_v51 = vadd.f32 %v3657_v36, %v3386_v56  ;;  %9107 = vmatprep.mubr.f32.mxu0 %v11696_v6  ;;  %v13184_v26 = vld [vmem:[#allocation52_spill] sm:$0xff]  ;;  %v13185_v37 = vld [vmem:[#allocation51_spill] sm:$0xff]  ;;  %v11750_v19 = vpop.f32.mrf.mxu1 }
 0x22c   : > { %9033 = vmatprep.mubr.f32.mxu1 %v3876_v25  ;;  %v8961_v7 = vpop.f32.mrf.mxu0  ;;  %9108 = vmatmul.mubr.f32.gmra.mxu0 %v11698_v11  ;;  %v3391_v56 = vadd.f32 %v11499_v30, %v3001_v53  ;;  %v2614_v30 = vadd.f32 %v13185_v37, %v13184_v26  ;;  %v3390_v0 = vadd.f32 %v11514_v31, %v3000_v39  ;;  %v13191_v12 = vld [vmem:[#allocation55_spill] sm:$0xff]  ;;  %v13192_v17 = vld [vmem:[#allocation96_spill] sm:$0xff]  ;;  %v13194_v37 = vld [vmem:[#allocation61_spill] sm:$0xff] }
 0x22d   : > { %9034 = vmatmul.mubr.f32.gmra.mxu1 %v3877_v15  ;;  %3957 = vst [vmem:[#allocation3 + $0xb0] sm:$0xff] %v3879_v57  ;;  %v3878_v47 = vmax.f32 %v3846_v61, 0.0  ;;  %v3849_v16 = vadd.f32 %v11599_v40, %v3813_v59  ;;  %v3812_v18 = vmul.f32 %v11581_v33, %v3776_v51  ;;  %v3779_v32 = vadd.f32 %v8961_v7, %v3389_v13  ;;  %v13187_v51 = vld [vmem:[#allocation54_spill] sm:$0xff] }
 0x22e   : > { %v3667_v58 = vpop.f32.mrf.mxu0  ;;  %v11717_v15 = vld [vmem:[#allocation3 + $0x67] sm:$0xff]  ;;  %v11719_v25 = vld [vmem:[#allocation3 + $0x6f] sm:$0xff]  ;;  %v3002_v63 = vadd.f32 %v13186_v38, %v2611_v41  ;;  %v2613_v10 = vadd.f32 %v13187_v51, %v2223_v4  ;;  %v2225_v31 = vadd.f32 %v13188_v48, %v11584_v27  ;;  %v3393_v60 = vadd.f32 %v11550_v35, %v3003_v21 }
 0x22f   : > { %3956 = vst [vmem:[#allocation3 + $0xa8] sm:$0xff] %v3878_v47  ;;  %v3881_v9 = vmax.f32 %v3849_v16, 0.0  ;;  %v3848_v8 = vadd.f32 %v11599_v40, %v3812_v18  ;;  %v3815_v62 = vmul.f32 %v11581_v33, %v3779_v32  ;;  %v3778_v22 = vadd.f32 %v3667_v58, %v3388_v50  ;;  %9110 = vmatprep.mubr.f32.mxu0 %v11717_v15  ;;  %v13189_v50 = vld [vmem:[#allocation94_spill] sm:$0xff]  ;;  %v13190_v27 = vld [vmem:[#allocation56_spill] sm:$0xff]  ;;  %v13197_v51 = vld [vmem:[#allocation59_spill] sm:$0xff] }
 0x230   : > { %9036 = vmatprep.mubr.f32.mxu1 %v3878_v47  ;;  %v8964_v13 = vpop.f32.mrf.mxu0  ;;  %9111 = vmatmul.mubr.f32.gmra.mxu0 %v11719_v25  ;;  %v3005_v1 = vadd.f32 %v13189_v50, %v2614_v30  ;;  %v2616_v35 = vadd.f32 %v13191_v12, %v13190_v27  ;;  %v3392_v41 = vadd.f32 %v11588_v14, %v3002_v63  ;;  %v13198_v48 = vld [vmem:[#allocation100_spill] sm:$0xff]  ;;  %v11771_v50 = vpop.f32.mrf.mxu1  ;;  %v13200_v12 = vld [vmem:[#allocation65_spill] sm:$0xff] }
 0x231   : > { %9037 = vmatmul.mubr.f32.gmra.mxu1 %v3879_v57  ;;  %3959 = vst [vmem:[#allocation3 + $0xd0] sm:$0xff] %v3881_v9  ;;  %v3880_v53 = vmax.f32 %v3848_v8, 0.0  ;;  %v3851_v36 = vadd.f32 %v11599_v40, %v3815_v62  ;;  %v3814_v61 = vmul.f32 %v11581_v33, %v3778_v22  ;;  %v3781_v59 = vadd.f32 %v8964_v13, %v3391_v56  ;;  %v13193_v22 = vld [vmem:[#allocation58_spill] sm:$0xff] }
 0x232   : > { %v3677_v39 = vpop.f32.mrf.mxu0  ;;  %v11738_v57 = vld [vmem:[#allocation3 + $0x87] sm:$0xff]  ;;  %v11740_v7 = vld [vmem:[#allocation3 + $0x8f] sm:$0xff]  ;;  %v3004_v4 = vadd.f32 %v13192_v17, %v2613_v10  ;;  %v2615_v26 = vadd.f32 %v13193_v22, %v2225_v31  ;;  %v2227_v14 = vadd.f32 %v13194_v37, %v11591_v3  ;;  %v3395_v30 = vadd.f32 %v11614_v2, %v3005_v1 }
 0x233   : > { %3958 = vst [vmem:[#allocation3 + $0xc8] sm:$0xff] %v3880_v53  ;;  %v3883_v47 = vmax.f32 %v3851_v36, 0.0  ;;  %v3850_v16 = vadd.f32 %v11599_v40, %v3814_v61  ;;  %v3817_v18 = vmul.f32 %v11581_v33, %v3781_v59  ;;  %v3780_v32 = vadd.f32 %v3677_v39, %v3390_v0  ;;  %9113 = vmatprep.mubr.f32.mxu0 %v11738_v57  ;;  %v13195_v0 = vld [vmem:[#allocation98_spill] sm:$0xff]  ;;  %v13196_v3 = vld [vmem:[#allocation60_spill] sm:$0xff]  ;;  %v13203_v22 = vld [vmem:[#allocation63_spill] sm:$0xff] }
 0x234   : > { %9039 = vmatprep.mubr.f32.mxu1 %v3880_v53  ;;  %v8967_v56 = vpop.f32.mrf.mxu0  ;;  %9114 = vmatmul.mubr.f32.gmra.mxu0 %v11740_v7  ;;  %v3007_v38 = vadd.f32 %v13195_v0, %v2616_v35  ;;  %v2618_v2 = vadd.f32 %v13197_v51, %v13196_v3  ;;  %v3394_v10 = vadd.f32 %v11631_v54, %v3004_v4  ;;  %v13204_v37 = vld [vmem:[#allocation103_spill] sm:$0xff]  ;;  %v11792_v0 = vpop.f32.mrf.mxu1  ;;  %v13206_v51 = vld [vmem:[#allocation69_spill] sm:$0xff] }
 0x235   : > { %9040 = vmatmul.mubr.f32.gmra.mxu1 %v3881_v9  ;;  %3961 = vst [vmem:[#allocation3 + $0xf0] sm:$0xff] %v3883_v47  ;;  %v3882_v21 = vmax.f32 %v3850_v16, 0.0  ;;  %v3853_v58 = vadd.f32 %v11599_v40, %v3817_v18  ;;  %v3816_v8 = vmul.f32 %v11581_v33, %v3780_v32  ;;  %v3783_v62 = vadd.f32 %v8967_v56, %v3393_v60  ;;  %v13199_v32 = vld [vmem:[#allocation62_spill] sm:$0xff] }
 0x236   : > { %v3687_v63 = vpop.f32.mrf.mxu0  ;;  %v11759_v9 = vld [vmem:[#allocation3 + $0xa7] sm:$0xff]  ;;  %v11761_v13 = vld [vmem:[#allocation3 + $0xaf] sm:$0xff]  ;;  %v3006_v31 = vadd.f32 %v13198_v48, %v2615_v26  ;;  %v2617_v27 = vadd.f32 %v13199_v32, %v2227_v14  ;;  %v2229_v54 = vadd.f32 %v13200_v12, %v11602_v43  ;;  %v3397_v35 = vadd.f32 %v11648_v34, %v3007_v38 }
 0x237   : > { %3960 = vst [vmem:[#allocation3 + $0xe8] sm:$0xff] %v3882_v21  ;;  %v3885_v53 = vmax.f32 %v3853_v58, 0.0  ;;  %v3852_v36 = vadd.f32 %v11599_v40, %v3816_v8  ;;  %v3819_v61 = vmul.f32 %v11581_v33, %v3783_v62  ;;  %v3782_v59 = vadd.f32 %v3687_v63, %v3392_v41  ;;  %9116 = vmatprep.mubr.f32.mxu0 %v11759_v9  ;;  %v13201_v41 = vld [vmem:[#allocation101_spill] sm:$0xff]  ;;  %v13202_v43 = vld [vmem:[#allocation64_spill] sm:$0xff]  ;;  %v13209_v32 = vld [vmem:[#allocation67_spill] sm:$0xff] }
 0x238   : > { %9042 = vmatprep.mubr.f32.mxu1 %v3882_v21  ;;  %v8970_v60 = vpop.f32.mrf.mxu0  ;;  %9117 = vmatmul.mubr.f32.gmra.mxu0 %v11761_v13  ;;  %v3009_v17 = vadd.f32 %v13201_v41, %v2618_v2  ;;  %v2620_v34 = vadd.f32 %v13203_v22, %v13202_v43  ;;  %v3396_v26 = vadd.f32 %v11666_v55, %v3006_v31  ;;  %v13211_v43 = vld [vmem:[#allocation73_spill] sm:$0xff] }
 0x239   : > { %9043 = vmatmul.mubr.f32.gmra.mxu1 %v3883_v47  ;;  %3963 = vst [vmem:[#allocation3 + $0x110] sm:$0xff] %v3885_v53  ;;  %v3884_v1 = vmax.f32 %v3852_v36, 0.0  ;;  %v3855_v39 = vadd.f32 %v11599_v40, %v3819_v61  ;;  %v3818_v16 = vmul.f32 %v11581_v33, %v3782_v59  ;;  %v3785_v18 = vadd.f32 %v8970_v60, %v3395_v30  ;;  %v13205_v59 = vld [vmem:[#allocation66_spill] sm:$0xff] }
 0x23a   : > { %v3697_v4 = vpop.f32.mrf.mxu0  ;;  %v11780_v47 = vld [vmem:[#allocation3 + $0xc7] sm:$0xff]  ;;  %v11782_v56 = vld [vmem:[#allocation3 + $0xcf] sm:$0xff]  ;;  %v3008_v14 = vadd.f32 %v13204_v37, %v2617_v27  ;;  %v2619_v3 = vadd.f32 %v13205_v59, %v2229_v54  ;;  %v2231_v55 = vadd.f32 %v13206_v51, %v11607_v52  ;;  %v3399_v2 = vadd.f32 %v11687_v24, %v3009_v17 }
 0x23b   : > { %3962 = vst [vmem:[#allocation3 + $0x108] sm:$0xff] %v3884_v1  ;;  %v3887_v21 = vmax.f32 %v3855_v39, 0.0  ;;  %v3854_v58 = vadd.f32 %v11599_v40, %v3818_v16  ;;  %v3821_v8 = vmul.f32 %v11581_v33, %v3785_v18  ;;  %v3784_v62 = vadd.f32 %v3697_v4, %v3394_v10  ;;  %9119 = vmatprep.mubr.f32.mxu0 %v11780_v47  ;;  %v13207_v10 = vld [vmem:[#allocation105_spill] sm:$0xff]  ;;  %v13208_v52 = vld [vmem:[#allocation68_spill] sm:$0xff]  ;;  %v13215_v59 = vld [vmem:[#allocation107_spill] sm:$0xff] }
 0x23c   : > { %9045 = vmatprep.mubr.f32.mxu1 %v3884_v1  ;;  %v8973_v30 = vpop.f32.mrf.mxu0  ;;  %9120 = vmatmul.mubr.f32.gmra.mxu0 %v11782_v56  ;;  %v3011_v48 = vadd.f32 %v13207_v10, %v2620_v34  ;;  %v2622_v24 = vadd.f32 %v13209_v32, %v13208_v52  ;;  %v3398_v27 = vadd.f32 %v11708_v44, %v3008_v14  ;;  %v13218_v32 = vld [vmem:[#allocation108_spill] sm:$0xff] }
 0x23d   : > { %9046 = vmatmul.mubr.f32.gmra.mxu1 %v3885_v53  ;;  %3965 = vst [vmem:[#allocation3 + $0x130] sm:$0xff] %v3887_v21  ;;  %v3886_v38 = vmax.f32 %v3854_v58, 0.0  ;;  %v3857_v63 = vadd.f32 %v11599_v40, %v3821_v8  ;;  %v3820_v36 = vmul.f32 %v11581_v33, %v3784_v62  ;;  %v3787_v61 = vadd.f32 %v8973_v30, %v3397_v35  ;;  %v8935_v35 = vpop.f32.mrf.mxu1  ;;  %v13210_v8 = vld [vmem:[#allocation70_spill] sm:$0xff] }
 0x23e   : > { %v3707_v31 = vpop.f32.mrf.mxu0  ;;  %v11801_v53 = vld [vmem:[#allocation3 + $0xe7] sm:$0xff]  ;;  %v11803_v60 = vld [vmem:[#allocation3 + $0xef] sm:$0xff]  ;;  %v3010_v12 = vadd.f32 %v11493_v5, %v2619_v3  ;;  %v2621_v62 = vadd.f32 %v13210_v8, %v2231_v55  ;;  %v2233_v22 = vadd.f32 %v13211_v43, %v11625_v49  ;;  %v3401_v44 = vadd.f32 %v11729_v28, %v3011_v48 }
 0x23f   : > { %3964 = vst [vmem:[#allocation3 + $0x128] sm:$0xff] %v3886_v38  ;;  %v3889_v1 = vmax.f32 %v3857_v63, 0.0  ;;  %v3856_v39 = vadd.f32 %v11599_v40, %v3820_v36  ;;  %v3823_v16 = vmul.f32 %v11581_v33, %v3787_v61  ;;  %v3786_v18 = vadd.f32 %v3707_v31, %v3396_v26  ;;  %9122 = vmatprep.mubr.f32.mxu0 %v11801_v53  ;;  %v13212_v5 = vld [vmem:[#allocation106_spill] sm:$0xff]  ;;  %v13213_v49 = vld [vmem:[#allocation72_spill] sm:$0xff]  ;;  %v13214_v36 = vld [vmem:[#allocation71_spill] sm:$0xff]  ;;  %v3357_v55 = vpop.f32.mrf.mxu1 }
 0x240   : > { %9048 = vmatprep.mubr.f32.mxu1 %v3886_v38  ;;  %v8976_v54 = vpop.f32.mrf.mxu0  ;;  %9123 = vmatmul.mubr.f32.gmra.mxu0 %v11803_v60  ;;  %v3013_v34 = vadd.f32 %v13212_v5, %v2622_v24  ;;  %v2624_v28 = vadd.f32 %v13214_v36, %v13213_v49  ;;  %v3400_v61 = vadd.f32 %v11750_v19, %v3010_v12 }
 0x241   : > { %9049 = vmatmul.mubr.f32.gmra.mxu1 %v3887_v21  ;;  %3967 = vst [vmem:[#allocation3 + $0x150] sm:$0xff] %v3889_v1  ;;  %v3888_v41 = vmax.f32 %v3856_v39, 0.0  ;;  %v3859_v17 = vadd.f32 %v11599_v40, %v3823_v16  ;;  %v3822_v4 = vmul.f32 %v11581_v33, %v3786_v18  ;;  %v3789_v58 = vadd.f32 %v8976_v54, %v3399_v2  ;;  %v13216_v39 = vld [vmem:[#allocation74_spill] sm:$0xff]  ;;  %v13217_v18 = vld [vmem:[#allocation77_spill] sm:$0xff] }
 0x242   : > { %v3717_v26 = vpop.f32.mrf.mxu0  ;;  %v11820_v37 = vld [vmem:[#allocation3 + $0x107] sm:$0xff]  ;;  %v11822_v21 = vld [vmem:[#allocation3 + $0x10f] sm:$0xff]  ;;  %v3012_v3 = vadd.f32 %v13215_v59, %v2621_v62  ;;  %v2623_v16 = vadd.f32 %v13216_v39, %v2233_v22  ;;  %v2235_v52 = vadd.f32 %v13217_v18, %v11660_v29  ;;  %v3403_v19 = vadd.f32 %v11771_v50, %v3013_v34  ;;  %v8938_v22 = vpop.f32.mrf.mxu1 }
 0x243   : > { %3966 = vst [vmem:[#allocation3 + $0x148] sm:$0xff] %v3888_v41  ;;  %v3891_v14 = vmax.f32 %v3859_v17, 0.0  ;;  %v3858_v30 = vadd.f32 %v11599_v40, %v3822_v4  ;;  %v3825_v38 = vmul.f32 %v11581_v33, %v3789_v58  ;;  %v3788_v63 = vadd.f32 %v3717_v26, %v3398_v27  ;;  %9125 = vmatprep.mubr.f32.mxu0 %v11820_v37  ;;  %v13219_v29 = vld [vmem:[#allocation76_spill] sm:$0xff]  ;;  %v13220_v58 = vld [vmem:[#allocation75_spill] sm:$0xff] }
 0x244   : > { %9051 = vmatprep.mubr.f32.mxu1 %v3888_v41  ;;  %v8979_v51 = vpop.f32.mrf.mxu0  ;;  %9126 = vmatmul.mubr.f32.gmra.mxu0 %v11822_v21  ;;  %v3015_v24 = vadd.f32 %v13218_v32, %v2624_v28  ;;  %v2626_v50 = vadd.f32 %v13220_v58, %v13219_v29  ;;  %v3402_v8 = vadd.f32 %v11792_v0, %v3012_v3 }
 0x245   : > { %9052 = vmatmul.mubr.f32.gmra.mxu1 %v3889_v1  ;;  %3969 = vst [vmem:[#allocation3 + $0x170] sm:$0xff] %v3891_v14  ;;  %v3890_v2 = vmax.f32 %v3858_v30, 0.0  ;;  %v3861_v10 = vadd.f32 %v11599_v40, %v3825_v38  ;;  %v3824_v48 = vmul.f32 %v11581_v33, %v3788_v63  ;;  %v3791_v31 = vadd.f32 %v8979_v51, %v3401_v44  ;;  %v13221_v30 = vld [vmem:[#allocation78_spill] sm:$0xff] }
 0x246   : > { %v3727_v27 = vpop.f32.mrf.mxu0  ;;  %v11839_v12 = vld [vmem:[#allocation3 + $0x127] sm:$0xff]  ;;  %v11841_v1 = vld [vmem:[#allocation3 + $0x12f] sm:$0xff]  ;;  %v3014_v62 = vadd.f32 %v11524_v23, %v2623_v16  ;;  %v2625_v38 = vadd.f32 %v13221_v30, %v2235_v52  ;;  %v3405_v63 = vadd.f32 %v8935_v35, %v3015_v24  ;;  %v3017_v49 = vadd.f32 %v11540_v45, %v2626_v50  ;;  %v3367_v45 = vpop.f32.mrf.mxu1 }
 0x247   : > { %3968 = vst [vmem:[#allocation3 + $0x168] sm:$0xff] %v3890_v2  ;;  %v3893_v54 = vmax.f32 %v3861_v10, 0.0  ;;  %v3860_v41 = vadd.f32 %v11599_v40, %v3824_v48  ;;  %v3827_v17 = vmul.f32 %v11581_v33, %v3791_v31  ;;  %v3790_v4 = vadd.f32 %v3727_v27, %v3400_v61  ;;  %9128 = vmatprep.mubr.f32.mxu0 %v11839_v12 }
 0x248   : > { %9054 = vmatprep.mubr.f32.mxu1 %v3890_v2  ;;  %v8982_v43 = vpop.f32.mrf.mxu0  ;;  %9129 = vmatmul.mubr.f32.gmra.mxu0 %v11841_v1  ;;  %v3404_v3 = vadd.f32 %v3357_v55, %v3014_v62  ;;  %v3016_v35 = vadd.f32 %v11562_v46, %v2625_v38  ;;  %v3407_v39 = vadd.f32 %v8938_v22, %v3017_v49  ;;  %v4529_v38 = vld [vmem:[#allocation3 + $0x9] sm:$0xff] }
 0x249   : > { %9055 = vmatmul.mubr.f32.gmra.mxu1 %v3891_v14  ;;  %3971 = vst [vmem:[#allocation3 + $0x190] sm:$0xff] %v3893_v54  ;;  %v3892_v44 = vmax.f32 %v3860_v41, 0.0  ;;  %v3863_v5 = vadd.f32 %v11599_v40, %v3827_v17  ;;  %v3826_v34 = vmul.f32 %v11581_v33, %v3790_v4  ;;  %v3793_v26 = vadd.f32 %v8982_v43, %v3403_v19 }
 0x24a   : > { %v3737_v0 = vpop.f32.mrf.mxu0  ;;  %v11855_v36 = vld [vmem:[#allocation3 + $0x147] sm:$0xff]  ;;  %v11857_v23 = vld [vmem:[#allocation3 + $0x14f] sm:$0xff]  ;;  %v3406_v24 = vadd.f32 %v3367_v45, %v3016_v35 }
 0x24b   : > { %3970 = vst [vmem:[#allocation3 + $0x188] sm:$0xff] %v3892_v44  ;;  %v3895_v14 = vmax.f32 %v3863_v5, 0.0  ;;  %v3862_v28 = vadd.f32 %v11599_v40, %v3826_v34  ;;  %v3829_v61 = vmul.f32 %v11581_v33, %v3793_v26  ;;  %v3792_v59 = vadd.f32 %v3737_v0, %v3402_v8  ;;  %9131 = vmatprep.mubr.f32.mxu0 %v11855_v36  ;;  %v5187_v45 = vld [vmem:[#allocation4 + $0x268] sm:$0xff] }
 0x24c   : > { %9057 = vmatprep.mubr.f32.mxu1 %v3892_v44  ;;  %v8985_v51 = vpop.f32.mrf.mxu0  ;;  %9132 = vmatmul.mubr.f32.gmra.mxu0 %v11857_v23 }
 0x24d   : > { %9058 = vmatmul.mubr.f32.gmra.mxu1 %v3893_v54  ;;  %3973 = vst [vmem:[#allocation3 + $0x1b0] sm:$0xff] %v3895_v14  ;;  %v3894_v2 = vmax.f32 %v3862_v28, 0.0  ;;  %v3865_v10 = vadd.f32 %v11599_v40, %v3829_v61  ;;  %v3828_v48 = vmul.f32 %v11581_v33, %v3792_v59  ;;  %v3795_v31 = vadd.f32 %v8985_v51, %v3405_v63  ;;  %v11904_v61 = vld [vmem:[#allocation3 + $0x29] sm:$0xff]  ;;  %v13222_v59 = vld [vmem:[#allocation97_spill] sm:$0xff] }
 0x24e   : > { %v3747_v16 = vpop.f32.mrf.mxu0  ;;  %v11866_v18 = vld [vmem:[#allocation3 + $0x167] sm:$0xff]  ;;  %v11868_v52 = vld [vmem:[#allocation3 + $0x16f] sm:$0xff] }
 0x24f   : > { %3972 = vst [vmem:[#allocation3 + $0x1a8] sm:$0xff] %v3894_v2  ;;  %v3897_v46 = vmax.f32 %v3865_v10, 0.0  ;;  %v3864_v55 = vadd.f32 %v11599_v40, %v3828_v48  ;;  %v3831_v19 = vmul.f32 %v11581_v33, %v3795_v31  ;;  %v3794_v32 = vadd.f32 %v3747_v16, %v3404_v3  ;;  %9134 = vmatprep.mubr.f32.mxu0 %v11866_v18  ;;  %v11913_v51 = vld [vmem:[#allocation3 + $0x31] sm:$0xff]  ;;  %v5186_v16 = vld [vmem:[#allocation4 + $0x260] sm:$0xff] }
 0x250   : > { %9060 = vmatprep.mubr.f32.mxu1 %v3894_v2  ;;  %v8988_v27 = vpop.f32.mrf.mxu0  ;;  %9135 = vmatmul.mubr.f32.gmra.mxu0 %v11868_v52  ;;  %v11917_v2 = vld [vmem:[#allocation3 + $0x49] sm:$0xff] }
 0x251   : > { %9061 = vmatmul.mubr.f32.gmra.mxu1 %v3895_v14  ;;  %3975 = vst [vmem:[#allocation3 + $0x1d0] sm:$0xff] %v3897_v46  ;;  %v3896_v54 = vmax.f32 %v3864_v55, 0.0  ;;  %v3867_v41 = vadd.f32 %v11599_v40, %v3831_v19  ;;  %v3830_v17 = vmul.f32 %v11581_v33, %v3794_v32  ;;  %v3797_v4 = vadd.f32 %v8988_v27, %v3407_v39  ;;  %v11923_v39 = vld [vmem:[#allocation3 + $0x51] sm:$0xff] }
 0x252   : > { %v3757_v29 = vpop.f32.mrf.mxu0  ;;  %v11876_v58 = vld [vmem:[#allocation3 + $0x187] sm:$0xff]  ;;  %v11878_v50 = vld [vmem:[#allocation3 + $0x18f] sm:$0xff]  ;;  %v5185_v32 = vld [vmem:[#allocation4 + $0x258] sm:$0xff] }
 0x253   : > { %3974 = vst [vmem:[#allocation3 + $0x1c8] sm:$0xff] %v3896_v54  ;;  %v3899_v8 = vmax.f32 %v3867_v41, 0.0  ;;  %v3866_v62 = vadd.f32 %v11599_v40, %v3830_v17  ;;  %v3833_v43 = vmul.f32 %v11581_v33, %v3797_v4  ;;  %v3796_v22 = vadd.f32 %v3757_v29, %v3406_v24  ;;  %9137 = vmatprep.mubr.f32.mxu0 %v11876_v58  ;;  %v5494_v55 = vld [vmem:[#allocation4 + $0x2f0] sm:$0xff]  ;;  %v5493_v24 = vld [vmem:[#allocation4 + $0x2e8] sm:$0xff]  ;;  %v5491_v17 = vld [vmem:[#allocation4 + $0x2d8] sm:$0xff] }
 0x254   : > { %9063 = vmatprep.mubr.f32.mxu1 %v3896_v54  ;;  %9138 = vmatmul.mubr.f32.gmra.mxu0 %v11878_v50  ;;  %v11932_v19 = vld [vmem:[#allocation3 + $0x71] sm:$0xff]  ;;  %v5492_v54 = vld [vmem:[#allocation4 + $0x2e0] sm:$0xff]  ;;  %v5183_v41 = vld [vmem:[#allocation4 + $0x248] sm:$0xff] }
 0x255   : > { %9064 = vmatmul.mubr.f32.gmra.mxu1 %v3897_v46  ;;  %3977 = vst [vmem:[#allocation3 + $0x1f0] sm:$0xff] %v3899_v8  ;;  %v3898_v44 = vmax.f32 %v3866_v62, 0.0  ;;  %v3869_v5 = vadd.f32 %v11599_v40, %v3833_v43  ;;  %v3832_v34 = vmul.f32 %v11581_v33, %v3796_v22  ;;  %v4530_v33 = vld [vmem:[#allocation3 + $0x11] sm:$0xff]  ;;  %v11927_v46 = vld [vmem:[#allocation3 + $0x69] sm:$0xff]  ;;  %v5182_v4 = vld [vmem:[#allocation4 + $0x240] sm:$0xff] }
 0x256   : > { %v11886_v26 = vld [vmem:[#allocation3 + $0x1a7] sm:$0xff]  ;;  %v11888_v30 = vld [vmem:[#allocation3 + $0x1af] sm:$0xff] }
 0x257   : > { %3976 = vst [vmem:[#allocation3 + $0x1e8] sm:$0xff] %v3898_v44  ;;  %v3901_v63 = vmax.f32 %v3869_v5, 0.0  ;;  %v11891_v49 = vadd.f32 %v11599_v40, %v3832_v34  ;;  %9140 = vmatprep.mubr.f32.mxu0 %v11886_v26  ;;  %9066 = vmatprep.mubr.f32.mxu1 %v3898_v44  ;;  %v5188_v40 = vld [vmem:[#allocation4 + $0x270] sm:$0xff]  ;;  %v5489_v62 = vld [vmem:[#allocation4 + $0x2c8] sm:$0xff]  ;;  %v5488_v22 = vld [vmem:[#allocation4 + $0x2c0] sm:$0xff] }
 0x258   : > { %9141 = vmatmul.mubr.f32.gmra.mxu0 %v11888_v30  ;;  %v5184_v27 = vld [vmem:[#allocation4 + $0x250] sm:$0xff]  ;;  %v5179_v44 = vld [vmem:[#allocation4 + $0x228] sm:$0xff]  ;;  %v5487_v5 = vld [vmem:[#allocation4 + $0x2b8] sm:$0xff] }
 0x259   : > { %9067 = vmatmul.mubr.f32.gmra.mxu1 %v3899_v8  ;;  %3979 = vst [vmem:[#allocation3 + $0x210] sm:$0xff] %v3901_v63  ;;  %v3900_v0 = vmax.f32 %v11891_v49, 0.0  ;;  %v5490_v29 = vld [vmem:[#allocation4 + $0x2d0] sm:$0xff]  ;;  %v5181_v8 = vld [vmem:[#allocation4 + $0x238] sm:$0xff]  ;;  %v5178_v34 = vld [vmem:[#allocation4 + $0x220] sm:$0xff] }
 0x25a   : > { %9181 = vmatprep.mubr.f32.mxu1 %v4529_v38  ;;  %v11896_v14 = vld [vmem:[#allocation3 + $0x1c7] sm:$0xff]  ;;  %v11898_v28 = vld [vmem:[#allocation3 + $0x1cf] sm:$0xff]  ;;  %v5177_v63 = vld [vmem:[#allocation4 + $0x218] sm:$0xff] }
 0x25b   : > { %3978 = vst [vmem:[#allocation3 + $0x208] sm:$0xff] %v3900_v0  ;;  %9143 = vmatprep.mubr.f32.mxu0 %v11896_v14  ;;  %v5180_v43 = vld [vmem:[#allocation4 + $0x230] sm:$0xff] }
 0x25c   : > { %9144 = vmatmul.mubr.f32.gmra.mxu0 %v11898_v28  ;;  %v5486_v38 = vld [vmem:[#allocation4 + $0x2b0] sm:$0xff] }
 0x25d   : > { %9182 = vmatmul.mubr.f32.vlgmr.msra.gmra.mxu1 %v4530_v33  ;;  %v9023_v10 = vpop.f32.mrf.mxu1  ;;  %v9103_v48 = vpop.f32.mrf.mxu0  ;;  %v5485_v33 = vld [vmem:[#allocation4 + $0x2a8] sm:$0xff] }
 0x25e   : > { %9184 = vmatprep.mubr.f32.mxu1 %v11904_v61  ;;  %9310 = vmatpush3.msra.mxu1 %v13222_v59  ;;  %v11908_v3 = vld [vmem:[#allocation3 + $0x1e7] sm:$0xff]  ;;  %v11910_v35 = vld [vmem:[#allocation3 + $0x1ef] sm:$0xff]  ;;  %v11921_v31 = vadd.f32 %v9103_v48, %v9023_v10  ;;  %v5483_v10 = vld [vmem:[#allocation4 + $0x298] sm:$0xff] }
 0x25f   : > { %9311 = vmatprep.subr.mxu1 %v5188_v40  ;;  %9146 = vmatprep.mubr.f32.mxu0 %v11908_v3  ;;  %v5484_v59 = vld [vmem:[#allocation4 + $0x2a0] sm:$0xff] }
 0x260   : > { %9312 = vmatpush3.msra.mxu1 %v5188_v40  ;;  %9147 = vmatmul.mubr.f32.gmra.mxu0 %v11910_v35  ;;  %v5176_v40 = vld [vmem:[#allocation4 + $0x210] sm:$0xff]  ;;  %v5174_v48 = vld [vmem:[#allocation4 + $0x200] sm:$0xff] }
 0x261   : > { %9185 = vmatmul.mubr.f32.gmra.mxu1 %v11913_v51  ;;  %9261 = vmatprep.mubr.f32.mxu0 %v11675_v42  ;;  %v13223_v42 = vld [vmem:[#allocation104_spill] sm:$0xff] }
 0x262   : > { %9187 = vmatprep.mubr.f32.mxu1 %v11917_v2  ;;  %9313 = vmatprep.subr.mxu1 %v5187_v45  ;;  %v12159_v49 = vld [vmem:[#allocation3 + $0x209] sm:$0xff] }
 0x263   : > { %9314 = vmatpush3.msra.mxu1 %v5187_v45  ;;  %v5175_v45 = vld [vmem:[#allocation4 + $0x208] sm:$0xff] }
 0x264   : > { %9262 = vmatmul.mubr.f32.vlgmr.msra.gmra.mxu0 %v11677_v20  ;;  %9315 = vmatprep.subr.mxu1 %v5186_v16  ;;  %v11936_v20 = vld [vmem:[#allocation3 + $0x89] sm:$0xff] }
 0x265   : > { %9188 = vmatmul.mubr.f32.gmra.mxu1 %v11923_v39  ;;  %9264 = vmatprep.mubr.f32.mxu0 %v11696_v6  ;;  %v11940_v6 = vld [vmem:[#allocation3 + $0x91] sm:$0xff] }
 0x266   : > { %9190 = vmatprep.mubr.f32.mxu1 %v11927_v46  ;;  %9390 = vmatpush3.msra.mxu0 %v13223_v42  ;;  %v5141_v42 = vld [vmem:[#allocation3 + $0x28] sm:$0xff] }
 0x267   : > { %9391 = vmatprep.subr.mxu0 %v5494_v55  ;;  %9316 = vmatpush3.msra.mxu1 %v5186_v16  ;;  %v5482_v16 = vld [vmem:[#allocation4 + $0x290] sm:$0xff] }
 0x268   : > { %9265 = vmatmul.mubr.f32.gmra.mxu0 %v11698_v11  ;;  %9317 = vmatprep.subr.mxu1 %v5185_v32  ;;  %v11944_v11 = vld [vmem:[#allocation3 + $0xa9] sm:$0xff] }
 0x269   : > { %9191 = vmatmul.mubr.f32.gmra.mxu1 %v11932_v19  ;;  %9267 = vmatprep.mubr.f32.mxu0 %v11717_v15  ;;  %v11948_v15 = vld [vmem:[#allocation3 + $0xb1] sm:$0xff] }
 0x26a   : > { %9193 = vmatprep.mubr.f32.mxu1 %v11936_v20  ;;  %9392 = vmatpush3.msra.mxu0 %v5494_v55  ;;  %v5481_v55 = vld [vmem:[#allocation4 + $0x288] sm:$0xff] }
 0x26b   : > { %9393 = vmatprep.subr.mxu0 %v5493_v24  ;;  %9318 = vmatpush3.msra.mxu1 %v5185_v32  ;;  %v5480_v32 = vld [vmem:[#allocation4 + $0x280] sm:$0xff] }
 0x26c   : > { %9268 = vmatmul.mubr.f32.gmra.mxu0 %v11719_v25  ;;  %9319 = vmatprep.subr.mxu1 %v5184_v27  ;;  %v11952_v25 = vld [vmem:[#allocation3 + $0xc9] sm:$0xff] }
 0x26d   : > { %9194 = vmatmul.mubr.f32.gmra.mxu1 %v11940_v6  ;;  %9270 = vmatprep.mubr.f32.mxu0 %v11738_v57  ;;  %v11956_v57 = vld [vmem:[#allocation3 + $0xd1] sm:$0xff] }
 0x26e   : > { %9196 = vmatprep.mubr.f32.mxu1 %v11944_v11  ;;  %9394 = vmatpush3.msra.mxu0 %v5493_v24  ;;  %v12034_v24 = vld [vmem:[#allocation3 + $0x207] sm:$0xff] }
 0x26f   : > { %9395 = vmatprep.subr.mxu0 %v5492_v54  ;;  %9320 = vmatpush3.msra.mxu1 %v5184_v27  ;;  %v5801_v27 = vld [vmem:[#allocation4 + $0x370] sm:$0xff] }
 0x270   : > { %9271 = vmatmul.mubr.f32.gmra.mxu0 %v11740_v7  ;;  %9321 = vmatprep.subr.mxu1 %v5183_v41  ;;  %v11960_v7 = vld [vmem:[#allocation3 + $0xe9] sm:$0xff] }
 0x271   : > { %9197 = vmatmul.mubr.f32.gmra.mxu1 %v11948_v15  ;;  %9273 = vmatprep.mubr.f32.mxu0 %v11759_v9  ;;  %v11964_v9 = vld [vmem:[#allocation3 + $0xf1] sm:$0xff] }
 0x272   : > { %9199 = vmatprep.mubr.f32.mxu1 %v11952_v25  ;;  %9396 = vmatpush3.msra.mxu0 %v5492_v54  ;;  %v12039_v54 = vld [vmem:[#allocation3 + $0x20f] sm:$0xff] }
 0x273   : > { %9397 = vmatprep.subr.mxu0 %v5491_v17  ;;  %9322 = vmatpush3.msra.mxu1 %v5183_v41  ;;  %v5800_v41 = vld [vmem:[#allocation4 + $0x368] sm:$0xff] }
 0x274   : > { %9274 = vmatmul.mubr.f32.gmra.mxu0 %v11761_v13  ;;  %9323 = vmatprep.subr.mxu1 %v5182_v4  ;;  %v11968_v13 = vld [vmem:[#allocation3 + $0x109] sm:$0xff] }
 0x275   : > { %9200 = vmatmul.mubr.f32.gmra.mxu1 %v11956_v57  ;;  %9276 = vmatprep.mubr.f32.mxu0 %v11780_v47  ;;  %v11972_v47 = vld [vmem:[#allocation3 + $0x111] sm:$0xff] }
 0x276   : > { %9202 = vmatprep.mubr.f32.mxu1 %v11960_v7  ;;  %9398 = vmatpush3.msra.mxu0 %v5491_v17  ;;  %v5799_v17 = vld [vmem:[#allocation4 + $0x360] sm:$0xff] }
 0x277   : > { %9399 = vmatprep.subr.mxu0 %v5490_v29  ;;  %9324 = vmatpush3.msra.mxu1 %v5182_v4  ;;  %v12047_v4 = vld [vmem:[#allocation3 + $0x68] sm:$0xff] }
 0x278   : > { %9277 = vmatmul.mubr.f32.gmra.mxu0 %v11782_v56  ;;  %9325 = vmatprep.subr.mxu1 %v5181_v8  ;;  %v11976_v56 = vld [vmem:[#allocation3 + $0x129] sm:$0xff] }
 0x279   : > { %9203 = vmatmul.mubr.f32.gmra.mxu1 %v11964_v9  ;;  %9279 = vmatprep.mubr.f32.mxu0 %v11801_v53  ;;  %v11980_v53 = vld [vmem:[#allocation3 + $0x131] sm:$0xff] }
 0x27a   : > { %9205 = vmatprep.mubr.f32.mxu1 %v11968_v13  ;;  %9400 = vmatpush3.msra.mxu0 %v5490_v29  ;;  %v6107_v29 = vld [vmem:[#allocation4 + $0x3f0] sm:$0xff] }
 0x27b   : > { %9401 = vmatprep.subr.mxu0 %v5489_v62  ;;  %9326 = vmatpush3.msra.mxu1 %v5181_v8  ;;  %v12052_v8 = vld [vmem:[#allocation3 + $0x70] sm:$0xff] }
 0x27c   : > { %9280 = vmatmul.mubr.f32.gmra.mxu0 %v11803_v60  ;;  %9327 = vmatprep.subr.mxu1 %v5180_v43  ;;  %v11984_v60 = vld [vmem:[#allocation3 + $0x149] sm:$0xff] }
 0x27d   : > { %9206 = vmatmul.mubr.f32.gmra.mxu1 %v11972_v47  ;;  %9282 = vmatprep.mubr.f32.mxu0 %v11820_v37  ;;  %v11988_v37 = vld [vmem:[#allocation3 + $0x151] sm:$0xff] }
 0x27e   : > { %9208 = vmatprep.mubr.f32.mxu1 %v11976_v56  ;;  %9402 = vmatpush3.msra.mxu0 %v5489_v62  ;;  %v12055_v62 = vld [vmem:[#allocation3 + $0x88] sm:$0xff] }
 0x27f   : > { %9403 = vmatprep.subr.mxu0 %v5488_v22  ;;  %9328 = vmatpush3.msra.mxu1 %v5180_v43  ;;  %v6105_v43 = vld [vmem:[#allocation4 + $0x3e0] sm:$0xff] }
 0x280   : > { %9283 = vmatmul.mubr.f32.gmra.mxu0 %v11822_v21  ;;  %9329 = vmatprep.subr.mxu1 %v5179_v44  ;;  %v11992_v21 = vld [vmem:[#allocation3 + $0x169] sm:$0xff] }
 0x281   : > { %9209 = vmatmul.mubr.f32.gmra.mxu1 %v11980_v53  ;;  %9285 = vmatprep.mubr.f32.mxu0 %v11839_v12  ;;  %v11996_v12 = vld [vmem:[#allocation3 + $0x171] sm:$0xff] }
 0x282   : > { %9211 = vmatprep.mubr.f32.mxu1 %v11984_v60  ;;  %9404 = vmatpush3.msra.mxu0 %v5488_v22  ;;  %v12063_v22 = vld [vmem:[#allocation3 + $0xa8] sm:$0xff] }
 0x283   : > { %9405 = vmatprep.subr.mxu0 %v5487_v5  ;;  %9330 = vmatpush3.msra.mxu1 %v5179_v44  ;;  %v6104_v44 = vld [vmem:[#allocation4 + $0x3d8] sm:$0xff] }
 0x284   : > { %9286 = vmatmul.mubr.f32.gmra.mxu0 %v11841_v1  ;;  %9331 = vmatprep.subr.mxu1 %v5178_v34  ;;  %v12000_v1 = vld [vmem:[#allocation3 + $0x189] sm:$0xff] }
 0x285   : > { %9212 = vmatmul.mubr.f32.gmra.mxu1 %v11988_v37  ;;  %9288 = vmatprep.mubr.f32.mxu0 %v11855_v36  ;;  %v12004_v36 = vld [vmem:[#allocation3 + $0x191] sm:$0xff] }
 0x286   : > { %9214 = vmatprep.mubr.f32.mxu1 %v11992_v21  ;;  %9406 = vmatpush3.msra.mxu0 %v5487_v5  ;;  %v12071_v5 = vld [vmem:[#allocation3 + $0xc8] sm:$0xff] }
 0x287   : > { %9407 = vmatprep.subr.mxu0 %v5486_v38  ;;  %9332 = vmatpush3.msra.mxu1 %v5178_v34  ;;  %v6103_v34 = vld [vmem:[#allocation4 + $0x3d0] sm:$0xff] }
 0x288   : > { %9289 = vmatmul.mubr.f32.gmra.mxu0 %v11857_v23  ;;  %9333 = vmatprep.subr.mxu1 %v5177_v63  ;;  %v12008_v23 = vld [vmem:[#allocation3 + $0x1a9] sm:$0xff] }
 0x289   : > { %9215 = vmatmul.mubr.f32.gmra.mxu1 %v11996_v12  ;;  %9291 = vmatprep.mubr.f32.mxu0 %v11866_v18  ;;  %v12012_v18 = vld [vmem:[#allocation3 + $0x1b1] sm:$0xff] }
 0x28a   : > { %9217 = vmatprep.mubr.f32.mxu1 %v12000_v1  ;;  %9408 = vmatpush3.msra.mxu0 %v5486_v38  ;;  %v12079_v38 = vld [vmem:[#allocation3 + $0xe8] sm:$0xff] }
 0x28b   : > { %9409 = vmatprep.subr.mxu0 %v5485_v33  ;;  %9334 = vmatpush3.msra.mxu1 %v5177_v63  ;;  %v6102_v63 = vld [vmem:[#allocation4 + $0x3c8] sm:$0xff] }
 0x28c   : > { %9292 = vmatmul.mubr.f32.gmra.mxu0 %v11868_v52  ;;  %9335 = vmatprep.subr.mxu1 %v5176_v40  ;;  %v12016_v52 = vld [vmem:[#allocation3 + $0x1c9] sm:$0xff] }
 0x28d   : > { %9218 = vmatmul.mubr.f32.gmra.mxu1 %v12004_v36  ;;  %9294 = vmatprep.mubr.f32.mxu0 %v11876_v58  ;;  %v12020_v58 = vld [vmem:[#allocation3 + $0x1d1] sm:$0xff] }
 0x28e   : > { %9220 = vmatprep.mubr.f32.mxu1 %v12008_v23  ;;  %9410 = vmatpush3.msra.mxu0 %v5485_v33  ;;  %v12087_v33 = vld [vmem:[#allocation3 + $0x108] sm:$0xff] }
 0x28f   : > { %9411 = vmatprep.subr.mxu0 %v5484_v59  ;;  %9336 = vmatpush3.msra.mxu1 %v5176_v40  ;;  %v6101_v40 = vld [vmem:[#allocation4 + $0x3c0] sm:$0xff] }
 0x290   : > { %9295 = vmatmul.mubr.f32.gmra.mxu0 %v11878_v50  ;;  %9337 = vmatprep.subr.mxu1 %v5175_v45  ;;  %v12024_v50 = vld [vmem:[#allocation3 + $0x1e9] sm:$0xff] }
 0x291   : > { %9221 = vmatmul.mubr.f32.gmra.mxu1 %v12012_v18  ;;  %9297 = vmatprep.mubr.f32.mxu0 %v11886_v26  ;;  %v12028_v26 = vld [vmem:[#allocation3 + $0x1f1] sm:$0xff] }
 0x292   : > { %9223 = vmatprep.mubr.f32.mxu1 %v12016_v52  ;;  %9412 = vmatpush3.msra.mxu0 %v5484_v59  ;;  %v12095_v59 = vld [vmem:[#allocation3 + $0x128] sm:$0xff] }
 0x293   : > { %9413 = vmatprep.subr.mxu0 %v5483_v10  ;;  %9338 = vmatpush3.msra.mxu1 %v5175_v45  ;;  %v6100_v45 = vld [vmem:[#allocation4 + $0x3b8] sm:$0xff] }
 0x294   : > { %9298 = vmatmul.mubr.f32.gmra.mxu0 %v11888_v30  ;;  %9339 = vmatprep.subr.mxu1 %v5174_v48  ;;  %v5802_v30 = vld [vmem:[#allocation4 + $0x378] sm:$0xff] }
 0x295   : > { %9224 = vmatmul.mubr.f32.gmra.mxu1 %v12020_v58  ;;  %9300 = vmatprep.mubr.f32.mxu0 %v11896_v14  ;;  %v6108_v14 = vld [vmem:[#allocation4 + $0x3f8] sm:$0xff] }
 0x296   : > { %9226 = vmatprep.mubr.f32.mxu1 %v12024_v50  ;;  %9414 = vmatpush3.msra.mxu0 %v5483_v10  ;;  %v12103_v10 = vld [vmem:[#allocation3 + $0x148] sm:$0xff] }
 0x297   : > { %9415 = vmatprep.subr.mxu0 %v5482_v16  ;;  %9340 = vmatpush3.msra.mxu1 %v5174_v48  ;;  %v6099_v48 = vld [vmem:[#allocation4 + $0x3b0] sm:$0xff] }
 0x298   : > { %9301 = vmatmul.mubr.f32.gmra.mxu0 %v11898_v28  ;;  %9469 = vmatprep.subr.mxu1 %v5802_v30  ;;  %v5142_v28 = vld [vmem:[#allocation3 + $0x30] sm:$0xff] }
 0x299   : > { %9227 = vmatmul.mubr.f32.gmra.mxu1 %v12028_v26  ;;  %9303 = vmatprep.mubr.f32.mxu0 %v11908_v3  ;;  %v12037_v3 = vld [vmem:[#allocation3 + $0x48] sm:$0xff] }
 0x29a   : > { %9416 = vmatpush3.msra.mxu0 %v5482_v16  ;;  %9341 = vmatprep.mubr.f32.mxu1 %v5141_v42  ;;  %v12111_v16 = vld [vmem:[#allocation3 + $0x168] sm:$0xff]  ;;  %v6097_v42 = vld [vmem:[#allocation4 + $0x3a0] sm:$0xff] }
 0x29b   : > { %9417 = vmatprep.subr.mxu0 %v5481_v55 }
 0x29c   : > { %9418 = vmatpush3.msra.mxu0 %v5481_v55  ;;  %v6098_v55 = vld [vmem:[#allocation4 + $0x3a8] sm:$0xff] }
 0x29d   : > { %9304 = vmatmul.mubr.f32.gmra.mxu0 %v11910_v35  ;;  %9419 = vmatprep.subr.mxu0 %v5480_v32  ;;  %v12044_v35 = vld [vmem:[#allocation3 + $0x50] sm:$0xff] }
 0x29e   : > { %9306 = vmatprep.mubr.f32.mxu0 %v12034_v24  ;;  %9420 = vmatpush3.msra.mxu0 %v5480_v32  ;;  %v12127_v32 = vld [vmem:[#allocation3 + $0x1a8] sm:$0xff] }
 0x29f   : > { %9342 = vmatmul.mubr.f32.vlgmr.msra.gmra.mxu1 %v5142_v28  ;;  %9549 = vmatprep.subr.mxu0 %v6108_v14  ;;  %v12135_v28 = vld [vmem:[#allocation3 + $0x1c8] sm:$0xff] }
 0x2a0   : > { %9344 = vmatprep.mubr.f32.mxu1 %v12037_v3  ;;  %9470 = vmatpush3.msra.mxu1 %v5802_v30  ;;  %v12119_v30 = vld [vmem:[#allocation3 + $0x188] sm:$0xff] }
 0x2a1   : > { %9307 = vmatmul.mubr.f32.gmra.mxu0 %v12039_v54  ;;  %9471 = vmatprep.subr.mxu1 %v5801_v27 }
 0x2a2   : > { %9421 = vmatprep.mubr.f32.mxu0 %v11904_v61  ;;  %9472 = vmatpush3.msra.mxu1 %v5801_v27  ;;  %v6106_v61 = vld [vmem:[#allocation4 + $0x3e8] sm:$0xff]  ;;  %v6095_v27 = vld [vmem:[#allocation4 + $0x390] sm:$0xff] }
 0x2a3   : > { %9345 = vmatmul.mubr.f32.gmra.mxu1 %v12044_v35  ;;  %9473 = vmatprep.subr.mxu1 %v5800_v41 }
 0x2a4   : > { %9347 = vmatprep.mubr.f32.mxu1 %v12047_v4  ;;  %9474 = vmatpush3.msra.mxu1 %v5800_v41  ;;  %v12143_v41 = vld [vmem:[#allocation3 + $0x1e8] sm:$0xff] }
 0x2a5   : > { %9422 = vmatmul.mubr.f32.vlgmr.msra.gmra.mxu0 %v11913_v51  ;;  %9475 = vmatprep.subr.mxu1 %v5799_v17  ;;  %v12060_v51 = vld [vmem:[#allocation3 + $0x90] sm:$0xff] }
 0x2a6   : > { %9424 = vmatprep.mubr.f32.mxu0 %v11917_v2  ;;  %9550 = vmatpush3.msra.mxu0 %v6108_v14  ;;  %v5798_v2 = vld [vmem:[#allocation4 + $0x358] sm:$0xff] }
 0x2a7   : > { %9348 = vmatmul.mubr.f32.gmra.mxu1 %v12052_v8  ;;  %9551 = vmatprep.subr.mxu0 %v6107_v29  ;;  %v6096_v14 = vld [vmem:[#allocation4 + $0x398] sm:$0xff] }
 0x2a8   : > { %9350 = vmatprep.mubr.f32.mxu1 %v12055_v62  ;;  %9552 = vmatpush3.msra.mxu0 %v6107_v29  ;;  %v6093_v29 = vld [vmem:[#allocation4 + $0x380] sm:$0xff] }
 0x2a9   : > { %9425 = vmatmul.mubr.f32.gmra.mxu0 %v11923_v39  ;;  %9553 = vmatprep.subr.mxu0 %v6106_v61  ;;  %v12068_v39 = vld [vmem:[#allocation3 + $0xb0] sm:$0xff] }
 0x2aa   : > { %9427 = vmatprep.mubr.f32.mxu0 %v11927_v46  ;;  %9554 = vmatpush3.msra.mxu0 %v6106_v61  ;;  %v5797_v46 = vld [vmem:[#allocation4 + $0x350] sm:$0xff]  ;;  %v5754_v61 = vld [vmem:[#allocation3 + $0x47] sm:$0xff] }
 0x2ab   : > { %9351 = vmatmul.mubr.f32.gmra.mxu1 %v12060_v51  ;;  %9555 = vmatprep.subr.mxu0 %v6105_v43 }
 0x2ac   : > { %9353 = vmatprep.mubr.f32.mxu1 %v12063_v22  ;;  %9476 = vmatpush3.msra.mxu1 %v5799_v17  ;;  %v6094_v17 = vld [vmem:[#allocation4 + $0x388] sm:$0xff] }
 0x2ad   : > { %9428 = vmatmul.mubr.f32.gmra.mxu0 %v11932_v19  ;;  %9477 = vmatprep.subr.mxu1 %v5798_v2  ;;  %v12076_v19 = vld [vmem:[#allocation3 + $0xd0] sm:$0xff] }
 0x2ae   : > { %9430 = vmatprep.mubr.f32.mxu0 %v11936_v20  ;;  %9556 = vmatpush3.msra.mxu0 %v6105_v43  ;;  %v5796_v20 = vld [vmem:[#allocation4 + $0x348] sm:$0xff] }
 0x2af   : > { %9354 = vmatmul.mubr.f32.gmra.mxu1 %v12068_v39  ;;  %9557 = vmatprep.subr.mxu0 %v6104_v44  ;;  %v5756_v43 = vld [vmem:[#allocation3 + $0x67] sm:$0xff] }
 0x2b0   : > { %9356 = vmatprep.mubr.f32.mxu1 %v12071_v5  ;;  %9478 = vmatpush3.msra.mxu1 %v5798_v2  ;;  %v12164_v2 = vld [vmem:[#allocation3 + $0x8] sm:$0xff] }
 0x2b1   : > { %9431 = vmatmul.mubr.f32.gmra.mxu0 %v11940_v6  ;;  %9479 = vmatprep.subr.mxu1 %v5797_v46  ;;  %v12084_v6 = vld [vmem:[#allocation3 + $0xf0] sm:$0xff] }
 0x2b2   : > { %9433 = vmatprep.mubr.f32.mxu0 %v11944_v11  ;;  %9558 = vmatpush3.msra.mxu0 %v6104_v44  ;;  %v5795_v11 = vld [vmem:[#allocation4 + $0x340] sm:$0xff]  ;;  %v12167_v44 = vld [vmem:[#allocation3 + $0x211] sm:$0xff] }
 0x2b3   : > { %9357 = vmatmul.mubr.f32.gmra.mxu1 %v12076_v19  ;;  %9559 = vmatprep.subr.mxu0 %v6103_v34 }
 0x2b4   : > { %9359 = vmatprep.mubr.f32.mxu1 %v12079_v38  ;;  %9480 = vmatpush3.msra.mxu1 %v5797_v46 }
 0x2b5   : > { %9434 = vmatmul.mubr.f32.gmra.mxu0 %v11948_v15  ;;  %9481 = vmatprep.subr.mxu1 %v5796_v20  ;;  %v12092_v15 = vld [vmem:[#allocation3 + $0x110] sm:$0xff] }
 0x2b6   : > { %9436 = vmatprep.mubr.f32.mxu0 %v11952_v25  ;;  %9560 = vmatpush3.msra.mxu0 %v6103_v34  ;;  %v5794_v25 = vld [vmem:[#allocation4 + $0x338] sm:$0xff]  ;;  %v5757_v34 = vld [vmem:[#allocation3 + $0x6f] sm:$0xff] }
 0x2b7   : > { %9360 = vmatmul.mubr.f32.gmra.mxu1 %v12084_v6  ;;  %9561 = vmatprep.subr.mxu0 %v6102_v63 }
 0x2b8   : > { %9362 = vmatprep.mubr.f32.mxu1 %v12087_v33  ;;  %9482 = vmatpush3.msra.mxu1 %v5796_v20  ;;  %v6411_v20 = vld [vmem:[#allocation4 + $0x460] sm:$0xff] }
 0x2b9   : > { %9437 = vmatmul.mubr.f32.gmra.mxu0 %v11956_v57  ;;  %9483 = vmatprep.subr.mxu1 %v5795_v11  ;;  %v12100_v57 = vld [vmem:[#allocation3 + $0x130] sm:$0xff] }
 0x2ba   : > { %9439 = vmatprep.mubr.f32.mxu0 %v11960_v7  ;;  %9562 = vmatpush3.msra.mxu0 %v6102_v63  ;;  %v5793_v7 = vld [vmem:[#allocation4 + $0x330] sm:$0xff]  ;;  %v5758_v63 = vld [vmem:[#allocation3 + $0x87] sm:$0xff] }
 0x2bb   : > { %9363 = vmatmul.mubr.f32.gmra.mxu1 %v12092_v15  ;;  %9563 = vmatprep.subr.mxu0 %v6101_v40 }
 0x2bc   : > { %9365 = vmatprep.mubr.f32.mxu1 %v12095_v59  ;;  %9484 = vmatpush3.msra.mxu1 %v5795_v11 }
 0x2bd   : > { %9440 = vmatmul.mubr.f32.gmra.mxu0 %v11964_v9  ;;  %9485 = vmatprep.subr.mxu1 %v5794_v25  ;;  %v12108_v9 = vld [vmem:[#allocation3 + $0x150] sm:$0xff] }
 0x2be   : > { %9442 = vmatprep.mubr.f32.mxu0 %v11968_v13  ;;  %9564 = vmatpush3.msra.mxu0 %v6101_v40  ;;  %v5792_v13 = vld [vmem:[#allocation4 + $0x328] sm:$0xff]  ;;  %v6410_v40 = vld [vmem:[#allocation4 + $0x458] sm:$0xff] }
 0x2bf   : > { %9366 = vmatmul.mubr.f32.gmra.mxu1 %v12100_v57  ;;  %9565 = vmatprep.subr.mxu0 %v6100_v45 }
 0x2c0   : > { %9368 = vmatprep.mubr.f32.mxu1 %v12103_v10  ;;  %9486 = vmatpush3.msra.mxu1 %v5794_v25 }
 0x2c1   : > { %9443 = vmatmul.mubr.f32.gmra.mxu0 %v11972_v47  ;;  %9487 = vmatprep.subr.mxu1 %v5793_v7  ;;  %v12116_v47 = vld [vmem:[#allocation3 + $0x170] sm:$0xff] }
 0x2c2   : > { %9445 = vmatprep.mubr.f32.mxu0 %v11976_v56  ;;  %9566 = vmatpush3.msra.mxu0 %v6100_v45  ;;  %v5791_v56 = vld [vmem:[#allocation4 + $0x320] sm:$0xff]  ;;  %v5759_v45 = vld [vmem:[#allocation3 + $0x8f] sm:$0xff] }
 0x2c3   : > { %9369 = vmatmul.mubr.f32.gmra.mxu1 %v12108_v9  ;;  %9567 = vmatprep.subr.mxu0 %v6099_v48 }
 0x2c4   : > { %9371 = vmatprep.mubr.f32.mxu1 %v12111_v16  ;;  %9488 = vmatpush3.msra.mxu1 %v5793_v7  ;;  %v6409_v7 = vld [vmem:[#allocation4 + $0x450] sm:$0xff] }
 0x2c5   : > { %9446 = vmatmul.mubr.f32.gmra.mxu0 %v11980_v53  ;;  %9489 = vmatprep.subr.mxu1 %v5792_v13  ;;  %v12124_v53 = vld [vmem:[#allocation3 + $0x190] sm:$0xff] }
 0x2c6   : > { %9448 = vmatprep.mubr.f32.mxu0 %v11984_v60  ;;  %9568 = vmatpush3.msra.mxu0 %v6099_v48  ;;  %v5790_v60 = vld [vmem:[#allocation4 + $0x318] sm:$0xff]  ;;  %v5760_v48 = vld [vmem:[#allocation3 + $0xa7] sm:$0xff] }
 0x2c7   : > { %9372 = vmatmul.mubr.f32.gmra.mxu1 %v12116_v47  ;;  %9569 = vmatprep.subr.mxu0 %v6098_v55 }
 0x2c8   : > { %9374 = vmatprep.mubr.f32.mxu1 %v12119_v30  ;;  %9490 = vmatpush3.msra.mxu1 %v5792_v13 }
 0x2c9   : > { %9449 = vmatmul.mubr.f32.gmra.mxu0 %v11988_v37  ;;  %9491 = vmatprep.subr.mxu1 %v5791_v56  ;;  %v12132_v37 = vld [vmem:[#allocation3 + $0x1b0] sm:$0xff] }
 0x2ca   : > { %9451 = vmatprep.mubr.f32.mxu0 %v11992_v21  ;;  %9570 = vmatpush3.msra.mxu0 %v6098_v55  ;;  %v5789_v21 = vld [vmem:[#allocation4 + $0x310] sm:$0xff]  ;;  %v6408_v55 = vld [vmem:[#allocation4 + $0x448] sm:$0xff] }
 0x2cb   : > { %9375 = vmatmul.mubr.f32.gmra.mxu1 %v12124_v53  ;;  %9571 = vmatprep.subr.mxu0 %v6097_v42 }
 0x2cc   : > { %9377 = vmatprep.mubr.f32.mxu1 %v12127_v32  ;;  %9492 = vmatpush3.msra.mxu1 %v5791_v56 }
 0x2cd   : > { %9452 = vmatmul.mubr.f32.gmra.mxu0 %v11996_v12  ;;  %9493 = vmatprep.subr.mxu1 %v5790_v60  ;;  %v12140_v12 = vld [vmem:[#allocation3 + $0x1d0] sm:$0xff] }
 0x2ce   : > { %9454 = vmatprep.mubr.f32.mxu0 %v12000_v1  ;;  %9572 = vmatpush3.msra.mxu0 %v6097_v42  ;;  %v5788_v1 = vld [vmem:[#allocation4 + $0x308] sm:$0xff] }
 0x2cf   : > { %9378 = vmatmul.mubr.f32.gmra.mxu1 %v12132_v37  ;;  %9573 = vmatprep.subr.mxu0 %v6096_v14 }
 0x2d0   : > { %9380 = vmatprep.mubr.f32.mxu1 %v12135_v28  ;;  %9494 = vmatpush3.msra.mxu1 %v5790_v60  ;;  %v6407_v60 = vld [vmem:[#allocation4 + $0x440] sm:$0xff] }
 0x2d1   : > { %9455 = vmatmul.mubr.f32.gmra.mxu0 %v12004_v36  ;;  %9495 = vmatprep.subr.mxu1 %v5789_v21  ;;  %v12148_v36 = vld [vmem:[#allocation3 + $0x1f0] sm:$0xff] }
 0x2d2   : > { %9457 = vmatprep.mubr.f32.mxu0 %v12008_v23  ;;  %9574 = vmatpush3.msra.mxu0 %v6096_v14  ;;  %v5787_v23 = vld [vmem:[#allocation4 + $0x300] sm:$0xff] }
 0x2d3   : > { %9381 = vmatmul.mubr.f32.gmra.mxu1 %v12140_v12  ;;  %9575 = vmatprep.subr.mxu0 %v6095_v27 }
 0x2d4   : > { %9383 = vmatprep.mubr.f32.mxu1 %v12143_v41  ;;  %9496 = vmatpush3.msra.mxu1 %v5789_v21  ;;  %v5762_v21 = vld [vmem:[#allocation3 + $0xc7] sm:$0xff] }
 0x2d5   : > { %9458 = vmatmul.mubr.f32.gmra.mxu0 %v12012_v18  ;;  %9497 = vmatprep.subr.mxu1 %v5788_v1  ;;  %v12155_v18 = vld [vmem:[#allocation3 + $0x210] sm:$0xff] }
 0x2d6   : > { %9460 = vmatprep.mubr.f32.mxu0 %v12016_v52  ;;  %9576 = vmatpush3.msra.mxu0 %v6095_v27  ;;  %v6414_v52 = vld [vmem:[#allocation4 + $0x478] sm:$0xff] }
 0x2d7   : > { %9384 = vmatmul.mubr.f32.gmra.mxu1 %v12148_v36  ;;  %9577 = vmatprep.subr.mxu0 %v6094_v17 }
 0x2d8   : > { %9386 = vmatprep.mubr.f32.mxu1 %v3900_v0  ;;  %9498 = vmatpush3.msra.mxu1 %v5788_v1  ;;  %v5755_v0 = vld [vmem:[#allocation3 + $0x4f] sm:$0xff] }
 0x2d9   : > { %9461 = vmatmul.mubr.f32.gmra.mxu0 %v12020_v58  ;;  %9499 = vmatprep.subr.mxu1 %v5787_v23  ;;  %v6413_v58 = vld [vmem:[#allocation4 + $0x470] sm:$0xff] }
 0x2da   : > { %9463 = vmatprep.mubr.f32.mxu0 %v12024_v50  ;;  %9578 = vmatpush3.msra.mxu0 %v6094_v17  ;;  %v12162_v50 = vpop.f32.mrf.mxu1  ;;  %v6406_v17 = vld [vmem:[#allocation4 + $0x438] sm:$0xff] }
 0x2db   : > { %9387 = vmatmul.mubr.f32.gmra.mxu1 %v12155_v18  ;;  %9579 = vmatprep.subr.mxu0 %v6093_v29 }
 0x2dc   : > { %9501 = vmatprep.mubr.f32.mxu1 %v5754_v61  ;;  %9500 = vmatpush3.msra.mxu1 %v5787_v23 }
 0x2dd   : > { %9464 = vmatmul.mubr.f32.gmra.mxu0 %v12028_v26  ;;  %9629 = vmatprep.subr.mxu1 %v6414_v52  ;;  %v6412_v26 = vld [vmem:[#allocation4 + $0x468] sm:$0xff] }
 0x2de   : > { %9466 = vmatprep.mubr.f32.mxu0 %v12159_v49  ;;  %9580 = vmatpush3.msra.mxu0 %v6093_v29 }
 0x2df   : > { %9502 = vmatmul.mubr.f32.vlgmr.msra.gmra.mxu1 %v5755_v0  ;;  %9709 = vmatprep.subr.mxu0 %v12164_v2  ;;  %v5764_v0 = vld [vmem:[#allocation3 + $0xe7] sm:$0xff] }
 0x2e0   : > { %9504 = vmatprep.mubr.f32.mxu1 %v5756_v43  ;;  %9630 = vmatpush3.msra.mxu1 %v6414_v52  ;;  %v9026_v46 = vpop.f32.mrf.mxu1  ;;  %v6405_v52 = vld [vmem:[#allocation4 + $0x430] sm:$0xff] }
 0x2e1   : > { %9467 = vmatmul.mubr.f32.gmra.mxu0 %v12167_v44  ;;  %9631 = vmatprep.subr.mxu1 %v6413_v58 }
 0x2e2   : > { %9581 = vmatprep.mubr.f32.mxu0 %v12037_v3  ;;  %9632 = vmatpush3.msra.mxu1 %v6413_v58  ;;  %v4155_v11 = vpop.f32.mrf.mxu1  ;;  %v12173_v3 = vpop.f32.mrf.mxu0 }
 0x2e3   : > { %9505 = vmatmul.mubr.f32.gmra.mxu1 %v5757_v34  ;;  %9633 = vmatprep.subr.mxu1 %v6412_v26 }
 0x2e4   : > { %9507 = vmatprep.mubr.f32.mxu1 %v5758_v63  ;;  %9634 = vmatpush3.msra.mxu1 %v6412_v26  ;;  %v9029_v25 = vpop.f32.mrf.mxu1  ;;  %v6404_v26 = vld [vmem:[#allocation4 + $0x428] sm:$0xff] }
 0x2e5   : > { %9582 = vmatmul.mubr.f32.vlgmr.msra.gmra.mxu0 %v12044_v35  ;;  %9635 = vmatprep.subr.mxu1 %v6411_v20 }
 0x2e6   : > { %9584 = vmatprep.mubr.f32.mxu0 %v12047_v4  ;;  %9636 = vmatpush3.msra.mxu1 %v6411_v20  ;;  %v4165_v13 = vpop.f32.mrf.mxu1  ;;  %v5761_v4 = vld [vmem:[#allocation3 + $0xaf] sm:$0xff]  ;;  %v6403_v20 = vld [vmem:[#allocation4 + $0x420] sm:$0xff] }
 0x2e7   : > { %9508 = vmatmul.mubr.f32.gmra.mxu1 %v5759_v45  ;;  %9637 = vmatprep.subr.mxu1 %v6410_v40  ;;  %v6402_v45 = vld [vmem:[#allocation4 + $0x418] sm:$0xff] }
 0x2e8   : > { %9510 = vmatprep.mubr.f32.mxu1 %v5760_v48  ;;  %9638 = vmatpush3.msra.mxu1 %v6410_v40  ;;  %v9106_v56 = vpop.f32.mrf.mxu0 }
 0x2e9   : > { %9585 = vmatmul.mubr.f32.gmra.mxu0 %v12052_v8  ;;  %v9032_v35 = vpop.f32.mrf.mxu1  ;;  %9639 = vmatprep.subr.mxu1 %v6409_v7  ;;  %v12176_v42 = vadd.f32 %v9106_v56, %v9026_v46  ;;  %v5768_v56 = vld [vmem:[#allocation3 + $0x127] sm:$0xff] }
 0x2ea   : > { %9587 = vmatprep.mubr.f32.mxu0 %v12055_v62  ;;  %9640 = vmatpush3.msra.mxu1 %v6409_v7  ;;  %v4380_v14 = vpop.f32.mrf.mxu0  ;;  %v5763_v62 = vld [vmem:[#allocation3 + $0xcf] sm:$0xff] }
 0x2eb   : > { %9511 = vmatmul.mubr.f32.gmra.mxu1 %v5761_v4  ;;  %v4175_v27 = vpop.f32.mrf.mxu1  ;;  %9641 = vmatprep.subr.mxu1 %v6408_v55  ;;  %v12179_v1 = vadd.f32 %v4380_v14, %v4155_v11  ;;  %v5766_v11 = vld [vmem:[#allocation3 + $0x107] sm:$0xff] }
 0x2ec   : > { %9513 = vmatprep.mubr.f32.mxu1 %v5762_v21  ;;  %9642 = vmatpush3.msra.mxu1 %v6408_v55  ;;  %v9109_v8 = vpop.f32.mrf.mxu0 }
 0x2ed   : > { %9588 = vmatmul.mubr.f32.gmra.mxu0 %v12060_v51  ;;  %v9035_v23 = vpop.f32.mrf.mxu1  ;;  %9643 = vmatprep.subr.mxu1 %v6407_v60  ;;  %v12182_v29 = vadd.f32 %v9109_v8, %v9029_v25  ;;  %v5770_v8 = vld [vmem:[#allocation3 + $0x147] sm:$0xff] }
 0x2ee   : > { %9590 = vmatprep.mubr.f32.mxu0 %v12063_v22  ;;  %9644 = vmatpush3.msra.mxu1 %v6407_v60  ;;  %v4390_v61 = vpop.f32.mrf.mxu0  ;;  %v5765_v22 = vld [vmem:[#allocation3 + $0xef] sm:$0xff] }
 0x2ef   : > { %9514 = vmatmul.mubr.f32.gmra.mxu1 %v5763_v62  ;;  %v4185_v58 = vpop.f32.mrf.mxu1  ;;  %9645 = vmatprep.subr.mxu1 %v6406_v17  ;;  %v12185_v43 = vadd.f32 %v4390_v61, %v4165_v13  ;;  %v6401_v13 = vld [vmem:[#allocation4 + $0x410] sm:$0xff]  ;;  %v6400_v60 = vld [vmem:[#allocation4 + $0x408] sm:$0xff] }
 0x2f0   : > { %9516 = vmatprep.mubr.f32.mxu1 %v5764_v0  ;;  %9646 = vmatpush3.msra.mxu1 %v6406_v17  ;;  %v9112_v51 = vpop.f32.mrf.mxu0 }
 0x2f1   : > { %9591 = vmatmul.mubr.f32.gmra.mxu0 %v12068_v39  ;;  %v9038_v46 = vpop.f32.mrf.mxu1  ;;  %9647 = vmatprep.subr.mxu1 %v6405_v52  ;;  %v12188_v34 = vadd.f32 %v9112_v51, %v9032_v35 }
 0x2f2   : > { %9593 = vmatprep.mubr.f32.mxu0 %v12071_v5  ;;  %9648 = vmatpush3.msra.mxu1 %v6405_v52  ;;  %v4400_v63 = vpop.f32.mrf.mxu0  ;;  %v5767_v5 = vld [vmem:[#allocation3 + $0x10f] sm:$0xff] }
 0x2f3   : > { %9517 = vmatmul.mubr.f32.gmra.mxu1 %v5765_v22  ;;  %v4195_v40 = vpop.f32.mrf.mxu1  ;;  %9649 = vmatprep.subr.mxu1 %v6404_v26  ;;  %v12191_v25 = vadd.f32 %v4400_v63, %v4175_v27  ;;  %v6399_v27 = vld [vmem:[#allocation4 + $0x400] sm:$0xff] }
 0x2f4   : > { %9519 = vmatprep.mubr.f32.mxu1 %v5766_v11  ;;  %9650 = vmatpush3.msra.mxu1 %v6404_v26  ;;  %v9115_v39 = vpop.f32.mrf.mxu0  ;;  %v5774_v63 = vld [vmem:[#allocation3 + $0x187] sm:$0xff] }
 0x2f5   : > { %9594 = vmatmul.mubr.f32.gmra.mxu0 %v12076_v19  ;;  %v9041_v7 = vpop.f32.mrf.mxu1  ;;  %9651 = vmatprep.subr.mxu1 %v6403_v20  ;;  %v12194_v48 = vadd.f32 %v9115_v39, %v9035_v23 }
 0x2f6   : > { %9596 = vmatprep.mubr.f32.mxu0 %v12079_v38  ;;  %9652 = vmatpush3.msra.mxu1 %v6403_v20  ;;  %v4410_v55 = vpop.f32.mrf.mxu0  ;;  %v5769_v38 = vld [vmem:[#allocation3 + $0x12f] sm:$0xff] }
 0x2f7   : > { %9520 = vmatmul.mubr.f32.gmra.mxu1 %v5767_v5  ;;  %v4205_v35 = vpop.f32.mrf.mxu1  ;;  %9653 = vmatprep.subr.mxu1 %v6402_v45  ;;  %v12197_v4 = vadd.f32 %v4410_v55, %v4185_v58  ;;  %v5772_v58 = vld [vmem:[#allocation3 + $0x167] sm:$0xff] }
 0x2f8   : > { %9522 = vmatprep.mubr.f32.mxu1 %v5768_v56  ;;  %9654 = vmatpush3.msra.mxu1 %v6402_v45  ;;  %v9118_v19 = vpop.f32.mrf.mxu0 }
 0x2f9   : > { %9597 = vmatmul.mubr.f32.gmra.mxu0 %v12084_v6  ;;  %v9044_v14 = vpop.f32.mrf.mxu1  ;;  %9655 = vmatprep.subr.mxu1 %v6401_v13  ;;  %v12200_v21 = vadd.f32 %v9118_v19, %v9038_v46 }
 0x2fa   : > { %9599 = vmatprep.mubr.f32.mxu0 %v12087_v33  ;;  %9656 = vmatpush3.msra.mxu1 %v6401_v13  ;;  %v4420_v17 = vpop.f32.mrf.mxu0  ;;  %v5771_v33 = vld [vmem:[#allocation3 + $0x14f] sm:$0xff] }
 0x2fb   : > { %9523 = vmatmul.mubr.f32.gmra.mxu1 %v5769_v38  ;;  %v4215_v23 = vpop.f32.mrf.mxu1  ;;  %9657 = vmatprep.subr.mxu1 %v6400_v60  ;;  %v12203_v62 = vadd.f32 %v4420_v17, %v4195_v40 }
 0x2fc   : > { %9525 = vmatprep.mubr.f32.mxu1 %v5770_v8  ;;  %9658 = vmatpush3.msra.mxu1 %v6400_v60  ;;  %v9121_v52 = vpop.f32.mrf.mxu0 }
 0x2fd   : > { %9600 = vmatmul.mubr.f32.gmra.mxu0 %v12092_v15  ;;  %v9047_v6 = vpop.f32.mrf.mxu1  ;;  %9659 = vmatprep.subr.mxu1 %v6399_v27  ;;  %v12206_v61 = vadd.f32 %v9121_v52, %v9041_v7 }
 0x2fe   : > { %9602 = vmatprep.mubr.f32.mxu0 %v12095_v59  ;;  %9660 = vmatpush3.msra.mxu1 %v6399_v27  ;;  %v4430_v0 = vpop.f32.mrf.mxu0  ;;  %v5773_v59 = vld [vmem:[#allocation3 + $0x16f] sm:$0xff] }
 0x2ff   : > { %9526 = vmatmul.mubr.f32.gmra.mxu1 %v5771_v33  ;;  %v12209_v26 = vpop.f32.mrf.mxu1  ;;  %9720 = vmatprep.subr.mxu1 %v12164_v2  ;;  %v12212_v51 = vadd.f32 %v4430_v0, %v4205_v35 }
 0x300   : > { %9528 = vmatprep.mubr.f32.mxu1 %v5772_v58  ;;  %v9124_v46 = vpop.f32.mrf.mxu0 }
 0x301   : > { %9603 = vmatmul.mubr.f32.gmra.mxu0 %v12100_v57  ;;  %v9050_v15 = vpop.f32.mrf.mxu1  ;;  %v12215_v22 = vadd.f32 %v9124_v46, %v9044_v14  ;;  %v5775_v57 = vld [vmem:[#allocation3 + $0x18f] sm:$0xff]  ;;  %v5784_v46 = vld [vmem:[#allocation3 + $0x227] sm:$0xff] }
 0x302   : > { %9605 = vmatprep.mubr.f32.mxu0 %v12103_v10  ;;  %v4440_v20 = vpop.f32.mrf.mxu0  ;;  %v5776_v10 = vld [vmem:[#allocation3 + $0x1a7] sm:$0xff] }
 0x303   : > { %9529 = vmatmul.mubr.f32.gmra.mxu1 %v5773_v59  ;;  %v12218_v11 = vpop.f32.mrf.mxu1  ;;  %v12220_v40 = vadd.f32 %v4440_v20, %v4215_v23  ;;  %v5785_v20 = vld [vmem:[#allocation3 + $0x22f] sm:$0xff] }
 0x304   : > { %9531 = vmatprep.mubr.f32.mxu1 %v5774_v63  ;;  %v9127_v45 = vpop.f32.mrf.mxu0 }
 0x305   : > { %9606 = vmatmul.mubr.f32.gmra.mxu0 %v12108_v9  ;;  %v9053_v39 = vpop.f32.mrf.mxu1  ;;  %v12223_v7 = vadd.f32 %v9127_v45, %v9047_v6  ;;  %v5777_v9 = vld [vmem:[#allocation3 + $0x1af] sm:$0xff] }
 0x306   : > { %9608 = vmatprep.mubr.f32.mxu0 %v12111_v16  ;;  %v12226_v5 = vpop.f32.mrf.mxu0  ;;  %v5778_v16 = vld [vmem:[#allocation3 + $0x1c7] sm:$0xff] }
 0x307   : > { %9532 = vmatmul.mubr.f32.gmra.mxu1 %v5775_v57  ;;  %v12228_v13 = vpop.f32.mrf.mxu1  ;;  %v6366_v57 = vld [vmem:[#allocation3 + $0x49] sm:$0xff] }
 0x308   : > { %9534 = vmatprep.mubr.f32.mxu1 %v5776_v10  ;;  %v9130_v55 = vpop.f32.mrf.mxu0 }
 0x309   : > { %9609 = vmatmul.mubr.f32.gmra.mxu0 %v12116_v47  ;;  %v9056_v56 = vpop.f32.mrf.mxu1  ;;  %v12231_v35 = vadd.f32 %v9130_v55, %v9050_v15  ;;  %v5779_v47 = vld [vmem:[#allocation3 + $0x1cf] sm:$0xff] }
 0x30a   : > { %9611 = vmatprep.mubr.f32.mxu0 %v12119_v30  ;;  %v12234_v60 = vpop.f32.mrf.mxu0  ;;  %v5780_v30 = vld [vmem:[#allocation3 + $0x1e7] sm:$0xff] }
 0x30b   : > { %9535 = vmatmul.mubr.f32.gmra.mxu1 %v5777_v9  ;;  %v12236_v19 = vpop.f32.mrf.mxu1  ;;  %v6367_v9 = vld [vmem:[#allocation3 + $0x51] sm:$0xff] }
 0x30c   : > { %9537 = vmatprep.mubr.f32.mxu1 %v5778_v16  ;;  %v9133_v14 = vpop.f32.mrf.mxu0 }
 0x30d   : > { %9612 = vmatmul.mubr.f32.gmra.mxu0 %v12124_v53  ;;  %v9059_v38 = vpop.f32.mrf.mxu1  ;;  %v12239_v27 = vadd.f32 %v9133_v14, %v9053_v39  ;;  %v5781_v53 = vld [vmem:[#allocation3 + $0x1ef] sm:$0xff] }
 0x30e   : > { %9614 = vmatprep.mubr.f32.mxu0 %v12127_v32  ;;  %v12242_v17 = vpop.f32.mrf.mxu0  ;;  %v6368_v14 = vld [vmem:[#allocation3 + $0x69] sm:$0xff] }
 0x30f   : > { %9538 = vmatmul.mubr.f32.gmra.mxu1 %v5779_v47  ;;  %v4265_v8 = vpop.f32.mrf.mxu1 }
 0x310   : > { %9540 = vmatprep.mubr.f32.mxu1 %v5780_v30  ;;  %v9136_v23 = vpop.f32.mrf.mxu0 }
 0x311   : > { %9615 = vmatmul.mubr.f32.gmra.mxu0 %v12132_v37  ;;  %v9062_v52 = vpop.f32.mrf.mxu1  ;;  %v12245_v6 = vadd.f32 %v9136_v23, %v9056_v56 }
 0x312   : > { %9617 = vmatprep.mubr.f32.mxu0 %v12135_v28  ;;  %v12248_v33 = vpop.f32.mrf.mxu0 }
 0x313   : > { %9541 = vmatmul.mubr.f32.gmra.mxu1 %v5781_v53  ;;  %v4275_v32 = vpop.f32.mrf.mxu1 }
 0x314   : > { %9543 = vmatprep.mubr.f32.mxu1 %v12034_v24  ;;  %v9139_v0 = vpop.f32.mrf.mxu0  ;;  %v6088_v24 = vld [vmem:[#allocation3 + $0x208] sm:$0xff] }
 0x315   : > { %9618 = vmatmul.mubr.f32.gmra.mxu0 %v12140_v12  ;;  %v9065_v58 = vpop.f32.mrf.mxu1  ;;  %v12252_v15 = vadd.f32 %v9139_v0, %v9059_v38  ;;  %v4371_v0 = vadd.f32 %v12173_v3, %v12162_v50 }
 0x316   : > { %9620 = vmatprep.mubr.f32.mxu0 %v12143_v41  ;;  %v4490_v37 = vpop.f32.mrf.mxu0 }
 0x317   : > { %9544 = vmatmul.mubr.f32.gmra.mxu1 %v12039_v54  ;;  %v4285_v28 = vpop.f32.mrf.mxu1  ;;  %v12256_v59 = vadd.f32 %v4490_v37, %v4265_v8 }
 0x318   : > { %9546 = vmatprep.mubr.f32.mxu1 %v5784_v46  ;;  %v9142_v63 = vpop.f32.mrf.mxu0 }
 0x319   : > { %9621 = vmatmul.mubr.f32.gmra.mxu0 %v12148_v36  ;;  %v9068_v45 = vpop.f32.mrf.mxu1  ;;  %v12259_v12 = vadd.f32 %v9142_v63, %v9062_v52  ;;  %v6369_v52 = vld [vmem:[#allocation3 + $0x71] sm:$0xff] }
 0x31a   : > { %9623 = vmatprep.mubr.f32.mxu0 %v6088_v24  ;;  %v4500_v39 = vpop.f32.mrf.mxu0  ;;  %v6371_v24 = vld [vmem:[#allocation3 + $0x91] sm:$0xff] }
 0x31b   : > { %9547 = vmatmul.mubr.f32.gmra.mxu1 %v5785_v20  ;;  %v4295_v41 = vpop.f32.mrf.mxu1  ;;  %v12261_v10 = vadd.f32 %v4500_v39, %v4275_v32  ;;  %v6372_v39 = vld [vmem:[#allocation3 + $0xa9] sm:$0xff] }
 0x31c   : > { %9661 = vmatprep.mubr.f32.mxu1 %v6366_v57  ;;  %v9145_v54 = vpop.f32.mrf.mxu0 }
 0x31d   : > { %9624 = vmatmul.mubr.f32.gmra.mxu0 %v12155_v18  ;;  %v9183_v55 = vpop.f32.mrf.mxu1  ;;  %v12264_v56 = vadd.f32 %v9145_v54, %v9065_v58 }
 0x31e   : > { %9626 = vmatprep.mubr.f32.mxu0 %v12164_v2  ;;  %v4804_v36 = vadd.f32 %v9183_v55, %v11921_v31  ;;  %v4510_v16 = vpop.f32.mrf.mxu0  ;;  %v6370_v31 = vld [vmem:[#allocation3 + $0x89] sm:$0xff] }
 0x31f   : > { %9662 = vmatmul.mubr.f32.vlgmr.msra.gmra.mxu1 %v6367_v9  ;;  %v4644_v38 = vpop.f32.mrf.mxu1  ;;  %v12268_v47 = vadd.f32 %v4510_v16, %v4285_v28 }
 0x320   : > { %9664 = vmatprep.mubr.f32.mxu1 %v6368_v14  ;;  %v9148_v30 = vpop.f32.mrf.mxu0  ;;  %v4803_v63 = vadd.f32 %v4644_v38, %v4371_v0 }
 0x321   : > { %9627 = vmatmul.mubr.f32.gmra.mxu0 %v12164_v2  ;;  %v9186_v8 = vpop.f32.mrf.mxu1  ;;  %v12271_v18 = vadd.f32 %v9148_v30, %v9068_v45 }
 0x322   : > { %v4806_v23 = vadd.f32 %v9186_v8, %v12176_v42  ;;  %v4520_v53 = vpop.f32.mrf.mxu0  ;;  %9717 = vmatprep.mubr.msk.f32.mxu0 %vm9952_vm2, %v12164_v2 }
 0x323   : > { %9665 = vmatmul.mubr.f32.gmra.mxu1 %v6369_v52  ;;  %v4654_v32 = vpop.f32.mrf.mxu1  ;;  %v12276_v58 = vadd.f32 %v4520_v53, %v4295_v41 }
 0x324   : > { %9667 = vmatprep.mubr.f32.mxu1 %v6370_v31  ;;  %v4805_v46 = vadd.f32 %v4654_v32, %v12179_v1  ;;  %v9263_v37 = vpop.f32.mrf.mxu0 }
 0x325   : > { %v9189_v28 = vpop.f32.mrf.mxu1  ;;  %v12279_v20 = vadd.f32 %v9263_v37, %v4804_v36  ;;  %v6373_v36 = vld [vmem:[#allocation3 + $0xb1] sm:$0xff] }
 0x326   : > { %v4808_v42 = vadd.f32 %v9189_v28, %v12182_v29  ;;  %v4950_v45 = vpop.f32.mrf.mxu0  ;;  %v6374_v29 = vld [vmem:[#allocation3 + $0xc9] sm:$0xff] }
 0x327   : > { %9668 = vmatmul.mubr.f32.gmra.mxu1 %v6371_v24  ;;  %v4664_v57 = vpop.f32.mrf.mxu1  ;;  %v12282_v54 = vadd.f32 %v4950_v45, %v4803_v63  ;;  %v6377_v63 = vld [vmem:[#allocation3 + $0xf1] sm:$0xff] }
 0x328   : > { %9670 = vmatprep.mubr.f32.mxu1 %v6372_v39  ;;  %v4807_v50 = vadd.f32 %v4664_v57, %v12185_v43  ;;  %v9266_v3 = vpop.f32.mrf.mxu0 }
 0x329   : > { %v9192_v41 = vpop.f32.mrf.mxu1  ;;  %v12285_v1 = vadd.f32 %v9266_v3, %v4806_v23  ;;  %v6375_v23 = vld [vmem:[#allocation3 + $0xd1] sm:$0xff] }
 0x32a   : > { %v4810_v55 = vadd.f32 %v9192_v41, %v12188_v34  ;;  %v4960_v9 = vpop.f32.mrf.mxu0  ;;  %v6376_v34 = vld [vmem:[#allocation3 + $0xe9] sm:$0xff]  ;;  %v6379_v41 = vld [vmem:[#allocation3 + $0x111] sm:$0xff] }
 0x32b   : > { %9671 = vmatmul.mubr.f32.gmra.mxu1 %v6373_v36  ;;  %v4674_v16 = vpop.f32.mrf.mxu1  ;;  %v12288_v14 = vadd.f32 %v4960_v9, %v4805_v46 }
 0x32c   : > { %9673 = vmatprep.mubr.f32.mxu1 %v6374_v29  ;;  %v4809_v38 = vadd.f32 %v4674_v16, %v12191_v25  ;;  %v9269_v30 = vpop.f32.mrf.mxu0 }
 0x32d   : > { %v9195_v8 = vpop.f32.mrf.mxu1  ;;  %v12291_v52 = vadd.f32 %v9269_v30, %v4808_v42 }
 0x32e   : > { %v4812_v43 = vadd.f32 %v9195_v8, %v12194_v48  ;;  %v4970_v53 = vpop.f32.mrf.mxu0  ;;  %v6378_v48 = vld [vmem:[#allocation3 + $0x109] sm:$0xff]  ;;  %v6381_v8 = vld [vmem:[#allocation3 + $0x131] sm:$0xff] }
 0x32f   : > { %9674 = vmatmul.mubr.f32.gmra.mxu1 %v6375_v23  ;;  %v4684_v31 = vpop.f32.mrf.mxu1  ;;  %v12294_v32 = vadd.f32 %v4970_v53, %v4807_v50 }
 0x330   : > { %9676 = vmatprep.mubr.f32.mxu1 %v6376_v34  ;;  %v4811_v0 = vadd.f32 %v4684_v31, %v12197_v4  ;;  %v9272_v46 = vpop.f32.mrf.mxu0 }
 0x331   : > { %v9198_v37 = vpop.f32.mrf.mxu1  ;;  %v12297_v28 = vadd.f32 %v9272_v46, %v4810_v55 }
 0x332   : > { %v4814_v25 = vadd.f32 %v9198_v37, %v12200_v21  ;;  %v4980_v42 = vpop.f32.mrf.mxu0  ;;  %v6380_v21 = vld [vmem:[#allocation3 + $0x129] sm:$0xff]  ;;  %v6383_v37 = vld [vmem:[#allocation3 + $0x151] sm:$0xff] }
 0x333   : > { %9677 = vmatmul.mubr.f32.gmra.mxu1 %v6377_v63  ;;  %v4694_v24 = vpop.f32.mrf.mxu1  ;;  %v12300_v45 = vadd.f32 %v4980_v42, %v4809_v38 }
 0x334   : > { %9679 = vmatprep.mubr.f32.mxu1 %v6378_v48  ;;  %v4813_v39 = vadd.f32 %v4694_v24, %v12203_v62  ;;  %v9275_v57 = vpop.f32.mrf.mxu0 }
 0x335   : > { %v9201_v50 = vpop.f32.mrf.mxu1  ;;  %v12303_v3 = vadd.f32 %v9275_v57, %v4812_v43  ;;  %v6385_v57 = vld [vmem:[#allocation3 + $0x171] sm:$0xff] }
 0x336   : > { %v4816_v4 = vadd.f32 %v9201_v50, %v12206_v61  ;;  %v4990_v55 = vpop.f32.mrf.mxu0  ;;  %v6382_v61 = vld [vmem:[#allocation3 + $0x149] sm:$0xff] }
 0x337   : > { %9680 = vmatmul.mubr.f32.gmra.mxu1 %v6379_v41  ;;  %v4704_v36 = vpop.f32.mrf.mxu1  ;;  %v12306_v9 = vadd.f32 %v4990_v55, %v4811_v0 }
 0x338   : > { %9682 = vmatprep.mubr.f32.mxu1 %v6380_v21  ;;  %v4815_v29 = vadd.f32 %v4704_v36, %v12212_v51  ;;  %v9278_v16 = vpop.f32.mrf.mxu0 }
 0x339   : > { %v9204_v38 = vpop.f32.mrf.mxu1  ;;  %v12309_v30 = vadd.f32 %v9278_v16, %v4814_v25 }
 0x33a   : > { %v4818_v62 = vadd.f32 %v9204_v38, %v12215_v22  ;;  %v5000_v43 = vpop.f32.mrf.mxu0  ;;  %v6384_v22 = vld [vmem:[#allocation3 + $0x169] sm:$0xff] }
 0x33b   : > { %9683 = vmatmul.mubr.f32.gmra.mxu1 %v6381_v8  ;;  %v4714_v23 = vpop.f32.mrf.mxu1  ;;  %v12312_v53 = vadd.f32 %v5000_v43, %v4813_v39  ;;  %v6388_v8 = vld [vmem:[#allocation3 + $0x1a9] sm:$0xff] }
 0x33c   : > { %9685 = vmatprep.mubr.f32.mxu1 %v6382_v61  ;;  %v4817_v34 = vadd.f32 %v4714_v23, %v12220_v40  ;;  %v9281_v31 = vpop.f32.mrf.mxu0  ;;  %v4461_v61 = vadd.f32 %v12234_v60, %v12218_v11 }
 0x33d   : > { %v9207_v0 = vpop.f32.mrf.mxu1  ;;  %v12315_v46 = vadd.f32 %v9281_v31, %v4816_v4  ;;  %v6386_v4 = vld [vmem:[#allocation3 + $0x189] sm:$0xff] }
 0x33e   : > { %v4820_v51 = vadd.f32 %v9207_v0, %v12223_v7  ;;  %v5010_v25 = vpop.f32.mrf.mxu0  ;;  %v4451_v7 = vadd.f32 %v12226_v5, %v12209_v26 }
 0x33f   : > { %9686 = vmatmul.mubr.f32.gmra.mxu1 %v6383_v37  ;;  %v4724_v63 = vpop.f32.mrf.mxu1  ;;  %v12318_v42 = vadd.f32 %v5010_v25, %v4815_v29  ;;  %v6390_v37 = vld [vmem:[#allocation3 + $0x1c9] sm:$0xff] }
 0x340   : > { %9688 = vmatprep.mubr.f32.mxu1 %v6384_v22  ;;  %v9284_v48 = vpop.f32.mrf.mxu0  ;;  %v4819_v16 = vadd.f32 %v4724_v63, %v4451_v7  ;;  %v4471_v22 = vadd.f32 %v12242_v17, %v12228_v13 }
 0x341   : > { %v9210_v24 = vpop.f32.mrf.mxu1  ;;  %v12320_v39 = vadd.f32 %v9284_v48, %v4818_v62  ;;  %v6387_v62 = vld [vmem:[#allocation3 + $0x191] sm:$0xff] }
 0x342   : > { %v4822_v40 = vadd.f32 %v9210_v24, %v12231_v35  ;;  %v5020_v50 = vpop.f32.mrf.mxu0 }
 0x343   : > { %9689 = vmatmul.mubr.f32.gmra.mxu1 %v6385_v57  ;;  %v4734_v41 = vpop.f32.mrf.mxu1  ;;  %v12325_v55 = vadd.f32 %v5020_v50, %v4817_v34  ;;  %v6391_v57 = vld [vmem:[#allocation3 + $0x1d1] sm:$0xff]  ;;  %v6392_v50 = vld [vmem:[#allocation3 + $0x1e9] sm:$0xff] }
 0x344   : > { %9691 = vmatprep.mubr.f32.mxu1 %v6386_v4  ;;  %v9287_v21 = vpop.f32.mrf.mxu0  ;;  %v4821_v31 = vadd.f32 %v4734_v41, %v4461_v61  ;;  %v4481_v41 = vadd.f32 %v12248_v33, %v12236_v19 }
 0x345   : > { %v9213_v36 = vpop.f32.mrf.mxu1  ;;  %v12327_v29 = vadd.f32 %v9287_v21, %v4820_v51  ;;  %v6389_v51 = vld [vmem:[#allocation3 + $0x1b1] sm:$0xff] }
 0x346   : > { %v4824_v38 = vadd.f32 %v9213_v36, %v12239_v27  ;;  %v5030_v35 = vpop.f32.mrf.mxu0 }
 0x347   : > { %9692 = vmatmul.mubr.f32.gmra.mxu1 %v6387_v62  ;;  %v4744_v43 = vpop.f32.mrf.mxu1  ;;  %v12332_v23 = vadd.f32 %v5030_v35, %v4819_v16 }
 0x348   : > { %9694 = vmatprep.mubr.f32.mxu1 %v6388_v8  ;;  %v9290_v26 = vpop.f32.mrf.mxu0  ;;  %v4823_v24 = vadd.f32 %v4744_v43, %v4471_v22 }
 0x349   : > { %v9216_v5 = vpop.f32.mrf.mxu1  ;;  %v12334_v34 = vadd.f32 %v9290_v26, %v4822_v40 }
 0x34a   : > { %v4826_v0 = vadd.f32 %v9216_v5, %v12245_v6  ;;  %v5040_v27 = vpop.f32.mrf.mxu0 }
 0x34b   : > { %9695 = vmatmul.mubr.f32.gmra.mxu1 %v6389_v51  ;;  %v4754_v25 = vpop.f32.mrf.mxu1  ;;  %v12339_v63 = vadd.f32 %v5040_v27, %v4821_v31  ;;  %v6397_v51 = vld [vmem:[#allocation3 + $0x231] sm:$0xff] }
 0x34c   : > { %9697 = vmatprep.mubr.f32.mxu1 %v6390_v37  ;;  %v9293_v11 = vpop.f32.mrf.mxu0  ;;  %v4825_v16 = vadd.f32 %v4754_v25, %v4481_v41 }
 0x34d   : > { %v9219_v60 = vpop.f32.mrf.mxu1  ;;  %v12341_v48 = vadd.f32 %v9293_v11, %v4824_v38  ;;  %v6393_v38 = vld [vmem:[#allocation3 + $0x1f1] sm:$0xff] }
 0x34e   : > { %v4828_v40 = vadd.f32 %v9219_v60, %v12252_v15  ;;  %v5050_v6 = vpop.f32.mrf.mxu0 }
 0x34f   : > { %9698 = vmatmul.mubr.f32.gmra.mxu1 %v6391_v57  ;;  %v4764_v4 = vpop.f32.mrf.mxu1  ;;  %v12346_v7 = vadd.f32 %v5050_v6, %v4823_v24 }
 0x350   : > { %9700 = vmatprep.mubr.f32.mxu1 %v6392_v50  ;;  %v4827_v13 = vadd.f32 %v4764_v4, %v12256_v59  ;;  %v9296_v17 = vpop.f32.mrf.mxu0  ;;  %v6396_v59 = vld [vmem:[#allocation3 + $0x229] sm:$0xff] }
 0x351   : > { %v9222_v21 = vpop.f32.mrf.mxu1  ;;  %v12349_v36 = vadd.f32 %v9296_v17, %v4826_v0 }
 0x352   : > { %v4830_v15 = vadd.f32 %v9222_v21, %v12259_v12  ;;  %v5060_v62 = vpop.f32.mrf.mxu0 }
 0x353   : > { %9701 = vmatmul.mubr.f32.gmra.mxu1 %v6393_v38  ;;  %v4774_v35 = vpop.f32.mrf.mxu1  ;;  %v12352_v8 = vadd.f32 %v5060_v62, %v4825_v16 }
 0x354   : > { %9703 = vmatprep.mubr.f32.mxu1 %v12159_v49  ;;  %v4829_v19 = vadd.f32 %v4774_v35, %v12261_v10  ;;  %v9299_v33 = vpop.f32.mrf.mxu0 }
 0x355   : > { %v9225_v43 = vpop.f32.mrf.mxu1  ;;  %v12356_v61 = vadd.f32 %v9299_v33, %v4828_v40 }
 0x356   : > { %v4832_v26 = vadd.f32 %v9225_v43, %v12264_v56  ;;  %v5070_v5 = vpop.f32.mrf.mxu0 }
 0x357   : > { %9704 = vmatmul.mubr.f32.gmra.mxu1 %v12167_v44  ;;  %v4784_v12 = vpop.f32.mrf.mxu1  ;;  %v12360_v31 = vadd.f32 %v5070_v5, %v4827_v13 }
 0x358   : > { %v4831_v0 = vadd.f32 %v4784_v12, %v12268_v47  ;;  %9706 = vmatprep.mubr.f32.mxu1 %v6396_v59  ;;  %v9302_v49 = vpop.f32.mrf.mxu0 }
 0x359   : > { %v9228_v27 = vpop.f32.mrf.mxu1  ;;  %v12363_v10 = vadd.f32 %v9302_v49, %v4830_v15 }
 0x35a   : > { %v4834_v37 = vadd.f32 %v9228_v27, %v12271_v18  ;;  %v5080_v25 = vpop.f32.mrf.mxu0 }
 0x35b   : > { %9707 = vmatmul.mubr.f32.gmra.mxu1 %v6397_v51  ;;  %v4794_v22 = vpop.f32.mrf.mxu1  ;;  %v12366_v56 = vadd.f32 %v5080_v25, %v4829_v19 }
 0x35c   : > { %v4833_v44 = vadd.f32 %v4794_v22, %v12276_v58  ;;  %9728 = vmatprep.mubr.msk.f32.mxu1 %vm9952_vm2, %v12164_v2 }
 0x35d   : > { %v9305_v11 = vpop.f32.mrf.mxu0 }
 0x35e   : > { %v12369_v60 = vadd.f32 %v9305_v11, %v4832_v26 }
 0x35f   : > { %v5090_v24 = vpop.f32.mrf.mxu0  ;;  %v9343_v47 = vpop.f32.mrf.mxu1 }
 0x360   : > { %v12371_v40 = vadd.f32 %v5090_v24, %v4831_v0  ;;  %v5416_v57 = vadd.f32 %v9343_v47, %v12279_v20 }
 0x361   : > { %v9308_v6 = vpop.f32.mrf.mxu0  ;;  %v5256_v50 = vpop.f32.mrf.mxu1 }
 0x362   : > { %v12374_v4 = vadd.f32 %v9308_v6, %v4834_v37  ;;  %v5415_v18 = vadd.f32 %v5256_v50, %v12282_v54 }
 0x363   : > { %v5100_v41 = vpop.f32.mrf.mxu0  ;;  %v9346_v13 = vpop.f32.mrf.mxu1 }
 0x364   : > { %v12377_v17 = vadd.f32 %v5100_v41, %v4833_v44  ;;  %v12380_v58 = vadd.f32 %v9346_v13, %v12285_v1 }
 0x365   : > { %v9423_v21 = vpop.f32.mrf.mxu0  ;;  %v5266_v16 = vpop.f32.mrf.mxu1 }
 0x366   : > { %v12382_v15 = vadd.f32 %v9423_v21, %v5416_v57  ;;  %v12385_v38 = vadd.f32 %v5266_v16, %v12288_v14 }
 0x367   : > { %v5562_v20 = vpop.f32.mrf.mxu0  ;;  %v9349_v62 = vpop.f32.mrf.mxu1 }
 0x368   : > { %v12387_v35 = vadd.f32 %v5562_v20, %v5415_v18  ;;  %v5420_v54 = vadd.f32 %v9349_v62, %v12291_v52 }
 0x369   : > { %v12390_v19 = vpop.f32.mrf.mxu0  ;;  %v5276_v33 = vpop.f32.mrf.mxu1 }
 0x36a   : > { %v5419_v43 = vadd.f32 %v5276_v33, %v12294_v32 }
 0x36b   : > { %v12393_v1 = vpop.f32.mrf.mxu0  ;;  %v9352_v59 = vpop.f32.mrf.mxu1 }
 0x36c   : > { %v12396_v26 = vadd.f32 %v9352_v59, %v12297_v28 }
 0x36d   : > { %v9429_v5 = vpop.f32.mrf.mxu0  ;;  %v5286_v14 = vpop.f32.mrf.mxu1 }
 0x36e   : > { %v12398_v12 = vadd.f32 %v9429_v5, %v5420_v54  ;;  %v12401_v0 = vadd.f32 %v5286_v14, %v12300_v45 }
 0x36f   : > { %v5582_v51 = vpop.f32.mrf.mxu0  ;;  %v9355_v52 = vpop.f32.mrf.mxu1 }
 0x370   : > { %v12403_v49 = vadd.f32 %v5582_v51, %v5419_v43  ;;  %v5424_v27 = vadd.f32 %v9355_v52, %v12303_v3 }
 0x371   : > { %v12406_v32 = vpop.f32.mrf.mxu0  ;;  %v5296_v37 = vpop.f32.mrf.mxu1 }
 0x372   : > { %v5423_v25 = vadd.f32 %v5296_v37, %v12306_v9 }
 0x373   : > { %v12409_v28 = vpop.f32.mrf.mxu0  ;;  %v9358_v22 = vpop.f32.mrf.mxu1 }
 0x374   : > { %v12412_v44 = vadd.f32 %v9358_v22, %v12309_v30 }
 0x375   : > { %v9435_v11 = vpop.f32.mrf.mxu0  ;;  %v5306_v45 = vpop.f32.mrf.mxu1 }
 0x376   : > { %v12414_v24 = vadd.f32 %v9435_v11, %v5424_v27  ;;  %v12417_v47 = vadd.f32 %v5306_v45, %v12312_v53 }
 0x377   : > { %v5602_v57 = vpop.f32.mrf.mxu0  ;;  %v9361_v3 = vpop.f32.mrf.mxu1 }
 0x378   : > { %v12419_v6 = vadd.f32 %v5602_v57, %v5423_v25  ;;  %v5428_v50 = vadd.f32 %v9361_v3, %v12315_v46 }
 0x379   : > { %v12422_v9 = vpop.f32.mrf.mxu0  ;;  %v5316_v18 = vpop.f32.mrf.mxu1 }
 0x37a   : > { %v5427_v41 = vadd.f32 %v5316_v18, %v12318_v42 }
 0x37b   : > { %v12425_v30 = vpop.f32.mrf.mxu0  ;;  %v9364_v13 = vpop.f32.mrf.mxu1 }
 0x37c   : > { %v12428_v21 = vadd.f32 %v9364_v13, %v12320_v39 }
 0x37d   : > { %v9441_v16 = vpop.f32.mrf.mxu0  ;;  %v5326_v53 = vpop.f32.mrf.mxu1 }
 0x37e   : > { %v12430_v20 = vadd.f32 %v9441_v16, %v5428_v50  ;;  %v12433_v62 = vadd.f32 %v5326_v53, %v12325_v55 }
 0x37f   : > { %v5622_v54 = vpop.f32.mrf.mxu0  ;;  %v9367_v46 = vpop.f32.mrf.mxu1 }
 0x380   : > { %v12435_v33 = vadd.f32 %v5622_v54, %v5427_v41  ;;  %v5432_v43 = vadd.f32 %v9367_v46, %v12327_v29 }
 0x381   : > { %v12438_v42 = vpop.f32.mrf.mxu0  ;;  %v5336_v59 = vpop.f32.mrf.mxu1 }
 0x382   : > { %v5431_v5 = vadd.f32 %v5336_v59, %v12332_v23 }
 0x383   : > { %v12441_v39 = vpop.f32.mrf.mxu0  ;;  %v9370_v14 = vpop.f32.mrf.mxu1 }
 0x384   : > { %v12448_v55 = vadd.f32 %v9370_v14, %v12334_v34 }
 0x385   : > { %v9447_v51 = vpop.f32.mrf.mxu0  ;;  %v5346_v29 = vpop.f32.mrf.mxu1 }
 0x386   : > { %v12450_v52 = vadd.f32 %v9447_v51, %v5432_v43  ;;  %v12453_v27 = vadd.f32 %v5346_v29, %v12339_v63 }
 0x387   : > { %v5642_v23 = vpop.f32.mrf.mxu0  ;;  %v9373_v37 = vpop.f32.mrf.mxu1 }
 0x388   : > { %v12455_v25 = vadd.f32 %v5642_v23, %v5431_v5  ;;  %v5436_v22 = vadd.f32 %v9373_v37, %v12341_v48 }
 0x389   : > { %v12458_v11 = vpop.f32.mrf.mxu0  ;;  %v5356_v45 = vpop.f32.mrf.mxu1 }
 0x38a   : > { %v5435_v2 = vadd.f32 %v5356_v45, %v12346_v7 }
 0x38b   : > { %v12461_v34 = vpop.f32.mrf.mxu0  ;;  %v9376_v57 = vpop.f32.mrf.mxu1 }
 0x38c   : > { %13224 = vst [vmem:[#allocation36_spill] sm:$0xff] %v12461_v34  ;;  %v12464_v3 = vadd.f32 %v9376_v57, %v12349_v36 }
 0x38d   : > { %v9453_v50 = vpop.f32.mrf.mxu0  ;;  %v5366_v63 = vpop.f32.mrf.mxu1 }
 0x38e   : > { %13225 = vst [vmem:[#allocation37_spill] sm:$0xff] %v12464_v3  ;;  %v12466_v18 = vadd.f32 %v9453_v50, %v5436_v22  ;;  %v12469_v41 = vadd.f32 %v5366_v63, %v12352_v8 }
 0x38f   : > { %v5662_v13 = vpop.f32.mrf.mxu0  ;;  %v9379_v48 = vpop.f32.mrf.mxu1 }
 0x390   : > { %13226 = vst [vmem:[#allocation10_spill] sm:$0xff] %v12469_v41  ;;  %v12471_v16 = vadd.f32 %v5662_v13, %v5435_v2  ;;  %v5440_v53 = vadd.f32 %v9379_v48, %v12356_v61 }
 0x391   : > { %v12474_v7 = vpop.f32.mrf.mxu0  ;;  %v5376_v54 = vpop.f32.mrf.mxu1 }
 0x392   : > { %13227 = vst [vmem:[#allocation11_spill] sm:$0xff] %v12474_v7  ;;  %v5439_v46 = vadd.f32 %v5376_v54, %v12360_v31 }
 0x393   : > { %v12477_v36 = vpop.f32.mrf.mxu0  ;;  %v9382_v43 = vpop.f32.mrf.mxu1 }
 0x394   : > { %13228 = vst [vmem:[#allocation17_spill] sm:$0xff] %v12477_v36  ;;  %v12480_v59 = vadd.f32 %v9382_v43, %v12363_v10 }
 0x395   : > { %v9459_v5 = vpop.f32.mrf.mxu0  ;;  %v5386_v8 = vpop.f32.mrf.mxu1 }
 0x396   : > { %13229 = vst [vmem:[#allocation25_spill] sm:$0xff] %v12480_v59  ;;  %v12482_v14 = vadd.f32 %v9459_v5, %v5440_v53  ;;  %v12485_v51 = vadd.f32 %v5386_v8, %v12366_v56 }
 0x397   : > { %v5682_v29 = vpop.f32.mrf.mxu0  ;;  %v9385_v61 = vpop.f32.mrf.mxu1 }
 0x398   : > { %13230 = vst [vmem:[#allocation13_spill] sm:$0xff] %v12485_v51  ;;  %v12487_v23 = vadd.f32 %v5682_v29, %v5439_v46  ;;  %v5444_v37 = vadd.f32 %v9385_v61, %v12369_v60 }
 0x399   : > { %v12490_v31 = vpop.f32.mrf.mxu0  ;;  %v5396_v22 = vpop.f32.mrf.mxu1 }
 0x39a   : > { %13231 = vst [vmem:[#allocation12_spill] sm:$0xff] %v12490_v31  ;;  %v5443_v45 = vadd.f32 %v5396_v22, %v12371_v40 }
 0x39b   : > { %v12493_v10 = vpop.f32.mrf.mxu0  ;;  %v9388_v2 = vpop.f32.mrf.mxu1 }
 0x39c   : > { %13232 = vst [vmem:[#allocation14_spill] sm:$0xff] %v12493_v10  ;;  %v12496_v57 = vadd.f32 %v9388_v2, %v12374_v4 }
 0x39d   : > { %v9465_v50 = vpop.f32.mrf.mxu0  ;;  %v5406_v56 = vpop.f32.mrf.mxu1 }
 0x39e   : > { %13233 = vst [vmem:[#allocation19_spill] sm:$0xff] %v12496_v57  ;;  %v12498_v63 = vadd.f32 %v9465_v50, %v5444_v37  ;;  %v12501_v13 = vadd.f32 %v5406_v56, %v12377_v17 }
 0x39f   : > { %v5702_v48 = vpop.f32.mrf.mxu0  ;;  %v9503_v60 = vpop.f32.mrf.mxu1 }
 0x3a0   : > { %13234 = vst [vmem:[#allocation26_spill] sm:$0xff] %v12501_v13  ;;  %v12503_v53 = vadd.f32 %v5702_v48, %v5443_v45  ;;  %v12506_v54 = vadd.f32 %v9503_v60, %v12382_v15 }
 0x3a1   : > { %v12508_v40 = vpop.f32.mrf.mxu0  ;;  %v5869_v46 = vpop.f32.mrf.mxu1 }
 0x3a2   : > { %13235 = vst [vmem:[#allocation15_spill] sm:$0xff] %v12508_v40  ;;  %v12511_v4 = vadd.f32 %v5869_v46, %v12387_v35 }
 0x3a3   : > { %v12513_v43 = vpop.f32.mrf.mxu0  ;;  %v12515_v5 = vpop.f32.mrf.mxu1 }
 0x3a4   : > { %13236 = vst [vmem:[#allocation16_spill] sm:$0xff] %v12513_v43 }
 0x3a5   : > { %v12517_v8 = vpop.f32.mrf.mxu0  ;;  %v12519_v17 = vpop.f32.mrf.mxu1 }
 0x3a7   : > { %v12521_v29 = vpop.f32.mrf.mxu0  ;;  %v9509_v61 = vpop.f32.mrf.mxu1 }
 0x3a8   : > { %v12524_v15 = vadd.f32 %v9509_v61, %v12398_v12 }
 0x3a9   : > { %v12526_v37 = vpop.f32.mrf.mxu0  ;;  %v5889_v22 = vpop.f32.mrf.mxu1 }
 0x3aa   : > { %v12529_v35 = vadd.f32 %v5889_v22, %v12403_v49 }
 0x3ab   : > { %v12531_v45 = vpop.f32.mrf.mxu0  ;;  %v12533_v2 = vpop.f32.mrf.mxu1 }
 0x3ad   : > { %v12535_v50 = vpop.f32.mrf.mxu0  ;;  %v12537_v56 = vpop.f32.mrf.mxu1 }
 0x3af   : > { %v9515_v48 = vpop.f32.mrf.mxu1  ;;  %v12539_v60 = vpop.f32.mrf.mxu0 }
 0x3b0   : > { %v12542_v12 = vadd.f32 %v9515_v48, %v12414_v24 }
 0x3b1   : > { %v5909_v46 = vpop.f32.mrf.mxu1  ;;  %v12549_v22 = vpop.f32.mrf.mxu0 }
 0x3b2   : > { %v12545_v61 = vadd.f32 %v5909_v46, %v12419_v6 }
 0x3b3   : > { %v12547_v49 = vpop.f32.mrf.mxu1  ;;  %v12553_v40 = vpop.f32.mrf.mxu0 }
 0x3b5   : > { %v12551_v43 = vpop.f32.mrf.mxu1  ;;  %v12563_v6 = vpop.f32.mrf.mxu0 }
 0x3b7   : > { %v9521_v13 = vpop.f32.mrf.mxu1  ;;  %v12567_v31 = vpop.f32.mrf.mxu0 }
 0x3b8   : > { %v12556_v57 = vadd.f32 %v9521_v13, %v12430_v20 }
 0x3b9   : > { %v5929_v10 = vpop.f32.mrf.mxu1 }
 0x3ba   : > { %v12559_v24 = vadd.f32 %v5929_v10, %v12435_v33  ;;  %v12577_v33 = vpop.f32.mrf.mxu0 }
 0x3bb   : > { %v12561_v48 = vpop.f32.mrf.mxu1 }
 0x3bc   : > { %v12581_v7 = vpop.f32.mrf.mxu0 }
 0x3bd   : > { %v12565_v46 = vpop.f32.mrf.mxu1 }
 0x3bf   : > { %v9527_v51 = vpop.f32.mrf.mxu1 }
 0x3c0   : > { %v12570_v59 = vadd.f32 %v9527_v51, %v12450_v52 }
 0x3c1   : > { %v5949_v36 = vpop.f32.mrf.mxu1 }
 0x3c2   : > { %13237 = vst [vmem:[#allocation18_spill] sm:$0xff] %v12570_v59  ;;  %v12573_v20 = vadd.f32 %v5949_v36, %v12455_v25  ;;  %v12591_v25 = vpop.f32.mrf.mxu0 }
 0x3c3   : > { %v12575_v13 = vpop.f32.mrf.mxu1 }
 0x3c4   : > { %13238 = vst [vmem:[#allocation20_spill] sm:$0xff] %v12573_v20  ;;  %13239 = vst [vmem:[#allocation21_spill] sm:$0xff] %v12575_v13  ;;  %v12595_v13 = vpop.f32.mrf.mxu0 }
 0x3c5   : > { %v12579_v10 = vpop.f32.mrf.mxu1 }
 0x3c6   : > { %13240 = vst [vmem:[#allocation28_spill] sm:$0xff] %v12579_v10 }
 0x3c7   : > { %v9533_v41 = vpop.f32.mrf.mxu1 }
 0x3c8   : > { %v12584_v3 = vadd.f32 %v9533_v41, %v12466_v18 }
 0x3c9   : > { %v5969_v34 = vpop.f32.mrf.mxu1 }
 0x3ca   : > { %13241 = vst [vmem:[#allocation27_spill] sm:$0xff] %v12584_v3  ;;  %v12587_v52 = vadd.f32 %v5969_v34, %v12471_v16  ;;  %v12605_v34 = vpop.f32.mrf.mxu0 }
 0x3cb   : > { %v12589_v51 = vpop.f32.mrf.mxu1 }
 0x3cc   : > { %13242 = vst [vmem:[#allocation29_spill] sm:$0xff] %v12587_v52  ;;  %13243 = vst [vmem:[#allocation22_spill] sm:$0xff] %v12589_v51  ;;  %v12609_v51 = vpop.f32.mrf.mxu0 }
 0x3cd   : > { %v12593_v36 = vpop.f32.mrf.mxu1 }
 0x3ce   : > { %13244 = vst [vmem:[#allocation31_spill] sm:$0xff] %v12593_v36 }
 0x3cf   : > { %v9539_v20 = vpop.f32.mrf.mxu1 }
 0x3d0   : > { %v12598_v10 = vadd.f32 %v9539_v20, %v12482_v14 }
 0x3d1   : > { %v5989_v59 = vpop.f32.mrf.mxu1 }
 0x3d2   : > { %v12601_v18 = vadd.f32 %v5989_v59, %v12487_v23  ;;  %v12619_v59 = vpop.f32.mrf.mxu0 }
 0x3d3   : > { %v12603_v41 = vpop.f32.mrf.mxu1 }
 0x3d4   : > { %13245 = vst [vmem:[#allocation30_spill] sm:$0xff] %v12601_v18  ;;  %13246 = vst [vmem:[#allocation81_spill] sm:$0xff] %v12603_v41  ;;  %v5724_v18 = vadd.f32 %v12390_v19, %v12380_v58  ;;  %v5723_v41 = vadd.f32 %v12393_v1, %v12385_v38  ;;  %v12639_v38 = vld [vmem:[%s12929_s3 + $0x2] ss:$0 sm:$0xff] }
 0x3d5   : > { %v12607_v16 = vpop.f32.mrf.mxu1 }
 0x3d6   : > { %13247 = vst [vmem:[#allocation79_spill] sm:$0xff] %v12607_v16 }
 0x3d7   : > { %v9545_v52 = vpop.f32.mrf.mxu1 }
 0x3d8   : > { %v12612_v36 = vadd.f32 %v9545_v52, %v12498_v63  ;;  %v6335_v63 = vadd.f32 %v12517_v8, %v12506_v54  ;;  %v6031_v52 = vadd.f32 %v12515_v5, %v5724_v18 }
 0x3d9   : > { %v6009_v3 = vpop.f32.mrf.mxu1 }
 0x3da   : > { %v12615_v14 = vadd.f32 %v6009_v3, %v12503_v53  ;;  %v12630_v3 = vpop.f32.mrf.mxu0 }
 0x3db   : > { %v12617_v20 = vpop.f32.mrf.mxu1 }
 0x3dc   : > { %13248 = vst [vmem:[#allocation32_spill] sm:$0xff] %v12615_v14  ;;  %13249 = vst [vmem:[#allocation35_spill] sm:$0xff] %v12617_v20  ;;  %v6334_v14 = vadd.f32 %v12521_v29, %v12511_v4  ;;  %v6030_v20 = vadd.f32 %v12519_v17, %v5723_v41  ;;  %v12642_v54 = vpop.f32.mrf.mxu0  ;;  %v5728_v4 = vadd.f32 %v12406_v32, %v12396_v26 }
 0x3dd   : > { %v12621_v23 = vpop.f32.mrf.mxu1  ;;  %v5727_v41 = vadd.f32 %v12409_v28, %v12401_v0  ;;  %v6339_v26 = vadd.f32 %v12535_v50, %v12524_v15  ;;  %v6338_v0 = vadd.f32 %v12539_v60, %v12529_v35 }
 0x3de   : > { %13250 = vst [vmem:[#allocation84_spill] sm:$0xff] %v12621_v23  ;;  %v6337_v23 = vadd.f32 %v12526_v37, %v6031_v52  ;;  %v6336_v1 = vadd.f32 %v12531_v45, %v6030_v20  ;;  %v12654_v45 = vld [vmem:[%s12929_s3 + $0x3] ss:$0 sm:$0xff]  ;;  %v12658_v32 = vpop.f32.mrf.mxu0 }
 0x3df   : > { %v9663_v16 = vpop.f32.mrf.mxu1 }
 0x3e0   : > { %v6641_v58 = vadd.f32 %v9663_v16, %v6335_v63  ;;  %v6035_v16 = vadd.f32 %v12533_v2, %v5728_v4  ;;  %v6034_v2 = vadd.f32 %v12537_v56, %v5727_v41  ;;  %v5732_v56 = vadd.f32 %v12422_v9, %v12412_v44 }
 0x3e1   : > { %v6481_v53 = vpop.f32.mrf.mxu1  ;;  %v5731_v41 = vadd.f32 %v12425_v30, %v12417_v47  ;;  %v12694_v47 = vld [vmem:[%s12930_s4] sm:$0xff]  ;;  %v6342_v30 = vadd.f32 %v12567_v31, %v12545_v61 }
 0x3e2   : > { %v6640_v5 = vadd.f32 %v6481_v53, %v6334_v14  ;;  %v6677_v37 = vmul.f32 %v12639_v38, %v6641_v58  ;;  %v6341_v28 = vadd.f32 %v12549_v22, %v6035_v16  ;;  %v6343_v16 = vadd.f32 %v12563_v6, %v12542_v12 }
 0x3e3   : > { %v9666_v19 = vpop.f32.mrf.mxu1  ;;  %v6039_v44 = vadd.f32 %v12547_v49, %v5732_v56  ;;  %v6038_v49 = vadd.f32 %v12551_v43, %v5731_v41 }
 0x3e4   : > { %v6643_v8 = vadd.f32 %v9666_v19, %v6337_v23  ;;  %v6676_v20 = vmul.f32 %v12639_v38, %v6640_v5  ;;  %v6713_v53 = vadd.f32 %v12654_v45, %v6677_v37  ;;  %v6340_v19 = vadd.f32 %v12553_v40, %v6034_v2  ;;  %v12670_v5 = vpop.f32.mrf.mxu0 }
 0x3e5   : > { %v6491_v29 = vpop.f32.mrf.mxu1  ;;  %v6345_v12 = vadd.f32 %v12577_v33, %v6039_v44 }
 0x3e6   : > { %v6679_v17 = vmul.f32 %v12639_v38, %v6643_v8  ;;  %v6642_v18 = vadd.f32 %v6491_v29, %v6336_v1  ;;  %v6712_v8 = vadd.f32 %v12654_v45, %v6676_v20  ;;  %v12675_v29 = vld [vmem:[#allocation3 + $0x8] sm:$0xff]  ;;  %v6745_v37 = vmax.f32 %v6713_v53, 0.0 }
 0x3e7   : > { %v9669_v14 = vpop.f32.mrf.mxu1  ;;  %v6344_v53 = vadd.f32 %v12581_v7, %v6038_v49  ;;  %v5736_v7 = vadd.f32 %v12438_v42, %v12428_v21  ;;  %v13251_v49 = vld [vmem:[#allocation36_spill] sm:$0xff] }
 0x3e8   : > { %v6715_v23 = vadd.f32 %v12654_v45, %v6679_v17  ;;  %v6678_v63 = vmul.f32 %v12639_v38, %v6642_v18  ;;  %v6645_v50 = vadd.f32 %v9669_v14, %v6339_v26  ;;  %v12686_v14 = vpop.f32.mrf.mxu0  ;;  %v6744_v26 = vmax.f32 %v6712_v8, 0.0 }
 0x3e9   : > { %v6501_v52 = vpop.f32.mrf.mxu1  ;;  %v6043_v56 = vadd.f32 %v12561_v48, %v5736_v7 }
 0x3ea   : > { %v6747_v58 = vmax.f32 %v6715_v23, 0.0  ;;  %v6714_v15 = vadd.f32 %v12654_v45, %v6678_v63  ;;  %v6644_v35 = vadd.f32 %v6501_v52, %v6338_v0  ;;  %v6681_v40 = vmul.f32 %v12639_v38, %v6645_v50  ;;  %v12707_v31 = vpop.f32.mrf.mxu0 }
 0x3eb   : > { %v9672_v1 = vpop.f32.mrf.mxu1 }
 0x3ec   : > { %v6746_v4 = vmax.f32 %v6714_v15, 0.0  ;;  %v6647_v60 = vadd.f32 %v9672_v1, %v6341_v28  ;;  %9710 = vmatpush3.msra.mxu0 %v6747_v58  ;;  %v6680_v20 = vmul.f32 %v12639_v38, %v6644_v35  ;;  %v6717_v0 = vadd.f32 %v12654_v45, %v6681_v40  ;;  %v12723_v21 = vpop.f32.mrf.mxu0 }
 0x3ed   : > { %v6511_v22 = vpop.f32.mrf.mxu1  ;;  %9711 = vmatprep.subr.mxu0 %v12675_v29  ;;  %v5735_v35 = vadd.f32 %v12441_v39, %v12433_v62  ;;  %v6346_v62 = vadd.f32 %v12595_v13, %v12559_v24  ;;  %v6349_v39 = vadd.f32 %v12605_v34, %v6043_v56 }
 0x3ee   : > { %v6683_v17 = vmul.f32 %v12639_v38, %v6647_v60  ;;  %v6646_v18 = vadd.f32 %v6511_v22, %v6340_v19  ;;  %9712 = vmatpush3.msra.mxu0 %v6746_v4  ;;  %v6716_v43 = vadd.f32 %v12654_v45, %v6680_v20  ;;  %v6749_v19 = vmax.f32 %v6717_v0, 0.0  ;;  %v12739_v24 = vpop.f32.mrf.mxu0  ;;  %v13252_v0 = vld [vmem:[#allocation18_spill] sm:$0xff] }
 0x3ef   : > { %v9675_v9 = vpop.f32.mrf.mxu1  ;;  %9713 = vmatprep.subr.mxu0 %v12675_v29  ;;  %v6347_v60 = vadd.f32 %v12591_v25, %v12556_v57  ;;  %v6042_v57 = vadd.f32 %v12565_v46, %v5735_v35 }
 0x3f0   : > { %v6719_v23 = vadd.f32 %v12654_v45, %v6683_v17  ;;  %v6682_v63 = vmul.f32 %v12639_v38, %v6646_v18  ;;  %9714 = vmatpush3.msra.mxu0 %v6745_v37  ;;  %v6649_v52 = vadd.f32 %v9675_v9, %v6343_v16  ;;  %v6748_v42 = vmax.f32 %v6716_v43, 0.0 }
 0x3f1   : > { %v6521_v6 = vpop.f32.mrf.mxu1  ;;  %9715 = vmatprep.subr.mxu0 %v12675_v29  ;;  %v6348_v44 = vadd.f32 %v12609_v51, %v6042_v57  ;;  %v5740_v51 = vadd.f32 %v12458_v11, %v12448_v55  ;;  %v12755_v55 = vpop.f32.mrf.mxu0 }
 0x3f2   : > { %v6751_v28 = vmax.f32 %v6719_v23, 0.0  ;;  %v6718_v2 = vadd.f32 %v12654_v45, %v6682_v63  ;;  %9716 = vmatpush3.msra.mxu0 %v6744_v26  ;;  %v6648_v33 = vadd.f32 %v6521_v6, %v6342_v30  ;;  %v6685_v1 = vmul.f32 %v12639_v38, %v6649_v52 }
 0x3f3   : > { %v9678_v58 = vpop.f32.mrf.mxu1  ;;  %9731 = vmatprep.subr.mxu0 %v12675_v29  ;;  %9718 = vmatmul.mubr.msk.f32.vlgmr.msra.gmra.mxu0 %vm6777_vm3, %v12694_v47  ;;  %v5739_v6 = vadd.f32 %v13251_v49, %v12453_v27 }
 0x3f4   : > { %v6750_v61 = vmax.f32 %v6718_v2, 0.0  ;;  %v6651_v15 = vadd.f32 %v9678_v58, %v6345_v12  ;;  %9721 = vmatpush3.msra.mxu1 %v6751_v28  ;;  %9739 = vmatprep.mubr.msk.f32.mxu0 %vm9952_vm2, %v12675_v29  ;;  %v6684_v37 = vmul.f32 %v12639_v38, %v6648_v33  ;;  %v6721_v25 = vadd.f32 %v12654_v45, %v6685_v1  ;;  %v13253_v2 = vld [vmem:[#allocation21_spill] sm:$0xff]  ;;  %v13254_v33 = vld [vmem:[#allocation20_spill] sm:$0xff] }
 0x3f5   : > { %v6531_v50 = vpop.f32.mrf.mxu1  ;;  %9722 = vmatprep.subr.mxu1 %v12675_v29  ;;  %v6351_v28 = vadd.f32 %v12619_v59, %v13252_v0  ;;  %v6047_v52 = vadd.f32 %v13253_v2, %v5740_v51  ;;  %v6350_v27 = vadd.f32 %v12630_v3, %v13254_v33  ;;  %v12771_v3 = vpop.f32.mrf.mxu0  ;;  %v13264_v33 = vld [vmem:[#allocation25_spill] sm:$0xff] }
 0x3f6   : > { %v6687_v8 = vmul.f32 %v12639_v38, %v6651_v15  ;;  %v6650_v4 = vadd.f32 %v6531_v50, %v6344_v53  ;;  %9723 = vmatpush3.msra.mxu1 %v6750_v61  ;;  %v6720_v46 = vadd.f32 %v12654_v45, %v6684_v37  ;;  %v6753_v23 = vmax.f32 %v6721_v25, 0.0  ;;  %v13255_v15 = vld [vmem:[#allocation28_spill] sm:$0xff]  ;;  %v13256_v37 = vld [vmem:[#allocation37_spill] sm:$0xff]  ;;  %v13258_v25 = vld [vmem:[#allocation10_spill] sm:$0xff] }
 0x3f7   : > { %v9681_v22 = vpop.f32.mrf.mxu1  ;;  %9724 = vmatprep.subr.mxu1 %v12675_v29  ;;  %v6353_v59 = vadd.f32 %v12642_v54, %v6047_v52  ;;  %v6046_v7 = vadd.f32 %v13255_v15, %v5739_v6 }
 0x3f8   : > { %v6723_v40 = vadd.f32 %v12654_v45, %v6687_v8  ;;  %v6686_v17 = vmul.f32 %v12639_v38, %v6650_v4  ;;  %9725 = vmatpush3.msra.mxu1 %v6749_v19  ;;  %v6653_v16 = vadd.f32 %v9681_v22, %v6347_v60  ;;  %v6752_v11 = vmax.f32 %v6720_v46, 0.0 }
 0x3f9   : > { %v6541_v48 = vpop.f32.mrf.mxu1  ;;  %9726 = vmatprep.subr.mxu1 %v12675_v29  ;;  %v6352_v35 = vadd.f32 %v12658_v32, %v6046_v7 }
 0x3fa   : > { %v6755_v18 = vmax.f32 %v6723_v40, 0.0  ;;  %v6722_v41 = vadd.f32 %v12654_v45, %v6686_v17  ;;  %9727 = vmatpush3.msra.mxu1 %v6748_v42  ;;  %v6652_v34 = vadd.f32 %v6541_v48, %v6346_v62  ;;  %v6689_v63 = vmul.f32 %v12639_v38, %v6653_v16  ;;  %v13257_v40 = vld [vmem:[#allocation11_spill] sm:$0xff] }
 0x3fb   : > { %v9684_v9 = vpop.f32.mrf.mxu1  ;;  %9742 = vmatprep.subr.mxu1 %v12675_v29  ;;  %9729 = vmatmul.mubr.msk.f32.vlgmr.msra.gmra.mxu1 %vm6777_vm3, %v12694_v47  ;;  %v5744_v32 = vadd.f32 %v13257_v40, %v13256_v37  ;;  %v13260_v16 = vld [vmem:[#allocation27_spill] sm:$0xff] }
 0x3fc   : > { %v6754_v13 = vmax.f32 %v6722_v41, 0.0  ;;  %v6655_v26 = vadd.f32 %v9684_v9, %v6349_v39  ;;  %9732 = vmatpush3.msra.mxu0 %v6755_v18  ;;  %9750 = vmatprep.mubr.msk.f32.mxu1 %vm9952_vm2, %v12675_v29  ;;  %v6688_v58 = vmul.f32 %v12639_v38, %v6652_v34  ;;  %v6725_v19 = vadd.f32 %v12654_v45, %v6689_v63  ;;  %v13259_v18 = vld [vmem:[#allocation17_spill] sm:$0xff]  ;;  %v13261_v9 = vld [vmem:[#allocation22_spill] sm:$0xff]  ;;  %v6305_v34 = vpop.f32.mrf.mxu0 }
 0x3fd   : > { %v6551_v20 = vpop.f32.mrf.mxu1  ;;  %9733 = vmatprep.subr.mxu0 %v12675_v29  ;;  %v5743_v41 = vadd.f32 %v13259_v18, %v13258_v25  ;;  %v6051_v46 = vadd.f32 %v13261_v9, %v5744_v32  ;;  %v13262_v63 = vld [vmem:[#allocation29_spill] sm:$0xff] }
 0x3fe   : > { %v6691_v30 = vmul.f32 %v12639_v38, %v6655_v26  ;;  %v6654_v12 = vadd.f32 %v6551_v20, %v6348_v44  ;;  %9734 = vmatpush3.msra.mxu0 %v6754_v13  ;;  %v6724_v54 = vadd.f32 %v12654_v45, %v6688_v58  ;;  %v6757_v62 = vmax.f32 %v6725_v19, 0.0 }
 0x3ff   : > { %v9687_v53 = vpop.f32.mrf.mxu1  ;;  %9735 = vmatprep.subr.mxu0 %v12675_v29  ;;  %v6355_v44 = vadd.f32 %v12670_v5, %v13260_v16  ;;  %v13263_v5 = vld [vmem:[#allocation31_spill] sm:$0xff] }
 0x400   : > { %v6727_v43 = vadd.f32 %v12654_v45, %v6691_v30  ;;  %v6690_v61 = vmul.f32 %v12639_v38, %v6654_v12  ;;  %9736 = vmatpush3.msra.mxu0 %v6753_v23  ;;  %v6657_v4 = vadd.f32 %v9687_v53, %v6351_v28  ;;  %v6756_v26 = vmax.f32 %v6724_v54, 0.0 }
 0x401   : > { %v6561_v50 = vpop.f32.mrf.mxu1  ;;  %9737 = vmatprep.subr.mxu0 %v12675_v29  ;;  %v6354_v30 = vadd.f32 %v12686_v14, %v13262_v63  ;;  %v6357_v12 = vadd.f32 %v12707_v31, %v6051_v46  ;;  %v6050_v49 = vadd.f32 %v13263_v5, %v5743_v41  ;;  %v9625_v14 = vpop.f32.mrf.mxu0  ;;  %v13273_v5 = vld [vmem:[#allocation26_spill] sm:$0xff] }
 0x402   : > { %v6759_v1 = vmax.f32 %v6727_v43, 0.0  ;;  %v6726_v8 = vadd.f32 %v12654_v45, %v6690_v61  ;;  %9738 = vmatpush3.msra.mxu0 %v6752_v11  ;;  %v6656_v22 = vadd.f32 %v6561_v50, %v6350_v27  ;;  %v6693_v39 = vmul.f32 %v12639_v38, %v6657_v4  ;;  %v13265_v27 = vld [vmem:[#allocation12_spill] sm:$0xff] }
 0x403   : > { %v9690_v60 = vpop.f32.mrf.mxu1  ;;  %9753 = vmatprep.subr.mxu0 %v12675_v29  ;;  %9740 = vmatmul.mubr.msk.f32.vlgmr.msra.gmra.mxu0 %vm6777_vm3, %v12694_v47  ;;  %v6356_v53 = vadd.f32 %v12723_v21, %v6050_v49  ;;  %v13274_v49 = vld [vmem:[#allocation16_spill] sm:$0xff] }
 0x404   : > { %v6758_v56 = vmax.f32 %v6726_v8, 0.0  ;;  %v6659_v42 = vadd.f32 %v9690_v60, %v6353_v59  ;;  %9743 = vmatpush3.msra.mxu1 %v6759_v1  ;;  %9761 = vmatprep.mubr.msk.f32.mxu0 %vm9952_vm2, %v12675_v29  ;;  %v6692_v51 = vmul.f32 %v12639_v38, %v6656_v22  ;;  %v6729_v0 = vadd.f32 %v12654_v45, %v6693_v39  ;;  %v13266_v1 = vld [vmem:[#allocation13_spill] sm:$0xff]  ;;  %v13267_v8 = vld [vmem:[#allocation14_spill] sm:$0xff]  ;;  %v6315_v22 = vpop.f32.mrf.mxu0 }
 0x405   : > { %v6571_v17 = vpop.f32.mrf.mxu1  ;;  %9744 = vmatprep.subr.mxu1 %v12675_v29  ;;  %v5748_v59 = vadd.f32 %v13265_v27, %v13264_v33  ;;  %v5747_v4 = vadd.f32 %v13267_v8, %v13266_v1  ;;  %v13268_v60 = vld [vmem:[#allocation81_spill] sm:$0xff]  ;;  %v13277_v27 = vld [vmem:[#allocation84_spill] sm:$0xff] }
 0x406   : > { %v6695_v57 = vmul.f32 %v12639_v38, %v6659_v42  ;;  %v6658_v48 = vadd.f32 %v6571_v17, %v6352_v35  ;;  %9745 = vmatpush3.msra.mxu1 %v6758_v56  ;;  %v6728_v31 = vadd.f32 %v12654_v45, %v6692_v51  ;;  %v6761_v15 = vmax.f32 %v6729_v0, 0.0  ;;  %v13269_v17 = vld [vmem:[#allocation30_spill] sm:$0xff]  ;;  %v13272_v51 = vld [vmem:[#allocation15_spill] sm:$0xff] }
 0x407   : > { %v9693_v13 = vpop.f32.mrf.mxu1  ;;  %9746 = vmatprep.subr.mxu1 %v12675_v29  ;;  %v6359_v35 = vadd.f32 %v12739_v24, %v12598_v10  ;;  %v6055_v54 = vadd.f32 %v13268_v60, %v5748_v59  ;;  %v13270_v10 = vld [vmem:[#allocation79_spill] sm:$0xff]  ;;  %v6363_v0 = vadd.f32 %v9625_v14, %v12612_v36 }
 0x408   : > { %v6731_v20 = vadd.f32 %v12654_v45, %v6695_v57  ;;  %v6694_v23 = vmul.f32 %v12639_v38, %v6658_v48  ;;  %9747 = vmatpush3.msra.mxu1 %v6757_v62  ;;  %v6661_v52 = vadd.f32 %v9693_v13, %v6355_v44  ;;  %v6760_v42 = vmax.f32 %v6728_v31, 0.0 }
 0x409   : > { %v6581_v6 = vpop.f32.mrf.mxu1  ;;  %9748 = vmatprep.subr.mxu1 %v12675_v29  ;;  %v6358_v62 = vadd.f32 %v12755_v55, %v13269_v17  ;;  %v6361_v39 = vadd.f32 %v12771_v3, %v6055_v54  ;;  %v6054_v24 = vadd.f32 %v13270_v10, %v5747_v4  ;;  %v9628_v55 = vpop.f32.mrf.mxu0 }
 0x40a   : > { %v6763_v28 = vmax.f32 %v6731_v20, 0.0  ;;  %v6730_v2 = vadd.f32 %v12654_v45, %v6694_v23  ;;  %9749 = vmatpush3.msra.mxu1 %v6756_v26  ;;  %v6660_v43 = vadd.f32 %v6581_v6, %v6354_v30  ;;  %v6697_v7 = vmul.f32 %v12639_v38, %v6661_v52  ;;  %v13271_v26 = vld [vmem:[#allocation19_spill] sm:$0xff] }
 0x40b   : > { %v9696_v11 = vpop.f32.mrf.mxu1  ;;  %9764 = vmatprep.subr.mxu1 %v12675_v29  ;;  %9751 = vmatmul.mubr.msk.f32.vlgmr.msra.gmra.mxu1 %vm6777_vm3, %v12694_v47  ;;  %v6360_v16 = vadd.f32 %v6305_v34, %v6054_v24  ;;  %v5752_v20 = vadd.f32 %v13272_v51, %v13271_v26  ;;  %v5751_v6 = vadd.f32 %v13274_v49, %v13273_v5 }
 0x40c   : > { %v6762_v58 = vmax.f32 %v6730_v2, 0.0  ;;  %v6663_v61 = vadd.f32 %v9696_v11, %v6357_v12  ;;  %9754 = vmatpush3.msra.mxu0 %v6763_v28  ;;  %9772 = vmatprep.mubr.msk.f32.mxu1 %vm9952_vm2, %v12675_v29  ;;  %v6696_v37 = vmul.f32 %v12639_v38, %v6660_v43  ;;  %v6733_v48 = vadd.f32 %v12654_v45, %v6697_v7  ;;  %v13275_v28 = vld [vmem:[#allocation35_spill] sm:$0xff] }
 0x40d   : > { %v6591_v21 = vpop.f32.mrf.mxu1  ;;  %9755 = vmatprep.subr.mxu0 %v12675_v29  ;;  %v6059_v2 = vadd.f32 %v13275_v28, %v5752_v20  ;;  %v6058_v59 = vadd.f32 %v13277_v27, %v5751_v6 }
 0x40e   : > { %v6699_v50 = vmul.f32 %v12639_v38, %v6663_v61  ;;  %v6662_v19 = vadd.f32 %v6591_v21, %v6356_v53  ;;  %9756 = vmatpush3.msra.mxu0 %v6762_v58  ;;  %v6732_v3 = vadd.f32 %v12654_v45, %v6696_v37  ;;  %v6765_v23 = vmax.f32 %v6733_v48, 0.0  ;;  %v6325_v53 = vpop.f32.mrf.mxu0  ;;  %v13276_v61 = vld [vmem:[#allocation32_spill] sm:$0xff] }
 0x40f   : > { %v9699_v56 = vpop.f32.mrf.mxu1  ;;  %9757 = vmatprep.subr.mxu0 %v12675_v29  ;;  %v6362_v33 = vadd.f32 %v6315_v22, %v13276_v61  ;;  %v6365_v21 = vadd.f32 %v9628_v55, %v6059_v2 }
 0x410   : > { %v6735_v40 = vadd.f32 %v12654_v45, %v6699_v50  ;;  %v6698_v32 = vmul.f32 %v12639_v38, %v6662_v19  ;;  %9758 = vmatpush3.msra.mxu0 %v6761_v15  ;;  %v6665_v41 = vadd.f32 %v9699_v56, %v6359_v35  ;;  %v6764_v11 = vmax.f32 %v6732_v3, 0.0 }
 0x411   : > { %v6601_v57 = vpop.f32.mrf.mxu1  ;;  %9759 = vmatprep.subr.mxu0 %v12675_v29  ;;  %v6364_v19 = vadd.f32 %v6325_v53, %v6058_v59 }
 0x412   : > { %v6767_v25 = vmax.f32 %v6735_v40, 0.0  ;;  %v6734_v18 = vadd.f32 %v12654_v45, %v6698_v32  ;;  %9760 = vmatpush3.msra.mxu0 %v6760_v42  ;;  %v6664_v46 = vadd.f32 %v6601_v57, %v6358_v62  ;;  %v6701_v63 = vmul.f32 %v12639_v38, %v6665_v41 }
 0x413   : > { %v9702_v44 = vpop.f32.mrf.mxu1  ;;  %9775 = vmatprep.subr.mxu0 %v12675_v29  ;;  %9762 = vmatmul.mubr.msk.f32.vlgmr.msra.gmra.mxu0 %vm6777_vm3, %v12694_v47 }
 0x414   : > { %v6766_v9 = vmax.f32 %v6734_v18, 0.0  ;;  %v6667_v13 = vadd.f32 %v9702_v44, %v6361_v39  ;;  %9765 = vmatpush3.msra.mxu1 %v6767_v25  ;;  %9783 = vmatprep.mubr.msk.f32.mxu0 %vm9952_vm2, %v12675_v29  ;;  %v6700_v31 = vmul.f32 %v12639_v38, %v6664_v46  ;;  %v6737_v14 = vadd.f32 %v12654_v45, %v6701_v63 }
 0x415   : > { %v6611_v34 = vpop.f32.mrf.mxu1  ;;  %9766 = vmatprep.subr.mxu1 %v12675_v29 }
 0x416   : > { %v6703_v30 = vmul.f32 %v12639_v38, %v6667_v13  ;;  %v6666_v12 = vadd.f32 %v6611_v34, %v6360_v16  ;;  %9767 = vmatpush3.msra.mxu1 %v6766_v9  ;;  %v6736_v8 = vadd.f32 %v12654_v45, %v6700_v31  ;;  %v6769_v56 = vmax.f32 %v6737_v14, 0.0 }
 0x417   : > { %v9705_v52 = vpop.f32.mrf.mxu1  ;;  %9768 = vmatprep.subr.mxu1 %v12675_v29 }
 0x418   : > { %v6739_v58 = vadd.f32 %v12654_v45, %v6703_v30  ;;  %v6702_v43 = vmul.f32 %v12639_v38, %v6666_v12  ;;  %9769 = vmatpush3.msra.mxu1 %v6765_v23  ;;  %v6669_v50 = vadd.f32 %v9705_v52, %v6363_v0  ;;  %v6768_v40 = vmax.f32 %v6736_v8, 0.0 }
 0x419   : > { %v6621_v36 = vpop.f32.mrf.mxu1  ;;  %9770 = vmatprep.subr.mxu1 %v12675_v29 }
 0x41a   : > { %v6771_v15 = vmax.f32 %v6739_v58, 0.0  ;;  %v6738_v7 = vadd.f32 %v12654_v45, %v6702_v43  ;;  %9771 = vmatpush3.msra.mxu1 %v6764_v11  ;;  %v6668_v35 = vadd.f32 %v6621_v36, %v6362_v33  ;;  %v6705_v22 = vmul.f32 %v12639_v38, %v6669_v50 }
 0x41b   : > { %v9708_v1 = vpop.f32.mrf.mxu1  ;;  %9786 = vmatprep.subr.mxu1 %v12675_v29  ;;  %9773 = vmatmul.mubr.msk.f32.vlgmr.msra.gmra.mxu1 %vm6777_vm3, %v12694_v47 }
 0x41c   : > { %v6770_v4 = vmax.f32 %v6738_v7, 0.0  ;;  %v6671_v60 = vadd.f32 %v9708_v1, %v6365_v21  ;;  %9776 = vmatpush3.msra.mxu0 %v6771_v15  ;;  %9794 = vmatprep.mubr.msk.f32.mxu1 %vm9952_vm2, %v12675_v29  ;;  %v6704_v32 = vmul.f32 %v12639_v38, %v6668_v35  ;;  %v6741_v39 = vadd.f32 %v12654_v45, %v6705_v22 }
 0x41d   : > { %v6631_v54 = vpop.f32.mrf.mxu1  ;;  %9777 = vmatprep.subr.mxu0 %v12675_v29 }
 0x41e   : > { %v6707_v42 = vmul.f32 %v12639_v38, %v6671_v60  ;;  %v6670_v37 = vadd.f32 %v6631_v54, %v6364_v19  ;;  %9778 = vmatpush3.msra.mxu0 %v6770_v4  ;;  %v6740_v57 = vadd.f32 %v12654_v45, %v6704_v32 }
 0x41f   : > { %9779 = vmatprep.subr.mxu0 %v12675_v29 }
 0x420   : > { %v6743_v17 = vadd.f32 %v12654_v45, %v6707_v42  ;;  %v6706_v62 = vmul.f32 %v12639_v38, %v6670_v37  ;;  %9780 = vmatpush3.msra.mxu0 %v6769_v56  ;;  %v6773_v38 = vmax.f32 %v6741_v39, 0.0  ;;  %v6772_v25 = vmax.f32 %v6740_v57, 0.0 }
 0x421   : > { %9781 = vmatprep.subr.mxu0 %v12675_v29 }
 0x422   : > { %v6775_v10 = vmax.f32 %v6743_v17, 0.0  ;;  %v6742_v24 = vadd.f32 %v12654_v45, %v6706_v62  ;;  %9782 = vmatpush3.msra.mxu0 %v6768_v40 }
 0x423   : > { %9784 = vmatmul.mubr.msk.f32.vlgmr.msra.gmra.mxu0 %vm6777_vm3, %v12694_v47 }
 0x424   : > { %v6774_v48 = vmax.f32 %v6742_v24, 0.0  ;;  %9787 = vmatpush3.msra.mxu1 %v6775_v10 }
 0x425   : > { %9788 = vmatprep.subr.mxu1 %v12675_v29 }
 0x426   : > { %9789 = vmatpush3.msra.mxu1 %v6774_v48 }
 0x427   : > { %9790 = vmatprep.subr.mxu1 %v12675_v29 }
 0x428   : > { %9791 = vmatpush3.msra.mxu1 %v6773_v38 }
 0x429   : > { %9792 = vmatprep.subr.mxu1 %v12675_v29 }
 0x42a   : > { %9793 = vmatpush3.msra.mxu1 %v6772_v25 }
 0x42b   : > { %9795 = vmatmul.mubr.msk.f32.vlgmr.msra.gmra.mxu1 %vm6777_vm3, %v12694_v47 }
 0x4b3   : > { %v6847_v45 = vpop.f32.mrf.mxu0 }
 0x4b4   : > { %6851 = vst [vmem:[%s232_s16] sm:$0xff] %v6847_v45 }
 0x4b5   : > { %v9719_v18 = vpop.f32.mrf.mxu0 }
 0x4bb   : > { %v6918_v41 = vpop.f32.mrf.mxu1 }
 0x4bc   : > { %6922 = vst [vmem:[%s232_s16 + $0x8] sm:$0xff] %v6918_v41 }
 0x4bd   : > { %v9730_v16 = vpop.f32.mrf.mxu1 }
 0x4c3   : > { %v6989_v44 = vpop.f32.mrf.mxu0 }
 0x4c4   : > { %6993 = vst [vmem:[%s232_s16 + $0x10] sm:$0xff] %v6989_v44 }
 0x4c5   : > { %v9741_v55 = vpop.f32.mrf.mxu0 }
 0x4cb   : > { %v7060_v3 = vpop.f32.mrf.mxu1 }
 0x4cc   : > { %7064 = vst [vmem:[%s232_s16 + $0x18] sm:$0xff] %v7060_v3 }
 0x4cd   : > { %v9752_v29 = vpop.f32.mrf.mxu1 }
 0x4d3   : > { %v7131_v9 = vpop.f32.mrf.mxu0 }
 0x4d4   : > { %7135 = vst [vmem:[%s232_s16 + $0x20] sm:$0xff] %v7131_v9 }
 0x4d5   : > { %v9763_v47 = vpop.f32.mrf.mxu0 }
 0x4db   : > { %v7202_v46 = vpop.f32.mrf.mxu1 }
 0x4dc   : > { %7206 = vst [vmem:[%s232_s16 + $0x28] sm:$0xff] %v7202_v46 }
 0x4dd   : > { %v9774_v13 = vpop.f32.mrf.mxu1 }
 0x4e3   : > { %v7273_v26 = vpop.f32.mrf.mxu0 }
 0x4e4   : > { %7277 = vst [vmem:[%s232_s16 + $0x30] sm:$0xff] %v7273_v26 }
 0x4e5   : > { %v9785_v51 = vpop.f32.mrf.mxu0 }
 0x4eb   : > { %v7344_v20 = vpop.f32.mrf.mxu1 }
 0x4ec   : > { %7348 = vst [vmem:[%s232_s16 + $0x38] sm:$0xff] %v7344_v20 }
 0x4ed   : > { %v9796_v34 = vpop.f32.mrf.mxu1 }
 0x4ee   : > { %9895 = shalt.err (!%p9892_p0)
}
 0x4ef   : > { %s9896_s10 = scalar_lea.hbm %s12882_s30, 1024  ;;  %s9900_s13 = scalar_lea.hbm %s12931_s5, 2048 }
 0x4f0   : > { %p9897_p1 = scmp.ne.s32.totalorder %s12882_s30, %s9896_s10  ;;  %p9901_p4 = scmp.lt.s32.totalorder %s12882_s30, %s12931_s5 }
 0x4f1   : > { %p9902_p7 = scmp.lt.s32.totalorder %s9900_s13, %s9896_s10 }
 0x4f2   : > { %p9898_p2 = pnand %p9897_p1, %p10024_p5 }
 0x4f3   : > { %p9903_p8 = por %p9902_p7, %p9901_p4 }
 0x4f4   : > { %p9899_p3 = pneg %p9898_p2 }
 0x4f6   : > { %p9904_p6 = pnand %p9903_p8, %p9899_p3 }
 0x4f8   : > { %9907 = shalt.err (!%p9904_p6)
}
 0x4f9   : > { %s9954_s16 = smov 128   ;;  %s9955_s23 = smov 8  }
 0x4fa   : > { %9801 = dma.vmem_to_hbm [thread:$0]  (%p10024_p5), %s12877_s17, 1024, %s12882_s30, %s12886_s6, %s9954_s16, %s9954_s16, %s9955_s23  }
 0x4fb PF: > { %p9813_p9 = scmp.ge.s32.totalorder %s9946_s21, 2  ;;  %s7378_s25 = sand.u32 1, %s9934_s18  }
 0x4fc   : > { %p13278_p10 = scmp.ne.s32.totalorder %s12966_s29, 0  ;;  %s7379_s26 = scalar_lea.sflag [#allocation6], %s7378_s25 }
 0x4fe   : > { %p9808_p11 = pnand %p9813_p9, %p13278_p10 }
 0x500   : > { %p9809_p12 = pneg %p9808_p11 }
 0x502   : > { %9929 = dma.done.wait (%p9809_p12), %s7379_s26, 1024  }
 0x503   : > { %9931 = vsyncadd (%p9809_p12), %s7379_s26, 4294966272  ;;  %p16_p13 = scmp.ge.s32.totalorder %s10011_s24, 4   ;;  %s13279_s18 = smov %s9938_s19 }
 0x504   : > { %s13280_s19 = smov %s9942_s20  ;;  %s13281_s20 = smov %s10022_s27 }
 0x505   : > { %s13282_s21 = smov %s10011_s24  ;;  %18 = sbr.rel (!%p16_p13) target bundleno = 4 (0x4), region = 102 }
 0x50a   :  { %7384 = vsyncpa [#allocation5], 1 }
 0x50b   :  { %7386 = vsyncpa [#allocation5 + $0x1], 1 }
 0x50c   :  { %7387 = vsyncpa [#allocation6], 1 }
 0x50d   :  { %7389 = vsyncpa [#allocation6 + $0x1], 1 }

</bundles_post_ra>
